<compile_context>
chip_gen: v7x
topology: tpu7x:2x2x1
jax: 0.10.0
libtpu: 0.0.40
codegen_flags: <defaults>
</compile_context>

<pallas_src>
import functools
import math

import jax
import jax.numpy as jnp
from jax import lax
from jax.experimental import pallas as pl
from jax.experimental.pallas import tpu as pltpu

LN_EPS = 1e-5                      # torch.nn.LayerNorm default
_ROW_TILE_CAP = 1024               # rows per grid step (mem-bound sweet spot, review: 512-2048)
_VMEM_LIMIT = 32 * 1024 * 1024     # explicit; safe on v5e/v6e (128 MiB) and v7x (64 MiB / TC)


def _silu(v):
    # v * sigmoid(v); exp maps to the EUP slot and is safe for large |v| in f32.
    return v * (1.0 / (1.0 + jnp.exp(-v)))


def _row_tile(n, cap=_ROW_TILE_CAP):
    """Row tile: as large as the cap allows, multiple of 8, and (when n > 8) at least two
    grid steps so the row axis shards across v7x's two TensorCores."""
    if n <= 8:
        return n
    t = min(cap, n)
    if t == n:                     # would be a single grid step
        t = -(-n // 2)
    t = max(8, (t // 8) * 8)
    return min(t, n)


def _mosaic_params():
    return pltpu.CompilerParams(
        dimension_semantics=("parallel",),
        vmem_limit_bytes=_VMEM_LIMIT)


# --------------------------------------------------------------------------------------- #
# Kernel 1: PatchMerging — fused 2x2 space-to-depth + LayerNorm(4C) (folded) + Linear.     #
# --------------------------------------------------------------------------------------- #
def _patch_merge_kernel(top_ref, bot_ref, wt_ref, wb_ref, bias_ref, o_ref):
    # top/bot: (tr, W2, 2C)   even / odd image rows of `tr` output row-pairs
    # wt/wb:   (2C, D)        gamma-folded halves of reduction weight (kernel channel order)
    # bias:    (1, D)         beta @ W.T            o: (tr*W2, D)
    top = top_ref[...].astype(jnp.float32)
    bot = bot_ref[...].astype(jnp.float32)
    four_c = top.shape[-1] + bot.shape[-1]

    s = jnp.sum(top, axis=-1, keepdims=True) + jnp.sum(bot, axis=-1, keepdims=True)
    mean = s / four_c
    tc = top - mean
    bc = bot - mean
    var = (jnp.sum(tc * tc, axis=-1, keepdims=True)
           + jnp.sum(bc * bc, axis=-1, keepdims=True)) / four_c
    inv = lax.rsqrt(var + LN_EPS)

    tr, w2, c2 = tc.shape
    # Collapse (tr, W2) -> rows; layout-free when W2 % 8 == 0 (true for typical maps).
    tn = (tc * inv).reshape(tr * w2, c2).astype(wt_ref.dtype)
    bn = (bc * inv).reshape(tr * w2, c2).astype(wb_ref.dtype)

    acc = jnp.dot(tn, wt_ref[...], preferred_element_type=jnp.float32)
    acc += jnp.dot(bn, wb_ref[...], preferred_element_type=jnp.float32)
    acc += bias_ref[...].astype(jnp.float32)
    o_ref[...] = acc.astype(o_ref.dtype)


def _patch_merge(x4, w_top, w_bot, bias, *, w2, out_dtype):
    r, _, _, c2 = x4.shape
    d = w_top.shape[1]
    n_pix = r * w2
    tr = _row_tile(r, cap=max(1, _ROW_TILE_CAP // max(w2, 1)))
    grid = (pl.cdiv(r, tr),)
    return pl.pallas_call(
        _patch_merge_kernel,
        out_shape=jax.ShapeDtypeStruct((n_pix, d), out_dtype),
        grid_spec=pltpu.PrefetchScalarGridSpec(
            num_scalar_prefetch=0,
            grid=grid,
            in_specs=[
                pl.BlockSpec((tr, None, w2, c2), lambda i: (i, 0, 0, 0)),   # even rows
                pl.BlockSpec((tr, None, w2, c2), lambda i: (i, 1, 0, 0)),   # odd rows
                pl.BlockSpec((c2, d), lambda i: (0, 0)),
                pl.BlockSpec((c2, d), lambda i: (0, 0)),
                pl.BlockSpec((1, d), lambda i: (0, 0)),
            ],
            out_specs=pl.BlockSpec((tr * w2, d), lambda i: (i, 0)),
        ),
        compiler_params=_mosaic_params(),
    )(x4, x4, w_top, w_bot, bias)


# --------------------------------------------------------------------------------------- #
# Kernel 2: VSS pre-norm (folded) + in_proj; emits x_part and silu(z).                     #
# --------------------------------------------------------------------------------------- #
def _in_proj_kernel(x_ref, wx_ref, wz_ref, bx_ref, bz_ref, xp_ref, sz_ref):
    x = x_ref[...].astype(jnp.float32)                        # (tn, D)
    mean = jnp.mean(x, axis=-1, keepdims=True)
    xc = x - mean
    var = jnp.mean(xc * xc, axis=-1, keepdims=True)
    xn = (xc * lax.rsqrt(var + LN_EPS)).astype(wx_ref.dtype)
    xp = jnp.dot(xn, wx_ref[...], preferred_element_type=jnp.float32)
    xp += bx_ref[...].astype(jnp.float32)
    z = jnp.dot(xn, wz_ref[...], preferred_element_type=jnp.float32)
    z += bz_ref[...].astype(jnp.float32)
    xp_ref[...] = xp.astype(xp_ref.dtype)
    sz_ref[...] = _silu(z).astype(sz_ref.dtype)


def _in_proj(xm, wx, wz, bx, bz, *, out_dtype):
    n, d = xm.shape
    ci = wx.shape[1]
    tn = _row_tile(n)
    grid = (pl.cdiv(n, tn),)
    return pl.pallas_call(
        _in_proj_kernel,
        out_shape=(jax.ShapeDtypeStruct((n, ci), out_dtype),
                   jax.ShapeDtypeStruct((n, ci), out_dtype)),
        grid_spec=pltpu.PrefetchScalarGridSpec(
            num_scalar_prefetch=0,
            grid=grid,
            in_specs=[
                pl.BlockSpec((tn, d), lambda i: (i, 0)),
                pl.BlockSpec((d, ci), lambda i: (0, 0)),
                pl.BlockSpec((d, ci), lambda i: (0, 0)),
                pl.BlockSpec((1, ci), lambda i: (0, 0)),
                pl.BlockSpec((1, ci), lambda i: (0, 0)),
            ],
            out_specs=(pl.BlockSpec((tn, ci), lambda i: (i, 0)),
                       pl.BlockSpec((tn, ci), lambda i: (i, 0))),
        ),
        compiler_params=_mosaic_params(),
    )(xm, wx, wz, bx, bz)


# --------------------------------------------------------------------------------------- #
# Kernel 3: depthwise 3x3 conv + bias + SiLU (one batch image per grid step).              #
# --------------------------------------------------------------------------------------- #
def _dwconv_kernel(x_ref, w_ref, b_ref, o_ref):
    # x: (H2+2, W2+2, Ci) spatially zero-padded image; w: (3, 3, Ci); b: (1, 1, Ci)
    h2, w2, ci = o_ref.shape
    w = w_ref[...].astype(jnp.float32)
    acc = jnp.zeros((h2, w2, ci), jnp.float32)
    for di in range(3):                                       # 9 shifted MACs on the VPU
        for dj in range(3):
            win = x_ref[di:di + h2, dj:dj + w2, :].astype(jnp.float32)
            acc += win * w[di:di + 1, dj:dj + 1, :]
    acc += b_ref[...].astype(jnp.float32)
    o_ref[...] = _silu(acc).astype(o_ref.dtype)


def _dwconv_silu(xp_pad, w_dw, b_dw, *, out_dtype):
    b, hp, wp, ci = xp_pad.shape
    h2, w2 = hp - 2, wp - 2
    return pl.pallas_call(
        _dwconv_kernel,
        out_shape=jax.ShapeDtypeStruct((b, h2, w2, ci), out_dtype),
        grid_spec=pltpu.PrefetchScalarGridSpec(
            num_scalar_prefetch=0,
            grid=(b,),
            in_specs=[
                pl.BlockSpec((None, hp, wp, ci), lambda i: (i, 0, 0, 0)),
                pl.BlockSpec((3, 3, ci), lambda i: (0, 0, 0)),
                pl.BlockSpec((1, 1, ci), lambda i: (0, 0, 0)),
            ],
            out_specs=pl.BlockSpec((None, h2, w2, ci), lambda i: (i, 0, 0, 0)),
        ),
        compiler_params=_mosaic_params(),
    )(xp_pad, w_dw, b_dw)


# --------------------------------------------------------------------------------------- #
# Kernel 4: mamba MLP + LN(Ci) + silu(z) gate + out_proj + residual + final LN(D).         #
# --------------------------------------------------------------------------------------- #
def _vss_tail_kernel(t_ref, sz_ref, xm_ref, wm1_ref, bm1_ref, wm2_ref,
                     g2_ref, b2_ref, wo_ref, gf_ref, bf_ref, o_ref):
    f32 = jnp.float32
    # mamba: Linear -> SiLU -> Linear (dt_bias folded into bm1)
    t = t_ref[...].astype(wm1_ref.dtype)
    h = jnp.dot(t, wm1_ref[...], preferred_element_type=f32)
    h += bm1_ref[...].astype(f32)
    h = _silu(h).astype(wm2_ref.dtype)
    h = jnp.dot(h, wm2_ref[...], preferred_element_type=f32)
    # LayerNorm(d_inner): affine kept explicit (an elementwise gate follows, cannot fold)
    mean = jnp.mean(h, axis=-1, keepdims=True)
    hc = h - mean
    var = jnp.mean(hc * hc, axis=-1, keepdims=True)
    hn = hc * lax.rsqrt(var + LN_EPS)
    hn = hn * g2_ref[...].astype(f32) + b2_ref[...].astype(f32)
    # gate with silu(z), out-project, residual
    gated = (hn * sz_ref[...].astype(f32)).astype(wo_ref.dtype)
    u = jnp.dot(gated, wo_ref[...], preferred_element_type=f32)
    r = xm_ref[...].astype(f32) + u
    # final LayerNorm(dim_out)
    mean2 = jnp.mean(r, axis=-1, keepdims=True)
    rc = r - mean2
    var2 = jnp.mean(rc * rc, axis=-1, keepdims=True)
    y = rc * lax.rsqrt(var2 + LN_EPS)
    y = y * gf_ref[...].astype(f32) + bf_ref[...].astype(f32)
    o_ref[...] = y.astype(o_ref.dtype)


def _vss_tail(t, sz, xm, wm1, bm1, wm2, g2, b2, wo, gf, bf, *, out_dtype):
    n, ci = t.shape
    d = wo.shape[1]
    tn = _row_tile(n)
    grid = (pl.cdiv(n, tn),)
    rows = lambda i: (i, 0)
    const = lambda i: (0, 0)
    return pl.pallas_call(
        _vss_tail_kernel,
        out_shape=jax.ShapeDtypeStruct((n, d), out_dtype),
        grid_spec=pltpu.PrefetchScalarGridSpec(
            num_scalar_prefetch=0,
            grid=grid,
            in_specs=[
                pl.BlockSpec((tn, ci), rows),
                pl.BlockSpec((tn, ci), rows),
                pl.BlockSpec((tn, d), rows),
                pl.BlockSpec((ci, ci), const),
                pl.BlockSpec((1, ci), const),
                pl.BlockSpec((ci, ci), const),
                pl.BlockSpec((1, ci), const),
                pl.BlockSpec((1, ci), const),
                pl.BlockSpec((ci, d), const),
                pl.BlockSpec((1, d), const),
                pl.BlockSpec((1, d), const),
            ],
            out_specs=pl.BlockSpec((tn, d), rows),
        ),
        compiler_params=_mosaic_params(),
    )(t, sz, xm, wm1, bm1, wm2, g2, b2, wo, gf, bf)


# --------------------------------------------------------------------------------------- #
# Host-side (one-time) parameter folding + full forward.                                   #
# --------------------------------------------------------------------------------------- #
def _prepare_params(p, compute_dtype):
    """Fold LN affines into the following matmuls, permute the patch-merge weight rows to
    the kernel's [x0,x2 | x1,x3] channel order, transpose torch (out,in) weights."""
    cd = compute_dtype
    f32 = jnp.float32
    c = p["pm_gamma"].shape[0] // 4
    d = p["pm_weight"].shape[0]
    ci = p["m1_w"].shape[0]

    perm = jnp.concatenate([jnp.arange(0, c), jnp.arange(2 * c, 3 * c),
                            jnp.arange(c, 2 * c), jnp.arange(3 * c, 4 * c)])
    wt = p["pm_weight"].astype(f32).T                                # (4C, D)
    w_fold = (p["pm_gamma"].astype(f32)[:, None] * wt)[perm]
    pm_bias = (p["pm_beta"].astype(f32) @ wt).reshape(1, d)

    win_t = p["in_proj_w"].astype(f32).T                             # (D, 2*Ci)
    wg = p["vss_ln_gamma"].astype(f32)[:, None] * win_t
    b_in = p["vss_ln_beta"].astype(f32) @ win_t

    wm1_t = p["m1_w"].astype(f32).T

    return dict(
        pm_w_top=w_fold[:2 * c].astype(cd),
        pm_w_bot=w_fold[2 * c:].astype(cd),
        pm_bias=pm_bias,
        in_w_x=wg[:, :ci].astype(cd),
        in_w_z=wg[:, ci:].astype(cd),
        in_b_x=b_in[:ci].reshape(1, ci),
        in_b_z=b_in[ci:].reshape(1, ci),
        conv_w=p["conv_w"].astype(f32),
        conv_b=p["conv_b"].astype(f32).reshape(1, 1, ci),
        wm1=wm1_t.astype(cd),
        bm1=(p["dt_bias"].astype(f32) @ wm1_t).reshape(1, ci),       # dt_bias folded
        wm2=p["m2_w"].astype(f32).T.astype(cd),
        g2=p["ss_ln_gamma"].astype(f32).reshape(1, ci),
        b2=p["ss_ln_beta"].astype(f32).reshape(1, ci),
        wo=p["out_proj_w"].astype(f32).T.astype(cd),
        gf=p["f_ln_gamma"].astype(f32).reshape(1, d),
        bf=p["f_ln_beta"].astype(f32).reshape(1, d),
    )


@functools.partial(jax.jit, static_argnames=("compute_dtype",))
def fvm_encoder_block_forward(x, params, *, compute_dtype=jnp.float32):
    """FVMEncoderBlock forward.  x: (B, H, W, dim) channels-last.
    Returns (B, ceil(H/2), ceil(W/2), dim_out) in x.dtype."""
    kp = _prepare_params(params, compute_dtype)
    cd = compute_dtype

    B, H, W, C = x.shape
    pad_h, pad_w = H % 2, W % 2
    if pad_h or pad_w:                                 # matches F.pad in the torch module
        x = jnp.pad(x, ((0, 0), (0, pad_h), (0, pad_w), (0, 0)))
        _, H, W, _ = x.shape
    H2, W2 = H // 2, W // 2
    D = kp["pm_w_top"].shape[1]
    Ci = kp["wm1"].shape[0]
    N = B * H2 * W2

    # PatchMerging: reads a pure-reshape view of x — no concat materialized in HBM.
    x4 = x.reshape(B * H2, 2, W2, 2 * C)
    xm = _patch_merge(x4, kp["pm_w_top"], kp["pm_w_bot"], kp["pm_bias"],
                      w2=W2, out_dtype=cd)                               # (N, D)

    # VSS pre-norm + in_proj, plus silu(z) for the later gate.
    xp, sz = _in_proj(xm, kp["in_w_x"], kp["in_w_z"], kp["in_b_x"], kp["in_b_z"],
                      out_dtype=cd)                                      # (N, Ci) x 2

    # Depthwise 3x3 conv + bias + SiLU.  The 1-pixel halo pad is the only materialized
    # glue copy (~(1+2/H2)(1+2/W2) of x_part).
    xp_img = xp.reshape(B, H2, W2, Ci)
    xp_pad = jnp.pad(xp_img, ((0, 0), (1, 1), (1, 1), (0, 0)))
    xc = _dwconv_silu(xp_pad, kp["conv_w"], kp["conv_b"], out_dtype=cd)
    xc = xc.reshape(N, Ci)

    # mamba MLP + LN + gate + out_proj + residual + final encoder LN.
    y = _vss_tail(xc, sz, xm, kp["wm1"], kp["bm1"], kp["wm2"], kp["g2"], kp["b2"],
                  kp["wo"], kp["gf"], kp["bf"], out_dtype=x.dtype)
    # TODO(synk): nn.Dropout(p=0.1) in SS2D is treated as eval-mode identity (no RNG mask).
    return y.reshape(B, H2, W2, D)


# --------------------------------------------------------------------------------------- #
# Parameter init (torch layouts) and pure-JAX f32 reference.                               #
# --------------------------------------------------------------------------------------- #
def init_params(dim, dim_out=None, key=None):
    """Random (non-default) values for every parameter so the folded/permuted kernel math
    is fully exercised by the correctness check; shapes mirror the torch module."""
    dim_out = dim_out or 2 * dim
    d_inner = int(1.5 * dim_out)
    four_c = 4 * dim
    key = key if key is not None else jax.random.PRNGKey(0)
    ks = jax.random.split(key, 16)
    f32 = jnp.float32

    def u(k, shape, bound):
        return jax.random.uniform(k, shape, f32, minval=-bound, maxval=bound)

    xav = math.sqrt(6.0 / (four_c + dim_out))
    return dict(
        pm_gamma=1.0 + 0.1 * jax.random.normal(ks[0], (four_c,), f32),
        pm_beta=0.1 * jax.random.normal(ks[1], (four_c,), f32),
        pm_weight=u(ks[2], (dim_out, four_c), xav),
        vss_ln_gamma=1.0 + 0.1 * jax.random.normal(ks[3], (dim_out,), f32),
        vss_ln_beta=0.1 * jax.random.normal(ks[4], (dim_out,), f32),
        in_proj_w=u(ks[5], (2 * d_inner, dim_out), 1.0 / math.sqrt(dim_out)),
        conv_w=u(ks[6], (3, 3, d_inner), 1.0 / 3.0),
        conv_b=u(ks[7], (d_inner,), 1.0 / 3.0),
        dt_bias=0.1 * jax.random.normal(ks[8], (d_inner,), f32),
        m1_w=u(ks[9], (d_inner, d_inner), 1.0 / math.sqrt(d_inner)),
        m2_w=u(ks[10], (d_inner, d_inner), 1.0 / math.sqrt(d_inner)),
        ss_ln_gamma=1.0 + 0.1 * jax.random.normal(ks[11], (d_inner,), f32),
        ss_ln_beta=0.1 * jax.random.normal(ks[12], (d_inner,), f32),
        out_proj_w=u(ks[13], (dim_out, d_inner), 1.0 / math.sqrt(d_inner)),
        f_ln_gamma=1.0 + 0.1 * jax.random.normal(ks[14], (dim_out,), f32),
        f_ln_beta=0.1 * jax.random.normal(ks[15], (dim_out,), f32),
    )


def _ln_ref(v, g, b):
    m = jnp.mean(v, axis=-1, keepdims=True)
    var = jnp.mean((v - m) ** 2, axis=-1, keepdims=True)
    return (v - m) / jnp.sqrt(var + LN_EPS) * g + b


def _mm(a, b):
    return jnp.matmul(a, b, precision=jax.lax.Precision.HIGHEST)


def fvm_encoder_block_reference(x, p):
    """Pure-JAX f32 reference mirroring the PyTorch forward literally (torch channel order)."""
    B, H, W, C = x.shape
    pad_h, pad_w = H % 2, W % 2
    if pad_h or pad_w:
        x = jnp.pad(x, ((0, 0), (0, pad_h), (0, pad_w), (0, 0)))
        _, H, W, _ = x.shape
    ci = p["m1_w"].shape[0]

    # PatchMerging
    x0 = x[:, 0::2, 0::2, :]
    x1 = x[:, 1::2, 0::2, :]
    x2 = x[:, 0::2, 1::2, :]
    x3 = x[:, 1::2, 1::2, :]
    xm = jnp.concatenate([x0, x1, x2, x3], axis=-1)
    xm = _mm(_ln_ref(xm, p["pm_gamma"], p["pm_beta"]), p["pm_weight"].T)

    # VSSBlock / SS2D
    y = _ln_ref(xm, p["vss_ln_gamma"], p["vss_ln_beta"])
    xz = _mm(y, p["in_proj_w"].T)
    x_part, z = xz[..., :ci], xz[..., ci:]
    conv = lax.conv_general_dilated(
        x_part, p["conv_w"][:, :, None, :], window_strides=(1, 1), padding="SAME",
        dimension_numbers=("NHWC", "HWIO", "NHWC"), feature_group_count=ci,
        precision=jax.lax.Precision.HIGHEST)
    xs = jax.nn.silu(conv + p["conv_b"])
    xs = xs + p["dt_bias"]
    xs = _mm(jax.nn.silu(_mm(xs, p["m1_w"].T)), p["m2_w"].T)
    xs = _ln_ref(xs, p["ss_ln_gamma"], p["ss_ln_beta"])
    out = _mm(xs * jax.nn.silu(z), p["out_proj_w"].T)
    vss = xm + out
    return _ln_ref(vss, p["f_ln_gamma"], p["f_ln_beta"])


if __name__ == "__main__":
    key = jax.random.PRNGKey(0)
    k_x, k_p = jax.random.split(key)

    B, H, W, dim = 2, 16, 16, 4
    dim_out = 2 * dim                                  # 8 ; d_inner = int(1.5*8) = 12
    x = jax.random.normal(k_x, (B, H, W, dim), jnp.float32)
    params = init_params(dim, dim_out, key=k_p)

    ref = jax.block_until_ready(fvm_encoder_block_reference(x, params))

    # f32 path: tight check validating the fused / folded / permuted kernel math.
    out = jax.block_until_ready(
        fvm_encoder_block_forward(x, params, compute_dtype=jnp.float32))
    assert out.shape == (B, H // 2, W // 2, dim_out), out.shape
    err = float(jnp.max(jnp.abs(out - ref)))
    assert err < 5e-3, f"f32 max abs err {err}"

    # bf16 matmul / intermediate-storage path (v6e/v7x-friendly): loose sanity check.
    out_bf = jax.block_until_ready(
        fvm_encoder_block_forward(x, params, compute_dtype=jnp.bfloat16))
    err_bf = float(jnp.max(jnp.abs(out_bf - ref)))
    assert err_bf < 0.25, f"bf16 max abs err {err_bf}"

    print("KERNEL_OK")
</pallas_src>

<mosaic_0001>
module attributes {stable_mosaic.version = 11 : i64} {
  func.func @_patch_merge_kernel(%arg0: i32, %arg1: memref<8x1x8x8xf32, #tpu.memory_space<vmem>>, %arg2: memref<8x1x8x8xf32, #tpu.memory_space<vmem>>, %arg3: memref<8x8xf32, #tpu.memory_space<vmem>>, %arg4: memref<8x8xf32, #tpu.memory_space<vmem>>, %arg5: memref<1x8xf32, #tpu.memory_space<vmem>>, %arg6: memref<64x8xf32, #tpu.memory_space<vmem>>) attributes {dimension_semantics = [#tpu.dimension_semantics<parallel>], iteration_bounds = array<i64: 2>, scalar_prefetch = 0 : i64, scratch_operands = 0 : i64, tpu.core_type = #tpu.core_type<tc>, window_params = [{transform_indices = @transform_0, window_bounds = array<i64: 8, 1, 8, 8>}, {transform_indices = @transform_1, window_bounds = array<i64: 8, 1, 8, 8>}, {pipeline_mode = #tpu.pipeline_mode<synchronous>, transform_indices = @transform_2, window_bounds = array<i64: 8, 8>}, {pipeline_mode = #tpu.pipeline_mode<synchronous>, transform_indices = @transform_3, window_bounds = array<i64: 8, 8>}, {pipeline_mode = #tpu.pipeline_mode<synchronous>, transform_indices = @transform_4, window_bounds = array<i64: 1, 8>}, {transform_indices = @transform_5, window_bounds = array<i64: 64, 8>}]} {
    %c0 = arith.constant 0 : index
    %c0_0 = arith.constant 0 : index
    %c0_1 = arith.constant 0 : index
    %c0_2 = arith.constant 0 : index
    %0 = vector.load %arg1[%c0, %c0_0, %c0_1, %c0_2] : memref<8x1x8x8xf32, #tpu.memory_space<vmem>>, vector<8x1x8x8xf32>
    %1 = vector.shape_cast %0 : vector<8x1x8x8xf32> to vector<8x8x8xf32>
    %c0_3 = arith.constant 0 : index
    %c0_4 = arith.constant 0 : index
    %c0_5 = arith.constant 0 : index
    %c0_6 = arith.constant 0 : index
    %2 = vector.load %arg2[%c0_3, %c0_4, %c0_5, %c0_6] : memref<8x1x8x8xf32, #tpu.memory_space<vmem>>, vector<8x1x8x8xf32>
    %3 = vector.shape_cast %2 : vector<8x1x8x8xf32> to vector<8x8x8xf32>
    %cst = arith.constant dense<0.000000e+00> : vector<8x8xf32>
    %4 = vector.multi_reduction <add>, %1, %cst [2] : vector<8x8x8xf32> to vector<8x8xf32>
    %5 = vector.shape_cast %4 : vector<8x8xf32> to vector<8x8x1xf32>
    %cst_7 = arith.constant dense<0.000000e+00> : vector<8x8xf32>
    %6 = vector.multi_reduction <add>, %3, %cst_7 [2] : vector<8x8x8xf32> to vector<8x8xf32>
    %7 = vector.shape_cast %6 : vector<8x8xf32> to vector<8x8x1xf32>
    %8 = arith.addf %5, %7 : vector<8x8x1xf32>
    %cst_8 = arith.constant 1.600000e+01 : f32
    %9 = vector.broadcast %cst_8 : f32 to vector<8x8x1xf32>
    %10 = arith.divf %8, %9 : vector<8x8x1xf32>
    %11 = vector.broadcast %10 : vector<8x8x1xf32> to vector<8x8x8xf32>
    %12 = arith.subf %1, %11 : vector<8x8x8xf32>
    %13 = vector.broadcast %10 : vector<8x8x1xf32> to vector<8x8x8xf32>
    %14 = arith.subf %3, %13 : vector<8x8x8xf32>
    %15 = arith.mulf %12, %12 : vector<8x8x8xf32>
    %cst_9 = arith.constant dense<0.000000e+00> : vector<8x8xf32>
    %16 = vector.multi_reduction <add>, %15, %cst_9 [2] : vector<8x8x8xf32> to vector<8x8xf32>
    %17 = vector.shape_cast %16 : vector<8x8xf32> to vector<8x8x1xf32>
    %18 = arith.mulf %14, %14 : vector<8x8x8xf32>
    %cst_10 = arith.constant dense<0.000000e+00> : vector<8x8xf32>
    %19 = vector.multi_reduction <add>, %18, %cst_10 [2] : vector<8x8x8xf32> to vector<8x8xf32>
    %20 = vector.shape_cast %19 : vector<8x8xf32> to vector<8x8x1xf32>
    %21 = arith.addf %17, %20 : vector<8x8x1xf32>
    %cst_11 = arith.constant 1.600000e+01 : f32
    %22 = vector.broadcast %cst_11 : f32 to vector<8x8x1xf32>
    %23 = arith.divf %21, %22 : vector<8x8x1xf32>
    %cst_12 = arith.constant 9.99999974E-6 : f32
    %24 = vector.broadcast %cst_12 : f32 to vector<8x8x1xf32>
    %25 = arith.addf %23, %24 : vector<8x8x1xf32>
    %26 = math.rsqrt %25 : vector<8x8x1xf32>
    %27 = vector.broadcast %26 : vector<8x8x1xf32> to vector<8x8x8xf32>
    %28 = arith.mulf %12, %27 : vector<8x8x8xf32>
    %29 = vector.shape_cast %28 : vector<8x8x8xf32> to vector<64x8xf32>
    %30 = vector.broadcast %26 : vector<8x8x1xf32> to vector<8x8x8xf32>
    %31 = arith.mulf %14, %30 : vector<8x8x8xf32>
    %32 = vector.shape_cast %31 : vector<8x8x8xf32> to vector<64x8xf32>
    %c0_13 = arith.constant 0 : index
    %c0_14 = arith.constant 0 : index
    %33 = vector.load %arg3[%c0_13, %c0_14] : memref<8x8xf32, #tpu.memory_space<vmem>>, vector<8x8xf32>
    %cst_15 = arith.constant dense<0.000000e+00> : vector<64x8xf32>
    %34 = tpu.matmul %29, %33, %cst_15 {dimension_numbers = #tpu.dot_dimension_numbers<[1], [0], [0], [1], [0, 0, 1, 1], [], []>} : vector<64x8xf32>, vector<8x8xf32>, vector<64x8xf32> -> vector<64x8xf32>
    %c0_16 = arith.constant 0 : index
    %c0_17 = arith.constant 0 : index
    %35 = vector.load %arg4[%c0_16, %c0_17] : memref<8x8xf32, #tpu.memory_space<vmem>>, vector<8x8xf32>
    %cst_18 = arith.constant dense<0.000000e+00> : vector<64x8xf32>
    %36 = tpu.matmul %32, %35, %cst_18 {dimension_numbers = #tpu.dot_dimension_numbers<[1], [0], [0], [1], [0, 0, 1, 1], [], []>} : vector<64x8xf32>, vector<8x8xf32>, vector<64x8xf32> -> vector<64x8xf32>
    %37 = arith.addf %34, %36 : vector<64x8xf32>
    %c0_19 = arith.constant 0 : index
    %c0_20 = arith.constant 0 : index
    %38 = vector.load %arg5[%c0_19, %c0_20] : memref<1x8xf32, #tpu.memory_space<vmem>>, vector<1x8xf32>
    %39 = vector.broadcast %38 : vector<1x8xf32> to vector<64x8xf32>
    %40 = arith.addf %37, %39 : vector<64x8xf32>
    %c0_21 = arith.constant 0 : index
    %c0_22 = arith.constant 0 : index
    %41 = vector.load %arg6[%c0_21, %c0_22] : memref<64x8xf32, #tpu.memory_space<vmem>>, vector<64x8xf32>
    tpu.vector_store %arg6[%c0_21, %c0_22], %40 {strides = array<i32>} : memref<64x8xf32, #tpu.memory_space<vmem>>, vector<64x8xf32>,
    return
  }
  func.func @transform_0(%arg0: i32) -> (i32, i32, i32, i32) {
    %c0_i32 = arith.constant 0 : i32
    %c0_i32_0 = arith.constant 0 : i32
    %c0_i32_1 = arith.constant 0 : i32
    %c0_i32_2 = arith.constant 0 : i32
    return %arg0, %c0_i32, %c0_i32_0, %c0_i32_1 : i32, i32, i32, i32
  }
  func.func @transform_1(%arg0: i32) -> (i32, i32, i32, i32) {
    %c1_i32 = arith.constant 1 : i32
    %c0_i32 = arith.constant 0 : i32
    %c0_i32_0 = arith.constant 0 : i32
    %c0_i32_1 = arith.constant 0 : i32
    return %arg0, %c1_i32, %c0_i32, %c0_i32_0 : i32, i32, i32, i32
  }
  func.func @transform_2(%arg0: i32) -> (i32, i32) {
    %c0_i32 = arith.constant 0 : i32
    %c0_i32_0 = arith.constant 0 : i32
    %c0_i32_1 = arith.constant 0 : i32
    return %c0_i32, %c0_i32_0 : i32, i32
  }
  func.func @transform_3(%arg0: i32) -> (i32, i32) {
    %c0_i32 = arith.constant 0 : i32
    %c0_i32_0 = arith.constant 0 : i32
    %c0_i32_1 = arith.constant 0 : i32
    return %c0_i32, %c0_i32_0 : i32, i32
  }
  func.func @transform_4(%arg0: i32) -> (i32, i32) {
    %c0_i32 = arith.constant 0 : i32
    %c0_i32_0 = arith.constant 0 : i32
    %c0_i32_1 = arith.constant 0 : i32
    return %c0_i32, %c0_i32_0 : i32, i32
  }
  func.func @transform_5(%arg0: i32) -> (i32, i32) {
    %c0_i32 = arith.constant 0 : i32
    %c0_i32_0 = arith.constant 0 : i32
    return %arg0, %c0_i32 : i32, i32
  }
}

module attributes {stable_mosaic.version = 11 : i64} {
  func.func @_in_proj_kernel(%arg0: i32, %arg1: memref<64x8xf32, #tpu.memory_space<vmem>>, %arg2: memref<8x12xf32, #tpu.memory_space<vmem>>, %arg3: memref<8x12xf32, #tpu.memory_space<vmem>>, %arg4: memref<1x12xf32, #tpu.memory_space<vmem>>, %arg5: memref<1x12xf32, #tpu.memory_space<vmem>>, %arg6: memref<64x12xf32, #tpu.memory_space<vmem>>, %arg7: memref<64x12xf32, #tpu.memory_space<vmem>>) attributes {dimension_semantics = [#tpu.dimension_semantics<parallel>], iteration_bounds = array<i64: 2>, scalar_prefetch = 0 : i64, scratch_operands = 0 : i64, tpu.core_type = #tpu.core_type<tc>, window_params = [{transform_indices = @transform_0, window_bounds = array<i64: 64, 8>}, {pipeline_mode = #tpu.pipeline_mode<synchronous>, transform_indices = @transform_1, window_bounds = array<i64: 8, 12>}, {pipeline_mode = #tpu.pipeline_mode<synchronous>, transform_indices = @transform_2, window_bounds = array<i64: 8, 12>}, {pipeline_mode = #tpu.pipeline_mode<synchronous>, transform_indices = @transform_3, window_bounds = array<i64: 1, 12>}, {pipeline_mode = #tpu.pipeline_mode<synchronous>, transform_indices = @transform_4, window_bounds = array<i64: 1, 12>}, {transform_indices = @transform_5, window_bounds = array<i64: 64, 12>}, {transform_indices = @transform_6, window_bounds = array<i64: 64, 12>}]} {
    %c0 = arith.constant 0 : index
    %c0_0 = arith.constant 0 : index
    %0 = vector.load %arg1[%c0, %c0_0] : memref<64x8xf32, #tpu.memory_space<vmem>>, vector<64x8xf32>
    %cst = arith.constant dense<0.000000e+00> : vector<64xf32>
    %1 = vector.multi_reduction <add>, %0, %cst [1] : vector<64x8xf32> to vector<64xf32>
    %2 = vector.shape_cast %1 : vector<64xf32> to vector<64x1xf32>
    %cst_1 = arith.constant 8.000000e+00 : f32
    %3 = vector.broadcast %cst_1 : f32 to vector<64x1xf32>
    %4 = arith.divf %2, %3 : vector<64x1xf32>
    %5 = vector.broadcast %4 : vector<64x1xf32> to vector<64x8xf32>
    %6 = arith.subf %0, %5 : vector<64x8xf32>
    %7 = arith.mulf %6, %6 : vector<64x8xf32>
    %cst_2 = arith.constant dense<0.000000e+00> : vector<64xf32>
    %8 = vector.multi_reduction <add>, %7, %cst_2 [1] : vector<64x8xf32> to vector<64xf32>
    %9 = vector.shape_cast %8 : vector<64xf32> to vector<64x1xf32>
    %cst_3 = arith.constant 8.000000e+00 : f32
    %10 = vector.broadcast %cst_3 : f32 to vector<64x1xf32>
    %11 = arith.divf %9, %10 : vector<64x1xf32>
    %cst_4 = arith.constant 9.99999974E-6 : f32
    %12 = vector.broadcast %cst_4 : f32 to vector<64x1xf32>
    %13 = arith.addf %11, %12 : vector<64x1xf32>
    %14 = math.rsqrt %13 : vector<64x1xf32>
    %15 = vector.broadcast %14 : vector<64x1xf32> to vector<64x8xf32>
    %16 = arith.mulf %6, %15 : vector<64x8xf32>
    %c0_5 = arith.constant 0 : index
    %c0_6 = arith.constant 0 : index
    %17 = vector.load %arg2[%c0_5, %c0_6] : memref<8x12xf32, #tpu.memory_space<vmem>>, vector<8x12xf32>
    %cst_7 = arith.constant dense<0.000000e+00> : vector<64x12xf32>
    %18 = tpu.matmul %16, %17, %cst_7 {dimension_numbers = #tpu.dot_dimension_numbers<[1], [0], [0], [1], [0, 0, 1, 1], [], []>} : vector<64x8xf32>, vector<8x12xf32>, vector<64x12xf32> -> vector<64x12xf32>
    %c0_8 = arith.constant 0 : index
    %c0_9 = arith.constant 0 : index
    %19 = vector.load %arg4[%c0_8, %c0_9] : memref<1x12xf32, #tpu.memory_space<vmem>>, vector<1x12xf32>
    %20 = vector.broadcast %19 : vector<1x12xf32> to vector<64x12xf32>
    %21 = arith.addf %18, %20 : vector<64x12xf32>
    %c0_10 = arith.constant 0 : index
    %c0_11 = arith.constant 0 : index
    %22 = vector.load %arg3[%c0_10, %c0_11] : memref<8x12xf32, #tpu.memory_space<vmem>>, vector<8x12xf32>
    %cst_12 = arith.constant dense<0.000000e+00> : vector<64x12xf32>
    %23 = tpu.matmul %16, %22, %cst_12 {dimension_numbers = #tpu.dot_dimension_numbers<[1], [0], [0], [1], [0, 0, 1, 1], [], []>} : vector<64x8xf32>, vector<8x12xf32>, vector<64x12xf32> -> vector<64x12xf32>
    %c0_13 = arith.constant 0 : index
    %c0_14 = arith.constant 0 : index
    %24 = vector.load %arg5[%c0_13, %c0_14] : memref<1x12xf32, #tpu.memory_space<vmem>>, vector<1x12xf32>
    %25 = vector.broadcast %24 : vector<1x12xf32> to vector<64x12xf32>
    %26 = arith.addf %23, %25 : vector<64x12xf32>
    %c0_15 = arith.constant 0 : index
    %c0_16 = arith.constant 0 : index
    %27 = vector.load %arg6[%c0_15, %c0_16] : memref<64x12xf32, #tpu.memory_space<vmem>>, vector<64x12xf32>
    tpu.vector_store %arg6[%c0_15, %c0_16], %21 {strides = array<i32>} : memref<64x12xf32, #tpu.memory_space<vmem>>, vector<64x12xf32>,
    %cst_17 = arith.constant 0.000000e+00 : f32
    %28 = vector.broadcast %cst_17 : f32 to vector<64x12xf32>
    %29 = arith.subf %28, %26 : vector<64x12xf32>
    %30 = math.exp %29 : vector<64x12xf32>
    %cst_18 = arith.constant 1.000000e+00 : f32
    %31 = vector.broadcast %cst_18 : f32 to vector<64x12xf32>
    %32 = arith.addf %31, %30 : vector<64x12xf32>
    %cst_19 = arith.constant 1.000000e+00 : f32
    %33 = vector.broadcast %cst_19 : f32 to vector<64x12xf32>
    %34 = arith.divf %33, %32 : vector<64x12xf32>
    %35 = arith.mulf %26, %34 : vector<64x12xf32>
    %c0_20 = arith.constant 0 : index
    %c0_21 = arith.constant 0 : index
    %36 = vector.load %arg7[%c0_20, %c0_21] : memref<64x12xf32, #tpu.memory_space<vmem>>, vector<64x12xf32>
    tpu.vector_store %arg7[%c0_20, %c0_21], %35 {strides = array<i32>} : memref<64x12xf32, #tpu.memory_space<vmem>>, vector<64x12xf32>,
    return
  }
  func.func @transform_0(%arg0: i32) -> (i32, i32) {
    %c0_i32 = arith.constant 0 : i32
    %c0_i32_0 = arith.constant 0 : i32
    return %arg0, %c0_i32 : i32, i32
  }
  func.func @transform_1(%arg0: i32) -> (i32, i32) {
    %c0_i32 = arith.constant 0 : i32
    %c0_i32_0 = arith.constant 0 : i32
    %c0_i32_1 = arith.constant 0 : i32
    return %c0_i32, %c0_i32_0 : i32, i32
  }
  func.func @transform_2(%arg0: i32) -> (i32, i32) {
    %c0_i32 = arith.constant 0 : i32
    %c0_i32_0 = arith.constant 0 : i32
    %c0_i32_1 = arith.constant 0 : i32
    return %c0_i32, %c0_i32_0 : i32, i32
  }
  func.func @transform_3(%arg0: i32) -> (i32, i32) {
    %c0_i32 = arith.constant 0 : i32
    %c0_i32_0 = arith.constant 0 : i32
    %c0_i32_1 = arith.constant 0 : i32
    return %c0_i32, %c0_i32_0 : i32, i32
  }
  func.func @transform_4(%arg0: i32) -> (i32, i32) {
    %c0_i32 = arith.constant 0 : i32
    %c0_i32_0 = arith.constant 0 : i32
    %c0_i32_1 = arith.constant 0 : i32
    return %c0_i32, %c0_i32_0 : i32, i32
  }
  func.func @transform_5(%arg0: i32) -> (i32, i32) {
    %c0_i32 = arith.constant 0 : i32
    %c0_i32_0 = arith.constant 0 : i32
    return %arg0, %c0_i32 : i32, i32
  }
  func.func @transform_6(%arg0: i32) -> (i32, i32) {
    %c0_i32 = arith.constant 0 : i32
    %c0_i32_0 = arith.constant 0 : i32
    return %arg0, %c0_i32 : i32, i32
  }
}

module attributes {stable_mosaic.version = 11 : i64} {
  func.func @_dwconv_kernel(%arg0: i32, %arg1: memref<1x10x10x12xf32, #tpu.memory_space<vmem>>, %arg2: memref<3x3x12xf32, #tpu.memory_space<vmem>>, %arg3: memref<1x1x12xf32, #tpu.memory_space<vmem>>, %arg4: memref<1x8x8x12xf32, #tpu.memory_space<vmem>>) attributes {dimension_semantics = [#tpu.dimension_semantics<parallel>], iteration_bounds = array<i64: 2>, scalar_prefetch = 0 : i64, scratch_operands = 0 : i64, tpu.core_type = #tpu.core_type<tc>, window_params = [{transform_indices = @transform_0, window_bounds = array<i64: 1, 10, 10, 12>}, {pipeline_mode = #tpu.pipeline_mode<synchronous>, transform_indices = @transform_1, window_bounds = array<i64: 3, 3, 12>}, {pipeline_mode = #tpu.pipeline_mode<synchronous>, transform_indices = @transform_2, window_bounds = array<i64: 1, 1, 12>}, {transform_indices = @transform_3, window_bounds = array<i64: 1, 8, 8, 12>}]} {
    %c0 = arith.constant 0 : index
    %c0_0 = arith.constant 0 : index
    %c0_1 = arith.constant 0 : index
    %0 = vector.load %arg2[%c0, %c0_0, %c0_1] : memref<3x3x12xf32, #tpu.memory_space<vmem>>, vector<3x3x12xf32>
    %cst = arith.constant 0.000000e+00 : f32
    %1 = vector.broadcast %cst : f32 to vector<8x8x12xf32>
    %c0_2 = arith.constant 0 : index
    %c0_3 = arith.constant 0 : index
    %c0_4 = arith.constant 0 : index
    %c0_5 = arith.constant 0 : index
    %2 = vector.load %arg1[%c0_2, %c0_3, %c0_4, %c0_5] : memref<1x10x10x12xf32, #tpu.memory_space<vmem>>, vector<1x8x8x12xf32>
    %3 = vector.shape_cast %2 : vector<1x8x8x12xf32> to vector<8x8x12xf32>
    %4 = vector.extract_strided_slice %0 {offsets = [0, 0, 0], sizes = [1, 1, 12], strides = [1, 1, 1]} : vector<3x3x12xf32> to vector<1x1x12xf32>
    %5 = vector.broadcast %4 : vector<1x1x12xf32> to vector<8x8x12xf32>
    %6 = arith.mulf %3, %5 : vector<8x8x12xf32>
    %7 = arith.addf %1, %6 : vector<8x8x12xf32>
    %c0_6 = arith.constant 0 : index
    %c0_7 = arith.constant 0 : index
    %c1 = arith.constant 1 : index
    %c0_8 = arith.constant 0 : index
    %8 = vector.load %arg1[%c0_6, %c0_7, %c1, %c0_8] : memref<1x10x10x12xf32, #tpu.memory_space<vmem>>, vector<1x8x8x12xf32>
    %9 = vector.shape_cast %8 : vector<1x8x8x12xf32> to vector<8x8x12xf32>
    %10 = vector.extract_strided_slice %0 {offsets = [0, 1, 0], sizes = [1, 1, 12], strides = [1, 1, 1]} : vector<3x3x12xf32> to vector<1x1x12xf32>
    %11 = vector.broadcast %10 : vector<1x1x12xf32> to vector<8x8x12xf32>
    %12 = arith.mulf %9, %11 : vector<8x8x12xf32>
    %13 = arith.addf %7, %12 : vector<8x8x12xf32>
    %c0_9 = arith.constant 0 : index
    %c0_10 = arith.constant 0 : index
    %c2 = arith.constant 2 : index
    %c0_11 = arith.constant 0 : index
    %14 = vector.load %arg1[%c0_9, %c0_10, %c2, %c0_11] : memref<1x10x10x12xf32, #tpu.memory_space<vmem>>, vector<1x8x8x12xf32>
    %15 = vector.shape_cast %14 : vector<1x8x8x12xf32> to vector<8x8x12xf32>
    %16 = vector.extract_strided_slice %0 {offsets = [0, 2, 0], sizes = [1, 1, 12], strides = [1, 1, 1]} : vector<3x3x12xf32> to vector<1x1x12xf32>
    %17 = vector.broadcast %16 : vector<1x1x12xf32> to vector<8x8x12xf32>
    %18 = arith.mulf %15, %17 : vector<8x8x12xf32>
    %19 = arith.addf %13, %18 : vector<8x8x12xf32>
    %c0_12 = arith.constant 0 : index
    %c1_13 = arith.constant 1 : index
    %c0_14 = arith.constant 0 : index
    %c0_15 = arith.constant 0 : index
    %20 = vector.load %arg1[%c0_12, %c1_13, %c0_14, %c0_15] : memref<1x10x10x12xf32, #tpu.memory_space<vmem>>, vector<1x8x8x12xf32>
    %21 = vector.shape_cast %20 : vector<1x8x8x12xf32> to vector<8x8x12xf32>
    %22 = vector.extract_strided_slice %0 {offsets = [1, 0, 0], sizes = [1, 1, 12], strides = [1, 1, 1]} : vector<3x3x12xf32> to vector<1x1x12xf32>
    %23 = vector.broadcast %22 : vector<1x1x12xf32> to vector<8x8x12xf32>
    %24 = arith.mulf %21, %23 : vector<8x8x12xf32>
    %25 = arith.addf %19, %24 : vector<8x8x12xf32>
    %c0_16 = arith.constant 0 : index
    %c1_17 = arith.constant 1 : index
    %c1_18 = arith.constant 1 : index
    %c0_19 = arith.constant 0 : index
    %26 = vector.load %arg1[%c0_16, %c1_17, %c1_18, %c0_19] : memref<1x10x10x12xf32, #tpu.memory_space<vmem>>, vector<1x8x8x12xf32>
    %27 = vector.shape_cast %26 : vector<1x8x8x12xf32> to vector<8x8x12xf32>
    %28 = vector.extract_strided_slice %0 {offsets = [1, 1, 0], sizes = [1, 1, 12], strides = [1, 1, 1]} : vector<3x3x12xf32> to vector<1x1x12xf32>
    %29 = vector.broadcast %28 : vector<1x1x12xf32> to vector<8x8x12xf32>
    %30 = arith.mulf %27, %29 : vector<8x8x12xf32>
    %31 = arith.addf %25, %30 : vector<8x8x12xf32>
    %c0_20 = arith.constant 0 : index
    %c1_21 = arith.constant 1 : index
    %c2_22 = arith.constant 2 : index
    %c0_23 = arith.constant 0 : index
    %32 = vector.load %arg1[%c0_20, %c1_21, %c2_22, %c0_23] : memref<1x10x10x12xf32, #tpu.memory_space<vmem>>, vector<1x8x8x12xf32>
    %33 = vector.shape_cast %32 : vector<1x8x8x12xf32> to vector<8x8x12xf32>
    %34 = vector.extract_strided_slice %0 {offsets = [1, 2, 0], sizes = [1, 1, 12], strides = [1, 1, 1]} : vector<3x3x12xf32> to vector<1x1x12xf32>
    %35 = vector.broadcast %34 : vector<1x1x12xf32> to vector<8x8x12xf32>
    %36 = arith.mulf %33, %35 : vector<8x8x12xf32>
    %37 = arith.addf %31, %36 : vector<8x8x12xf32>
    %c0_24 = arith.constant 0 : index
    %c2_25 = arith.constant 2 : index
    %c0_26 = arith.constant 0 : index
    %c0_27 = arith.constant 0 : index
    %38 = vector.load %arg1[%c0_24, %c2_25, %c0_26, %c0_27] : memref<1x10x10x12xf32, #tpu.memory_space<vmem>>, vector<1x8x8x12xf32>
    %39 = vector.shape_cast %38 : vector<1x8x8x12xf32> to vector<8x8x12xf32>
    %40 = vector.extract_strided_slice %0 {offsets = [2, 0, 0], sizes = [1, 1, 12], strides = [1, 1, 1]} : vector<3x3x12xf32> to vector<1x1x12xf32>
    %41 = vector.broadcast %40 : vector<1x1x12xf32> to vector<8x8x12xf32>
    %42 = arith.mulf %39, %41 : vector<8x8x12xf32>
    %43 = arith.addf %37, %42 : vector<8x8x12xf32>
    %c0_28 = arith.constant 0 : index
    %c2_29 = arith.constant 2 : index
    %c1_30 = arith.constant 1 : index
    %c0_31 = arith.constant 0 : index
    %44 = vector.load %arg1[%c0_28, %c2_29, %c1_30, %c0_31] : memref<1x10x10x12xf32, #tpu.memory_space<vmem>>, vector<1x8x8x12xf32>
    %45 = vector.shape_cast %44 : vector<1x8x8x12xf32> to vector<8x8x12xf32>
    %46 = vector.extract_strided_slice %0 {offsets = [2, 1, 0], sizes = [1, 1, 12], strides = [1, 1, 1]} : vector<3x3x12xf32> to vector<1x1x12xf32>
    %47 = vector.broadcast %46 : vector<1x1x12xf32> to vector<8x8x12xf32>
    %48 = arith.mulf %45, %47 : vector<8x8x12xf32>
    %49 = arith.addf %43, %48 : vector<8x8x12xf32>
    %c0_32 = arith.constant 0 : index
    %c2_33 = arith.constant 2 : index
    %c2_34 = arith.constant 2 : index
    %c0_35 = arith.constant 0 : index
    %50 = vector.load %arg1[%c0_32, %c2_33, %c2_34, %c0_35] : memref<1x10x10x12xf32, #tpu.memory_space<vmem>>, vector<1x8x8x12xf32>
    %51 = vector.shape_cast %50 : vector<1x8x8x12xf32> to vector<8x8x12xf32>
    %52 = vector.extract_strided_slice %0 {offsets = [2, 2, 0], sizes = [1, 1, 12], strides = [1, 1, 1]} : vector<3x3x12xf32> to vector<1x1x12xf32>
    %53 = vector.broadcast %52 : vector<1x1x12xf32> to vector<8x8x12xf32>
    %54 = arith.mulf %51, %53 : vector<8x8x12xf32>
    %55 = arith.addf %49, %54 : vector<8x8x12xf32>
    %c0_36 = arith.constant 0 : index
    %c0_37 = arith.constant 0 : index
    %c0_38 = arith.constant 0 : index
    %56 = vector.load %arg3[%c0_36, %c0_37, %c0_38] : memref<1x1x12xf32, #tpu.memory_space<vmem>>, vector<1x1x12xf32>
    %57 = vector.broadcast %56 : vector<1x1x12xf32> to vector<8x8x12xf32>
    %58 = arith.addf %55, %57 : vector<8x8x12xf32>
    %cst_39 = arith.constant 0.000000e+00 : f32
    %59 = vector.broadcast %cst_39 : f32 to vector<8x8x12xf32>
    %60 = arith.subf %59, %58 : vector<8x8x12xf32>
    %61 = math.exp %60 : vector<8x8x12xf32>
    %cst_40 = arith.constant 1.000000e+00 : f32
    %62 = vector.broadcast %cst_40 : f32 to vector<8x8x12xf32>
    %63 = arith.addf %62, %61 : vector<8x8x12xf32>
    %cst_41 = arith.constant 1.000000e+00 : f32
    %64 = vector.broadcast %cst_41 : f32 to vector<8x8x12xf32>
    %65 = arith.divf %64, %63 : vector<8x8x12xf32>
    %66 = arith.mulf %58, %65 : vector<8x8x12xf32>
    %c0_42 = arith.constant 0 : index
    %c0_43 = arith.constant 0 : index
    %c0_44 = arith.constant 0 : index
    %c0_45 = arith.constant 0 : index
    %67 = vector.load %arg4[%c0_42, %c0_43, %c0_44, %c0_45] : memref<1x8x8x12xf32, #tpu.memory_space<vmem>>, vector<1x8x8x12xf32>
    %68 = vector.shape_cast %67 : vector<1x8x8x12xf32> to vector<8x8x12xf32>
    %69 = vector.shape_cast %66 : vector<8x8x12xf32> to vector<1x8x8x12xf32>
    tpu.vector_store %arg4[%c0_42, %c0_43, %c0_44, %c0_45], %69 {strides = array<i32>} : memref<1x8x8x12xf32, #tpu.memory_space<vmem>>, vector<1x8x8x12xf32>,
    return
  }
  func.func @transform_0(%arg0: i32) -> (i32, i32, i32, i32) {
    %c0_i32 = arith.constant 0 : i32
    %c0_i32_0 = arith.constant 0 : i32
    %c0_i32_1 = arith.constant 0 : i32
    %c0_i32_2 = arith.constant 0 : i32
    return %arg0, %c0_i32, %c0_i32_0, %c0_i32_1 : i32, i32, i32, i32
  }
  func.func @transform_1(%arg0: i32) -> (i32, i32, i32) {
    %c0_i32 = arith.constant 0 : i32
    %c0_i32_0 = arith.constant 0 : i32
    %c0_i32_1 = arith.constant 0 : i32
    %c0_i32_2 = arith.constant 0 : i32
    return %c0_i32, %c0_i32_0, %c0_i32_1 : i32, i32, i32
  }
  func.func @transform_2(%arg0: i32) -> (i32, i32, i32) {
    %c0_i32 = arith.constant 0 : i32
    %c0_i32_0 = arith.constant 0 : i32
    %c0_i32_1 = arith.constant 0 : i32
    %c0_i32_2 = arith.constant 0 : i32
    return %c0_i32, %c0_i32_0, %c0_i32_1 : i32, i32, i32
  }
  func.func @transform_3(%arg0: i32) -> (i32, i32, i32, i32) {
    %c0_i32 = arith.constant 0 : i32
    %c0_i32_0 = arith.constant 0 : i32
    %c0_i32_1 = arith.constant 0 : i32
    %c0_i32_2 = arith.constant 0 : i32
    return %arg0, %c0_i32, %c0_i32_0, %c0_i32_1 : i32, i32, i32, i32
  }
}

module attributes {stable_mosaic.version = 11 : i64} {
  func.func @_vss_tail_kernel(%arg0: i32, %arg1: memref<64x12xf32, #tpu.memory_space<vmem>>, %arg2: memref<64x12xf32, #tpu.memory_space<vmem>>, %arg3: memref<64x8xf32, #tpu.memory_space<vmem>>, %arg4: memref<12x12xf32, #tpu.memory_space<vmem>>, %arg5: memref<1x12xf32, #tpu.memory_space<vmem>>, %arg6: memref<12x12xf32, #tpu.memory_space<vmem>>, %arg7: memref<1x12xf32, #tpu.memory_space<vmem>>, %arg8: memref<1x12xf32, #tpu.memory_space<vmem>>, %arg9: memref<12x8xf32, #tpu.memory_space<vmem>>, %arg10: memref<1x8xf32, #tpu.memory_space<vmem>>, %arg11: memref<1x8xf32, #tpu.memory_space<vmem>>, %arg12: memref<64x8xf32, #tpu.memory_space<vmem>>) attributes {dimension_semantics = [#tpu.dimension_semantics<parallel>], iteration_bounds = array<i64: 2>, scalar_prefetch = 0 : i64, scratch_operands = 0 : i64, tpu.core_type = #tpu.core_type<tc>, window_params = [{transform_indices = @transform_0, window_bounds = array<i64: 64, 12>}, {transform_indices = @transform_1, window_bounds = array<i64: 64, 12>}, {transform_indices = @transform_2, window_bounds = array<i64: 64, 8>}, {pipeline_mode = #tpu.pipeline_mode<synchronous>, transform_indices = @transform_3, window_bounds = array<i64: 12, 12>}, {pipeline_mode = #tpu.pipeline_mode<synchronous>, transform_indices = @transform_4, window_bounds = array<i64: 1, 12>}, {pipeline_mode = #tpu.pipeline_mode<synchronous>, transform_indices = @transform_5, window_bounds = array<i64: 12, 12>}, {pipeline_mode = #tpu.pipeline_mode<synchronous>, transform_indices = @transform_6, window_bounds = array<i64: 1, 12>}, {pipeline_mode = #tpu.pipeline_mode<synchronous>, transform_indices = @transform_7, window_bounds = array<i64: 1, 12>}, {pipeline_mode = #tpu.pipeline_mode<synchronous>, transform_indices = @transform_8, window_bounds = array<i64: 12, 8>}, {pipeline_mode = #tpu.pipeline_mode<synchronous>, transform_indices = @transform_9, window_bounds = array<i64: 1, 8>}, {pipeline_mode = #tpu.pipeline_mode<synchronous>, transform_indices = @transform_10, window_bounds = array<i64: 1, 8>}, {transform_indices = @transform_11, window_bounds = array<i64: 64, 8>}]} {
    %c0 = arith.constant 0 : index
    %c0_0 = arith.constant 0 : index
    %0 = vector.load %arg1[%c0, %c0_0] : memref<64x12xf32, #tpu.memory_space<vmem>>, vector<64x12xf32>
    %c0_1 = arith.constant 0 : index
    %c0_2 = arith.constant 0 : index
    %1 = vector.load %arg4[%c0_1, %c0_2] : memref<12x12xf32, #tpu.memory_space<vmem>>, vector<12x12xf32>
    %cst = arith.constant dense<0.000000e+00> : vector<64x12xf32>
    %2 = tpu.matmul %0, %1, %cst {dimension_numbers = #tpu.dot_dimension_numbers<[1], [0], [0], [1], [0, 0, 1, 1], [], []>} : vector<64x12xf32>, vector<12x12xf32>, vector<64x12xf32> -> vector<64x12xf32>
    %c0_3 = arith.constant 0 : index
    %c0_4 = arith.constant 0 : index
    %3 = vector.load %arg5[%c0_3, %c0_4] : memref<1x12xf32, #tpu.memory_space<vmem>>, vector<1x12xf32>
    %4 = vector.broadcast %3 : vector<1x12xf32> to vector<64x12xf32>
    %5 = arith.addf %2, %4 : vector<64x12xf32>
    %cst_5 = arith.constant 0.000000e+00 : f32
    %6 = vector.broadcast %cst_5 : f32 to vector<64x12xf32>
    %7 = arith.subf %6, %5 : vector<64x12xf32>
    %8 = math.exp %7 : vector<64x12xf32>
    %cst_6 = arith.constant 1.000000e+00 : f32
    %9 = vector.broadcast %cst_6 : f32 to vector<64x12xf32>
    %10 = arith.addf %9, %8 : vector<64x12xf32>
    %cst_7 = arith.constant 1.000000e+00 : f32
    %11 = vector.broadcast %cst_7 : f32 to vector<64x12xf32>
    %12 = arith.divf %11, %10 : vector<64x12xf32>
    %13 = arith.mulf %5, %12 : vector<64x12xf32>
    %c0_8 = arith.constant 0 : index
    %c0_9 = arith.constant 0 : index
    %14 = vector.load %arg6[%c0_8, %c0_9] : memref<12x12xf32, #tpu.memory_space<vmem>>, vector<12x12xf32>
    %cst_10 = arith.constant dense<0.000000e+00> : vector<64x12xf32>
    %15 = tpu.matmul %13, %14, %cst_10 {dimension_numbers = #tpu.dot_dimension_numbers<[1], [0], [0], [1], [0, 0, 1, 1], [], []>} : vector<64x12xf32>, vector<12x12xf32>, vector<64x12xf32> -> vector<64x12xf32>
    %cst_11 = arith.constant dense<0.000000e+00> : vector<64xf32>
    %16 = vector.multi_reduction <add>, %15, %cst_11 [1] : vector<64x12xf32> to vector<64xf32>
    %17 = vector.shape_cast %16 : vector<64xf32> to vector<64x1xf32>
    %cst_12 = arith.constant 1.200000e+01 : f32
    %18 = vector.broadcast %cst_12 : f32 to vector<64x1xf32>
    %19 = arith.divf %17, %18 : vector<64x1xf32>
    %20 = vector.broadcast %19 : vector<64x1xf32> to vector<64x12xf32>
    %21 = arith.subf %15, %20 : vector<64x12xf32>
    %22 = arith.mulf %21, %21 : vector<64x12xf32>
    %cst_13 = arith.constant dense<0.000000e+00> : vector<64xf32>
    %23 = vector.multi_reduction <add>, %22, %cst_13 [1] : vector<64x12xf32> to vector<64xf32>
    %24 = vector.shape_cast %23 : vector<64xf32> to vector<64x1xf32>
    %cst_14 = arith.constant 1.200000e+01 : f32
    %25 = vector.broadcast %cst_14 : f32 to vector<64x1xf32>
    %26 = arith.divf %24, %25 : vector<64x1xf32>
    %cst_15 = arith.constant 9.99999974E-6 : f32
    %27 = vector.broadcast %cst_15 : f32 to vector<64x1xf32>
    %28 = arith.addf %26, %27 : vector<64x1xf32>
    %29 = math.rsqrt %28 : vector<64x1xf32>
    %30 = vector.broadcast %29 : vector<64x1xf32> to vector<64x12xf32>
    %31 = arith.mulf %21, %30 : vector<64x12xf32>
    %c0_16 = arith.constant 0 : index
    %c0_17 = arith.constant 0 : index
    %32 = vector.load %arg7[%c0_16, %c0_17] : memref<1x12xf32, #tpu.memory_space<vmem>>, vector<1x12xf32>
    %33 = vector.broadcast %32 : vector<1x12xf32> to vector<64x12xf32>
    %34 = arith.mulf %31, %33 : vector<64x12xf32>
    %c0_18 = arith.constant 0 : index
    %c0_19 = arith.constant 0 : index
    %35 = vector.load %arg8[%c0_18, %c0_19] : memref<1x12xf32, #tpu.memory_space<vmem>>, vector<1x12xf32>
    %36 = vector.broadcast %35 : vector<1x12xf32> to vector<64x12xf32>
    %37 = arith.addf %34, %36 : vector<64x12xf32>
    %c0_20 = arith.constant 0 : index
    %c0_21 = arith.constant 0 : index
    %38 = vector.load %arg2[%c0_20, %c0_21] : memref<64x12xf32, #tpu.memory_space<vmem>>, vector<64x12xf32>
    %39 = arith.mulf %37, %38 : vector<64x12xf32>
    %c0_22 = arith.constant 0 : index
    %c0_23 = arith.constant 0 : index
    %40 = vector.load %arg9[%c0_22, %c0_23] : memref<12x8xf32, #tpu.memory_space<vmem>>, vector<12x8xf32>
    %cst_24 = arith.constant dense<0.000000e+00> : vector<64x8xf32>
    %41 = tpu.matmul %39, %40, %cst_24 {dimension_numbers = #tpu.dot_dimension_numbers<[1], [0], [0], [1], [0, 0, 1, 1], [], []>} : vector<64x12xf32>, vector<12x8xf32>, vector<64x8xf32> -> vector<64x8xf32>
    %c0_25 = arith.constant 0 : index
    %c0_26 = arith.constant 0 : index
    %42 = vector.load %arg3[%c0_25, %c0_26] : memref<64x8xf32, #tpu.memory_space<vmem>>, vector<64x8xf32>
    %43 = arith.addf %42, %41 : vector<64x8xf32>
    %cst_27 = arith.constant dense<0.000000e+00> : vector<64xf32>
    %44 = vector.multi_reduction <add>, %43, %cst_27 [1] : vector<64x8xf32> to vector<64xf32>
    %45 = vector.shape_cast %44 : vector<64xf32> to vector<64x1xf32>
    %cst_28 = arith.constant 8.000000e+00 : f32
    %46 = vector.broadcast %cst_28 : f32 to vector<64x1xf32>
    %47 = arith.divf %45, %46 : vector<64x1xf32>
    %48 = vector.broadcast %47 : vector<64x1xf32> to vector<64x8xf32>
    %49 = arith.subf %43, %48 : vector<64x8xf32>
    %50 = arith.mulf %49, %49 : vector<64x8xf32>
    %cst_29 = arith.constant dense<0.000000e+00> : vector<64xf32>
    %51 = vector.multi_reduction <add>, %50, %cst_29 [1] : vector<64x8xf32> to vector<64xf32>
    %52 = vector.shape_cast %51 : vector<64xf32> to vector<64x1xf32>
    %cst_30 = arith.constant 8.000000e+00 : f32
    %53 = vector.broadcast %cst_30 : f32 to vector<64x1xf32>
    %54 = arith.divf %52, %53 : vector<64x1xf32>
    %cst_31 = arith.constant 9.99999974E-6 : f32
    %55 = vector.broadcast %cst_31 : f32 to vector<64x1xf32>
    %56 = arith.addf %54, %55 : vector<64x1xf32>
    %57 = math.rsqrt %56 : vector<64x1xf32>
    %58 = vector.broadcast %57 : vector<64x1xf32> to vector<64x8xf32>
    %59 = arith.mulf %49, %58 : vector<64x8xf32>
    %c0_32 = arith.constant 0 : index
    %c0_33 = arith.constant 0 : index
    %60 = vector.load %arg10[%c0_32, %c0_33] : memref<1x8xf32, #tpu.memory_space<vmem>>, vector<1x8xf32>
    %61 = vector.broadcast %60 : vector<1x8xf32> to vector<64x8xf32>
    %62 = arith.mulf %59, %61 : vector<64x8xf32>
    %c0_34 = arith.constant 0 : index
    %c0_35 = arith.constant 0 : index
    %63 = vector.load %arg11[%c0_34, %c0_35] : memref<1x8xf32, #tpu.memory_space<vmem>>, vector<1x8xf32>
    %64 = vector.broadcast %63 : vector<1x8xf32> to vector<64x8xf32>
    %65 = arith.addf %62, %64 : vector<64x8xf32>
    %c0_36 = arith.constant 0 : index
    %c0_37 = arith.constant 0 : index
    %66 = vector.load %arg12[%c0_36, %c0_37] : memref<64x8xf32, #tpu.memory_space<vmem>>, vector<64x8xf32>
    tpu.vector_store %arg12[%c0_36, %c0_37], %65 {strides = array<i32>} : memref<64x8xf32, #tpu.memory_space<vmem>>, vector<64x8xf32>,
    return
  }
  func.func @transform_0(%arg0: i32) -> (i32, i32) {
    %c0_i32 = arith.constant 0 : i32
    %c0_i32_0 = arith.constant 0 : i32
    return %arg0, %c0_i32 : i32, i32
  }
  func.func @transform_1(%arg0: i32) -> (i32, i32) {
    %c0_i32 = arith.constant 0 : i32
    %c0_i32_0 = arith.constant 0 : i32
    return %arg0, %c0_i32 : i32, i32
  }
  func.func @transform_2(%arg0: i32) -> (i32, i32) {
    %c0_i32 = arith.constant 0 : i32
    %c0_i32_0 = arith.constant 0 : i32
    return %arg0, %c0_i32 : i32, i32
  }
  func.func @transform_3(%arg0: i32) -> (i32, i32) {
    %c0_i32 = arith.constant 0 : i32
    %c0_i32_0 = arith.constant 0 : i32
    %c0_i32_1 = arith.constant 0 : i32
    return %c0_i32, %c0_i32_0 : i32, i32
  }
  func.func @transform_4(%arg0: i32) -> (i32, i32) {
    %c0_i32 = arith.constant 0 : i32
    %c0_i32_0 = arith.constant 0 : i32
    %c0_i32_1 = arith.constant 0 : i32
    return %c0_i32, %c0_i32_0 : i32, i32
  }
  func.func @transform_5(%arg0: i32) -> (i32, i32) {
    %c0_i32 = arith.constant 0 : i32
    %c0_i32_0 = arith.constant 0 : i32
    %c0_i32_1 = arith.constant 0 : i32
    return %c0_i32, %c0_i32_0 : i32, i32
  }
  func.func @transform_6(%arg0: i32) -> (i32, i32) {
    %c0_i32 = arith.constant 0 : i32
    %c0_i32_0 = arith.constant 0 : i32
    %c0_i32_1 = arith.constant 0 : i32
    return %c0_i32, %c0_i32_0 : i32, i32
  }
  func.func @transform_7(%arg0: i32) -> (i32, i32) {
    %c0_i32 = arith.constant 0 : i32
    %c0_i32_0 = arith.constant 0 : i32
    %c0_i32_1 = arith.constant 0 : i32
    return %c0_i32, %c0_i32_0 : i32, i32
  }
  func.func @transform_8(%arg0: i32) -> (i32, i32) {
    %c0_i32 = arith.constant 0 : i32
    %c0_i32_0 = arith.constant 0 : i32
    %c0_i32_1 = arith.constant 0 : i32
    return %c0_i32, %c0_i32_0 : i32, i32
  }
  func.func @transform_9(%arg0: i32) -> (i32, i32) {
    %c0_i32 = arith.constant 0 : i32
    %c0_i32_0 = arith.constant 0 : i32
    %c0_i32_1 = arith.constant 0 : i32
    return %c0_i32, %c0_i32_0 : i32, i32
  }
  func.func @transform_10(%arg0: i32) -> (i32, i32) {
    %c0_i32 = arith.constant 0 : i32
    %c0_i32_0 = arith.constant 0 : i32
    %c0_i32_1 = arith.constant 0 : i32
    return %c0_i32, %c0_i32_0 : i32, i32
  }
  func.func @transform_11(%arg0: i32) -> (i32, i32) {
    %c0_i32 = arith.constant 0 : i32
    %c0_i32_0 = arith.constant 0 : i32
    return %arg0, %c0_i32 : i32, i32
  }
}

</mosaic_0001>

<bundles_post_ra>
// kernel: fvm_encoder_block_forward.6
= control target key start
LH: loop header
LB: loop body
LE: loop exit
PB: predicated region body
PF: predicated region fallthrough
CT: control target
= control target key end

     0   :  { %s692_s12 = smov 0   ;;  %s902_s0 = inlined_call_operand.vmem [shape: f32[2,10,10,12], index: 0, kind: input, shape index: {}]   ;;  %s903_s1 = inlined_call_operand.vmem [shape: f32[3,3,12], index: 1, kind: input, shape index: {}]   ;;  %s904_s2 = inlined_call_operand.vmem [shape: f32[1,1,12], index: 2, kind: input, shape index: {}]   ;;  %s905_s3 = inlined_call_operand.vmem [shape: f32[2,8,8,12], index: 3, kind: output, shape index: {}]  }
   0x1 LB: > { %s563_s13 = sadd.s32 4294967295, %s670_s12   ;;  %p567_p0 = scmp.ge.s32.totalorder %s670_s12, 1  ;;  %s670_s12 = sphi %s692_s12, %s13_s12  }
   0x2   : > { %p137_p1 = scmp.lt.s32.totalorder %s670_s12, 3 }
   0x4   : > { %p138_p2 = pnand %p567_p0, %p137_p1 }
   0x5   : > { %p161_p3 = scmp.lt.s32.totalorder (!%p138_p2), %s563_s13, 1  ;;  %v182_v0 = vlaneseq (!%p138_p2)  ;;  %v171_v2 = vld [vmem:[%s903_s1] sm:$0x7] (!%p138_p2)  ;;  %v172_v3 = vld [vmem:[%s903_s1 + $0x4] sm:$0x7] (!%p138_p2)  ;;  %vm499_vm0 = vcmask (!%p138_p2), 97280  }
   0x6   : > { %141 = sbr.rel (%p138_p2) target bundleno = 103 (0x67), region = 32  ;;  %v173_v4 = vld [vmem:[%s903_s1 + $0x8] sm:$0x7] (!%p138_p2) }
   0x7   : > { %v183_v1 = vshrl.u32 (!%p138_p2), %v182_v0, 7 }
   0x9   : > { %v184_v5 = vsub.s32 (!%p138_p2), 0, %v183_v1  ;;  %v212_v6 = vsub.s32 (!%p138_p2), 1, %v183_v1  ;;  %v240_v7 = vsub.s32 (!%p138_p2), 2, %v183_v1 }
   0xb   : > { %v717_v8 = vrot.slane (!%p138_p2), %v171_v2, %v184_v5  ;;  %v719_v9 = vrot.slane (!%p138_p2), %v171_v2, %v212_v6  ;;  %v721_v10 = vrot.slane (!%p138_p2), %v171_v2, %v240_v7  ;;  %v723_v11 = vrot.slane (!%p138_p2), %v172_v3, %v184_v5 }
   0xc   : > { %v728_v15 = vrot.slane (!%p138_p2), %v172_v3, %v212_v6  ;;  %v730_v16 = vrot.slane (!%p138_p2), %v172_v3, %v240_v7  ;;  %v732_v17 = vrot.slane (!%p138_p2), %v173_v4, %v184_v5  ;;  %v734_v18 = vrot.slane (!%p138_p2), %v173_v4, %v212_v6 }
   0xd   : > { %s907_s13 = smov (!%p161_p3, %s563_s13), 1  ;;  %v742_v25 = vrot.slane %v173_v4, %v240_v7 }
   0xe   : > { %s623_s18 = smul.u32 160, %s907_s13  ;;  %s622_s26 = sshll.u32 %s907_s13, 6 }
   0xf   : > { %s874_s29 = scalar_lea.vmem %s905_s3, %s622_s26 }
  0x10   : > { %s715_s23 = scalar_lea.vmem %s902_s0, %s623_s18 }
  0x11   : > { %v174_v12 = vld [vmem:[%s715_s23] sm:$0xff]  ;;  %v571_v22 = vld [vmem:[%s715_s23 + $0x10] sm:$0xff] }
  0x12   : > { %v202_v13 = vld [vmem:[%s715_s23 + $0x1] sm:$0xff]  ;;  %v186_v19 = vmul.f32 %v717_v8, %v174_v12  ;;  %v579_v23 = vld [vmem:[%s715_s23 + $0x11] sm:$0xff]  ;;  %v271_v26 = vmul.f32 %v571_v22, %v723_v11  ;;  %v187_v30 = vmul.f32 %v571_v22, %v717_v8 }
  0x13   : > { %v230_v14 = vld [vmem:[%s715_s23 + $0x2] sm:$0xff]  ;;  %v214_v20 = vmul.f32 %v719_v9, %v202_v13  ;;  %v587_v24 = vld [vmem:[%s715_s23 + $0x12] sm:$0xff]  ;;  %v299_v27 = vmul.f32 %v579_v23, %v728_v15  ;;  %v215_v37 = vmul.f32 %v579_v23, %v719_v9 }
  0x14   : > { %v242_v21 = vmul.f32 %v721_v10, %v230_v14  ;;  %v595_v28 = vld [vmem:[%s715_s23 + $0x20] sm:$0xff]  ;;  %v327_v32 = vmul.f32 %v587_v24, %v730_v16  ;;  %v243_v38 = vmul.f32 %v587_v24, %v721_v10  ;;  %v596_v40 = vld [vmem:[%s715_s23 + $0x30] sm:$0xff] }
  0x15   : > { %v603_v29 = vld [vmem:[%s715_s23 + $0x21] sm:$0xff]  ;;  %v222_v31 = vadd.f32 %v214_v20, %v186_v19  ;;  %v356_v33 = vmul.f32 %v595_v28, %v732_v17  ;;  %v272_v39 = vmul.f32 %v595_v28, %v723_v11  ;;  %v357_v44 = vmul.f32 %v596_v40, %v732_v17  ;;  %v604_v45 = vld [vmem:[%s715_s23 + $0x31] sm:$0xff] }
  0x16   : > { %v384_v34 = vmul.f32 %v603_v29, %v734_v18  ;;  %v611_v35 = vld [vmem:[%s715_s23 + $0x22] sm:$0xff]  ;;  %v300_v42 = vmul.f32 %v603_v29, %v728_v15  ;;  %v223_v46 = vadd.f32 %v215_v37, %v187_v30  ;;  %v385_v47 = vmul.f32 %v604_v45, %v734_v18  ;;  %v612_v48 = vld [vmem:[%s715_s23 + $0x32] sm:$0xff] }
  0x17   : > { %v754_v36 = vmul.f32 %v611_v35, %v742_v25  ;;  %v250_v41 = vadd.f32 %v242_v21, %v222_v31  ;;  %v328_v43 = vmul.f32 %v611_v35, %v730_v16  ;;  %v188_v49 = vmul.f32 %v595_v28, %v717_v8  ;;  %v597_v59 = vld [vmem:[%s715_s23 + $0x40] sm:$0xff]  ;;  %v598_v22 = vld [vmem:[%s715_s23 + $0x50] sm:$0xff] }
  0x18   : > { %v216_v50 = vmul.f32 %v603_v29, %v719_v9  ;;  %v413_v52 = vmul.f32 %v612_v48, %v742_v25  ;;  %v244_v53 = vmul.f32 %v611_v35, %v721_v10  ;;  %v273_v54 = vmul.f32 %v596_v40, %v723_v11  ;;  %v605_v60 = vld [vmem:[%s715_s23 + $0x41] sm:$0xff]  ;;  %v606_v23 = vld [vmem:[%s715_s23 + $0x51] sm:$0xff] }
  0x19   : > { %v279_v51 = vadd.f32 %v271_v26, %v250_v41  ;;  %v251_v55 = vadd.f32 %v243_v38, %v223_v46  ;;  %v301_v57 = vmul.f32 %v604_v45, %v728_v15  ;;  %v329_v58 = vmul.f32 %v612_v48, %v730_v16  ;;  %v613_v3 = vld [vmem:[%s715_s23 + $0x42] sm:$0xff] }
  0x1a   : > { %v224_v56 = vadd.f32 %v216_v50, %v188_v49  ;;  %v358_v62 = vmul.f32 %v597_v59, %v732_v17  ;;  %v386_v63 = vmul.f32 %v605_v60, %v734_v18  ;;  %v189_v0 = vmul.f32 %v596_v40, %v717_v8  ;;  %v798_v40 = vld [vmem:[%s904_s2] ss:$0 sm:$0xff] }
  0x1b   : > { %v307_v61 = vadd.f32 %v299_v27, %v279_v51  ;;  %v280_v1 = vadd.f32 %v272_v39, %v251_v55  ;;  %v217_v4 = vmul.f32 %v604_v45, %v719_v9  ;;  %v245_v5 = vmul.f32 %v612_v48, %v721_v10  ;;  %v599_v46 = vld [vmem:[%s715_s23 + $0x60] sm:$0xff] }
  0x1c   : > { %v252_v2 = vadd.f32 %v244_v53, %v224_v56  ;;  %v414_v7 = vmul.f32 %v613_v3, %v742_v25  ;;  %v274_v12 = vmul.f32 %v597_v59, %v723_v11  ;;  %v302_v13 = vmul.f32 %v605_v60, %v728_v15  ;;  %v607_v56 = vld [vmem:[%s715_s23 + $0x61] sm:$0xff] }
  0x1d   : > { %v335_v6 = vadd.f32 %v327_v32, %v307_v61  ;;  %v308_v14 = vadd.f32 %v300_v42, %v280_v1  ;;  %v225_v20 = vadd.f32 %v217_v4, %v189_v0  ;;  %v330_v21 = vmul.f32 %v613_v3, %v730_v16  ;;  %v614_v32 = vld [vmem:[%s715_s23 + $0x52] sm:$0xff] }
  0x1e   : > { %v281_v19 = vadd.f32 %v273_v54, %v252_v2  ;;  %v359_v26 = vmul.f32 %v598_v22, %v732_v17  ;;  %v387_v27 = vmul.f32 %v606_v23, %v734_v18  ;;  %v190_v28 = vmul.f32 %v597_v59, %v717_v8 }
  0x1f   : > { %v364_v24 = vadd.f32 %v356_v33, %v335_v6  ;;  %v336_v29 = vadd.f32 %v328_v43, %v308_v14  ;;  %v253_v31 = vadd.f32 %v245_v5, %v225_v20  ;;  %v218_v35 = vmul.f32 %v605_v60, %v719_v9 }
  0x20   : > { %v309_v30 = vadd.f32 %v301_v57, %v281_v19  ;;  %v415_v38 = vmul.f32 %v614_v32, %v742_v25  ;;  %v246_v39 = vmul.f32 %v613_v3, %v721_v10  ;;  %v275_v33 = vmul.f32 %v598_v22, %v723_v11 }
  0x21   : > { %v392_v37 = vadd.f32 %v384_v34, %v364_v24  ;;  %v365_v41 = vadd.f32 %v357_v44, %v336_v29  ;;  %v282_v43 = vadd.f32 %v274_v12, %v253_v31  ;;  %v226_v45 = vadd.f32 %v218_v35, %v190_v28  ;;  %v615_v12 = vld [vmem:[%s715_s23 + $0x62] sm:$0xff] }
  0x22   : > { %v337_v42 = vadd.f32 %v329_v58, %v309_v30  ;;  %v303_v34 = vmul.f32 %v606_v23, %v728_v15  ;;  %v331_v49 = vmul.f32 %v614_v32, %v730_v16  ;;  %v360_v50 = vmul.f32 %v599_v46, %v732_v17 }
  0x23   : > { %v420_v48 = vadd.f32 %v754_v36, %v392_v37  ;;  %v393_v51 = vadd.f32 %v385_v47, %v365_v41  ;;  %v310_v54 = vadd.f32 %v302_v13, %v282_v43  ;;  %v254_v55 = vadd.f32 %v246_v39, %v226_v45 }
  0x24   : > { %v366_v53 = vadd.f32 %v358_v62, %v337_v42  ;;  %v388_v44 = vmul.f32 %v607_v56, %v734_v18  ;;  %v191_v58 = vmul.f32 %v598_v22, %v717_v8  ;;  %v219_v36 = vmul.f32 %v606_v23, %v719_v9  ;;  %v600_v23 = vld [vmem:[%s715_s23 + $0x70] sm:$0xff] }
  0x25   : > { %v807_v57 = vadd.f32 %v798_v40, %v420_v48  ;;  %v421_v59 = vadd.f32 %v413_v52, %v393_v51  ;;  %v338_v61 = vadd.f32 %v330_v21, %v310_v54  ;;  %v283_v0 = vadd.f32 %v275_v33, %v254_v55 }
  0x26   : > { %v394_v60 = vadd.f32 %v386_v63, %v366_v53  ;;  %v227_v62 = vadd.f32 %v219_v36, %v191_v58  ;;  %v247_v1 = vmul.f32 %v614_v32, %v721_v10  ;;  %v276_v2 = vmul.f32 %v599_v46, %v723_v11  ;;  %v608_v32 = vld [vmem:[%s715_s23 + $0x71] sm:$0xff] }
  0x27   : > { %v443_v47 = vsub.f32 0.0, %v807_v57  ;;  %v816_v3 = vadd.f32 %v798_v40, %v421_v59  ;;  %v367_v5 = vadd.f32 %v359_v26, %v338_v61  ;;  %v311_v6 = vadd.f32 %v303_v34, %v283_v0  ;;  %v601_v59 = vld [vmem:[%s715_s23 + $0x80] sm:$0xff] }
  0x28   : > { %v422_v4 = vadd.f32 %v414_v7, %v394_v60  ;;  %v416_v52 = vmul.f32 %v615_v12, %v742_v25  ;;  %v255_v63 = vadd.f32 %v247_v1, %v227_v62  ;;  %v304_v14 = vmul.f32 %v607_v56, %v728_v15 }
  0x29   : > { %v451_v13 = vmul.f32 1.442695, %v443_v47  ;;  %v444_v19 = vsub.f32 0.0, %v816_v3  ;;  %v395_v21 = vadd.f32 %v387_v27, %v367_v5  ;;  %v339_v22 = vadd.f32 %v331_v49, %v311_v6  ;;  %v609_v5 = vld [vmem:[%s715_s23 + $0x81] sm:$0xff] }
  0x2a   : > { %v823_v20 = vadd.f32 %v798_v40, %v422_v4  ;;  %v284_v7 = vadd.f32 %v276_v2, %v255_v63  ;;  %v332_v24 = vmul.f32 %v615_v12, %v730_v16  ;;  %v361_v26 = vmul.f32 %v600_v23, %v732_v17 }
  0x2b   : > { %632 = vpow2.f32 %v451_v13  ;;  %v453_v28 = vmul.f32 1.442695, %v444_v19  ;;  %v423_v30 = vadd.f32 %v415_v38, %v395_v21  ;;  %v368_v31 = vadd.f32 %v360_v50, %v339_v22 }
  0x2c   : > { %v445_v29 = vsub.f32 0.0, %v823_v20  ;;  %v312_v35 = vadd.f32 %v304_v14, %v284_v7  ;;  %v389_v37 = vmul.f32 %v608_v32, %v734_v18  ;;  %v192_v27 = vmul.f32 %v599_v46, %v717_v8  ;;  %v616_v46 = vld [vmem:[%s715_s23 + $0x72] sm:$0xff]  ;;  %v617_v14 = vld [vmem:[%s715_s23 + $0x82] sm:$0xff] }
  0x2d   : > { %v220_v39 = vmul.f32 %v607_v56, %v719_v9  ;;  %634 = vpow2.f32 %v453_v28  ;;  %v834_v41 = vadd.f32 %v798_v40, %v423_v30  ;;  %v396_v42 = vadd.f32 %v388_v44, %v368_v31 }
  0x2e   : > { %v455_v33 = vmul.f32 1.442695, %v445_v29  ;;  %v340_v43 = vadd.f32 %v332_v24, %v312_v35  ;;  %v248_v38 = vmul.f32 %v615_v12, %v721_v10  ;;  %v277_v48 = vmul.f32 %v600_v23, %v723_v11  ;;  %v602_v24 = vld [vmem:[%s715_s23 + $0x90] sm:$0xff] }
  0x2f   : > { %v228_v45 = vadd.f32 %v220_v39, %v192_v27  ;;  %v446_v34 = vsub.f32 0.0, %v834_v41  ;;  %v424_v49 = vadd.f32 %v416_v52, %v396_v42  ;;  %v417_v51 = vmul.f32 %v616_v46, %v742_v25  ;;  %v610_v35 = vld [vmem:[%s715_s23 + $0x91] sm:$0xff] }
  0x30   : > { %636 = vpow2.f32 %v455_v33  ;;  %v369_v50 = vadd.f32 %v361_v26, %v340_v43  ;;  %v305_v54 = vmul.f32 %v608_v32, %v728_v15  ;;  %v333_v44 = vmul.f32 %v616_v46, %v730_v16  ;;  %v618_v39 = vld [vmem:[%s715_s23 + $0x92] sm:$0xff] }
  0x31   : > { %v256_v53 = vadd.f32 %v248_v38, %v228_v45  ;;  %v457_v55 = vmul.f32 1.442695, %v446_v34  ;;  %v843_v56 = vadd.f32 %v798_v40, %v424_v49  ;;  %v193_v60 = vmul.f32 %v600_v23, %v717_v8 }
  0x32   : > { %v397_v58 = vadd.f32 %v389_v37, %v369_v50  ;;  %v221_v61 = vmul.f32 %v608_v32, %v719_v9  ;;  %v249_v47 = vmul.f32 %v616_v46, %v721_v10  ;;  %v362_v4 = vmul.f32 %v601_v59, %v732_v17 }
  0x33   : > { %v285_v36 = vadd.f32 %v277_v48, %v256_v53  ;;  %638 = vpow2.f32 %v457_v55  ;;  %v447_v0 = vsub.f32 0.0, %v843_v56  ;;  %v278_v8 = vmul.f32 %v601_v59, %v723_v11 }
  0x34   : > { %v425_v1 = vadd.f32 %v417_v51, %v397_v58  ;;  %v229_v6 = vadd.f32 %v221_v61, %v193_v60  ;;  %v390_v63 = vmul.f32 %v609_v5, %v734_v18  ;;  %v418_v21 = vmul.f32 %v617_v14, %v742_v25 }
  0x35   : > { %v633_v62 = vpop.eup %632  ;;  %v313_v2 = vadd.f32 %v305_v54, %v285_v36  ;;  %v459_v13 = vmul.f32 1.442695, %v447_v0  ;;  %v306_v22 = vmul.f32 %v609_v5, %v728_v15  ;;  %v334_v29 = vmul.f32 %v617_v14, %v730_v16 }
  0x36   : > { %v467_v12 = vadd.f32 1.0, %v633_v62  ;;  %v855_v9 = vadd.f32 %v798_v40, %v425_v1  ;;  %v257_v10 = vadd.f32 %v249_v47, %v229_v6  ;;  %v363_v15 = vmul.f32 %v602_v24, %v732_v17 }
  0x37   : > { %v341_v52 = vadd.f32 %v333_v44, %v313_v2  ;;  %v635_v19 = vpop.eup %634  ;;  %v391_v43 = vmul.f32 %v610_v35, %v734_v18  ;;  %v419_v48 = vmul.f32 %v618_v39, %v742_v25 }
  0x38   : > { %640 = vrcp.f32 %v467_v12  ;;  %v468_v23 = vadd.f32 1.0, %v635_v19  ;;  %v448_v11 = vsub.f32 0.0, %v855_v9  ;;  %v286_v28 = vadd.f32 %v278_v8, %v257_v10 }
  0x39   : > { %642 = vpow2.f32 %v459_v13  ;;  %v370_v7 = vadd.f32 %v362_v4, %v341_v52 }
  0x3a   : > { %v637_v26 = vpop.eup %636  ;;  %644 = vrcp.f32 %v468_v23  ;;  %v461_v31 = vmul.f32 1.442695, %v448_v11  ;;  %v314_v37 = vadd.f32 %v306_v22, %v286_v28 }
  0x3b   : > { %v469_v30 = vadd.f32 1.0, %v637_v26  ;;  %v398_v32 = vadd.f32 %v390_v63, %v370_v7 }
  0x3c   : > { %v342_v42 = vadd.f32 %v334_v29, %v314_v37 }
  0x3d   : > { %646 = vrcp.f32 %v469_v30  ;;  %v426_v27 = vadd.f32 %v418_v21, %v398_v32  ;;  %v639_v33 = vpop.eup %638 }
  0x3e   : > { %648 = vpow2.f32 %v461_v31  ;;  %v470_v45 = vadd.f32 1.0, %v639_v33  ;;  %v371_v38 = vadd.f32 %v363_v15, %v342_v42 }
  0x3f   : > { %v441_v16 = vadd.f32 %v798_v40, %v426_v27 }
  0x40   : > { %650 = vrcp.f32 %v470_v45  ;;  %v399_v17 = vadd.f32 %v391_v43, %v371_v38 }
  0x41   : > { %v449_v34 = vsub.f32 0.0, %v441_v16 }
  0x42   : > { %v641_v49 = vpop.eup %640  ;;  %v427_v53 = vadd.f32 %v419_v48, %v399_v17 }
  0x43   : > { %v643_v18 = vpop.eup %642  ;;  %v491_v46 = vmul.f32 %v641_v49, %v807_v57  ;;  %v463_v50 = vmul.f32 1.442695, %v449_v34 }
  0x44   : > { %v471_v51 = vadd.f32 1.0, %v643_v18  ;;  %v645_v25 = vpop.eup %644  ;;  %v442_v55 = vadd.f32 %v798_v40, %v427_v53 }
  0x45   : > { %500 = vst.msk [vmem:[%s874_s29] sm:$0xff] %vm499_vm0, %v491_v46  ;;  %652 = vpow2.f32 %v463_v50  ;;  %v492_v54 = vmul.f32 %v645_v25, %v816_v3 }
  0x46   : > { %654 = vrcp.f32 %v471_v51  ;;  %v450_v36 = vsub.f32 0.0, %v442_v55 }
  0x47   : > { %v647_v44 = vpop.eup %646  ;;  %501 = vst.msk [vmem:[%s874_s29 + $0x8] sm:$0xff] %vm499_vm0, %v492_v54 }
  0x48   : > { %v649_v58 = vpop.eup %648  ;;  %v493_v57 = vmul.f32 %v647_v44, %v823_v20  ;;  %v465_v60 = vmul.f32 1.442695, %v450_v36 }
  0x49   : > { %v472_v59 = vadd.f32 1.0, %v649_v58 }
  0x4a   : > { %502 = vst.msk [vmem:[%s874_s29 + $0x10] sm:$0xff] %vm499_vm0, %v493_v57  ;;  %v651_v61 = vpop.eup %650 }
  0x4b   : > { %656 = vrcp.f32 %v472_v59  ;;  %v494_v3 = vmul.f32 %v651_v61, %v834_v41 }
  0x4c   : > { %658 = vpow2.f32 %v465_v60 }
  0x4d   : > { %503 = vst.msk [vmem:[%s874_s29 + $0x18] sm:$0xff] %vm499_vm0, %v494_v3 }
  0x4f   : > { %v653_v40 = vpop.eup %652 }
  0x50   : > { %v655_v0 = vpop.eup %654  ;;  %v473_v47 = vadd.f32 1.0, %v653_v40 }
  0x51   : > { %v495_v20 = vmul.f32 %v655_v0, %v843_v56 }
  0x52   : > { %660 = vrcp.f32 %v473_v47 }
  0x53   : > { %504 = vst.msk [vmem:[%s874_s29 + $0x20] sm:$0xff] %vm499_vm0, %v495_v20 }
  0x55   : > { %v657_v62 = vpop.eup %656 }
  0x56   : > { %v659_v1 = vpop.eup %658  ;;  %v496_v2 = vmul.f32 %v657_v62, %v855_v9 }
  0x57   : > { %v474_v4 = vadd.f32 1.0, %v659_v1 }
  0x58   : > { %505 = vst.msk [vmem:[%s874_s29 + $0x28] sm:$0xff] %vm499_vm0, %v496_v2 }
  0x59   : > { %662 = vrcp.f32 %v474_v4 }
  0x5c   : > { %v661_v41 = vpop.eup %660 }
  0x5d   : > { %v497_v5 = vmul.f32 %v661_v41, %v441_v16 }
  0x5f   : > { %506 = vst.msk [vmem:[%s874_s29 + $0x30] sm:$0xff] %vm499_vm0, %v497_v5 }
  0x63   : > { %v663_v6 = vpop.eup %662 }
  0x64   : > { %v498_v12 = vmul.f32 %v663_v6, %v442_v55 }
  0x66   : > { %507 = vst.msk [vmem:[%s874_s29 + $0x38] sm:$0xff] %vm499_vm0, %v498_v12 }
  0x67 PF: > { %s13_s12 = sadd.s32 1, %s670_s12  }
  0x68   : > { %p10_p4 = scmp.ge.s32.totalorder %s13_s12, 4  }
  0x6a   :  { %12 = sbr.rel (!%p10_p4) target bundleno = 1 (0x1), region = 64 }

// kernel: fvm_encoder_block_forward.5
= control target key start
LH: loop header
LB: loop body
LE: loop exit
PB: predicated region body
PF: predicated region fallthrough
CT: control target
= control target key end

     0   :  { %s972_s21 = smov 0   ;;  %s1131_s0 = inlined_call_operand.vmem [shape: f32[128,8], index: 0, kind: input, shape index: {}]   ;;  %s1132_s1 = inlined_call_operand.vmem [shape: f32[8,12], index: 1, kind: input, shape index: {}]   ;;  %s1133_s2 = inlined_call_operand.vmem [shape: f32[8,12], index: 2, kind: input, shape index: {}]   ;;  %s1134_s3 = inlined_call_operand.vmem [shape: f32[1,12], index: 3, kind: input, shape index: {}]   ;;  %s1135_s4 = inlined_call_operand.vmem [shape: f32[1,12], index: 4, kind: input, shape index: {}]   ;;  %s1136_s5 = inlined_call_operand.vmem [shape: f32[128,12], index: 5, kind: output, shape index: {0}]   ;;  %s1137_s6 = inlined_call_operand.vmem [shape: f32[128,12], index: 6, kind: output, shape index: {1}]  }
   0x1 LB: > { %s796_s22 = sadd.s32 4294967295, %s935_s21   ;;  %p800_p0 = scmp.ge.s32.totalorder %s935_s21, 1  ;;  %s935_s21 = sphi %s972_s21, %s17_s21  }
   0x2   : > { %p216_p1 = scmp.lt.s32.totalorder %s935_s21, 3 }
   0x4   : > { %p217_p2 = pnand %p800_p0, %p216_p1 }
   0x5   : > { %s801_s23 = sshll.u32 (!%p217_p2), %s796_s22, 3  ;;  %vm277_vm0 = vcmask (!%p217_p2), 64512   ;;  %v383_v56 = vld [vmem:[%s1132_s1] sm:$0xff] (!%p217_p2)  ;;  %vm633_vm1 = vcmask (!%p217_p2), 97280  }
   0x6   : > { %220 = sbr.rel (%p217_p2) target bundleno = 590 (0x24e), region = 40  ;;  %p252_p3 = scmp.lt.s32.totalorder (!%p217_p2), %s801_s23, 15  ;;  %v520_v57 = vld [vmem:[%s1133_s2] sm:$0xff] (!%p217_p2)  ;;  %845 = vmatprep.subr.mxu0 (!%p217_p2), %v383_v56 }
   0x7   : > { %859 = vmatprep.subr.mxu1 (!%p217_p2), %v520_v57  ;;  %846 = vmatpush3.msra.mxu0 (!%p217_p2), %v383_v56 }
   0x8   : > { %860 = vmatpush3.msra.mxu1 (!%p217_p2), %v520_v57 }
   0xd   : > { %s1139_s23 = smov (!%p252_p3, %s801_s23), 15 }
   0xe   : > { %s980_s24 = sshll.u32 %s1139_s23, 3 }
   0xf   : > { %s255_s27 = scalar_lea.vmem %s1131_s0, %s980_s24  ;;  %s1074_s14 = scalar_lea.vmem %s1136_s5, %s980_s24 }
  0x10   : > { %v269_v0 = vld [vmem:[%s255_s27] sm:$0xff]  ;;  %v271_v1 = vld [vmem:[%s255_s27 + $0x10] sm:$0xff]  ;;  %v270_v2 = vld [vmem:[%s255_s27 + $0x8] sm:$0xff]  ;;  %s267_s17 = scalar_lea.vmem %s1137_s6, %s980_s24 }
  0x11   : > { %v278_v3 = vsel %vm277_vm0, %v269_v0, 0.0  ;;  %v284_v4 = vsel %vm277_vm0, %v271_v1, 0.0  ;;  %v272_v5 = vld [vmem:[%s255_s27 + $0x18] sm:$0xff]  ;;  %v281_v6 = vsel %vm277_vm0, %v270_v2, 0.0  ;;  %v273_v8 = vld [vmem:[%s255_s27 + $0x20] sm:$0xff]  ;;  %v274_v9 = vld [vmem:[%s255_s27 + $0x28] sm:$0xff] }
  0x12   : > { %279 = vadd.xlane.f32.xlu0 %v278_v3  ;;  %285 = vadd.xlane.f32.xlu1 %v284_v4  ;;  %v287_v7 = vsel %vm277_vm0, %v272_v5, 0.0  ;;  %v290_v10 = vsel %vm277_vm0, %v273_v8, 0.0  ;;  %v293_v11 = vsel %vm277_vm0, %v274_v9, 0.0  ;;  %v275_v12 = vld [vmem:[%s255_s27 + $0x30] sm:$0xff]  ;;  %v276_v13 = vld [vmem:[%s255_s27 + $0x38] sm:$0xff] }
  0x13   : > { %v296_v14 = vsel %vm277_vm0, %v275_v12, 0.0  ;;  %v299_v15 = vsel %vm277_vm0, %v276_v13, 0.0 }
  0x16   : > { %282 = vadd.xlane.f32.xlu0 %v281_v6  ;;  %288 = vadd.xlane.f32.xlu1 %v287_v7 }
  0x1a   : > { %291 = vadd.xlane.f32.xlu0 %v290_v10  ;;  %294 = vadd.xlane.f32.xlu1 %v293_v11 }
  0x1e   : > { %297 = vadd.xlane.f32.xlu0 %v296_v14  ;;  %300 = vadd.xlane.f32.xlu1 %v299_v15 }
  0x9f   : > { %v280_v16 = vpop.xlane.xlu0 %279  ;;  %v286_v17 = vpop.xlane.xlu1 %285 }
  0xa0   : > { %v303_v18 = vmul.f32 0.125, %v280_v16  ;;  %v305_v19 = vmul.f32 0.125, %v286_v17 }
  0xa2   : > { %v994_v20 = vsub.f32 %v269_v0, %v303_v18  ;;  %v996_v21 = vsub.f32 %v271_v1, %v305_v19 }
  0xa3   : > { %v283_v22 = vpop.xlane.xlu0 %282  ;;  %v289_v23 = vpop.xlane.xlu1 %288 }
  0xa4   : > { %v304_v24 = vmul.f32 0.125, %v283_v22  ;;  %v306_v25 = vmul.f32 0.125, %v289_v23  ;;  %v319_v26 = vmul.f32 %v994_v20, %v994_v20  ;;  %v321_v27 = vmul.f32 %v996_v21, %v996_v21 }
  0xa6   : > { %v1002_v28 = vsub.f32 %v270_v2, %v304_v24  ;;  %v1004_v29 = vsub.f32 %v272_v5, %v306_v25  ;;  %v327_v30 = vsel %vm277_vm0, %v319_v26, 0.0  ;;  %v333_v33 = vsel %vm277_vm0, %v321_v27, 0.0 }
  0xa7   : > { %328 = vadd.xlane.f32.xlu0 %v327_v30  ;;  %v292_v31 = vpop.xlane.xlu0 %291  ;;  %v295_v32 = vpop.xlane.xlu1 %294 }
  0xa8   : > { %v307_v34 = vmul.f32 0.125, %v292_v31  ;;  %v308_v35 = vmul.f32 0.125, %v295_v32  ;;  %v320_v36 = vmul.f32 %v1002_v28, %v1002_v28  ;;  %v322_v37 = vmul.f32 %v1004_v29, %v1004_v29 }
  0xaa   : > { %v1012_v38 = vsub.f32 %v273_v8, %v307_v34  ;;  %v1014_v39 = vsub.f32 %v274_v9, %v308_v35  ;;  %v330_v40 = vsel %vm277_vm0, %v320_v36, 0.0  ;;  %v336_v43 = vsel %vm277_vm0, %v322_v37, 0.0  ;;  %v807_v34 = vld [vmem:[%s1134_s3] ss:$0 sm:$0xff] }
  0xab   : > { %334 = vadd.xlane.f32.xlu0 %v333_v33  ;;  %331 = vadd.xlane.f32.xlu1 %v330_v40  ;;  %v298_v41 = vpop.xlane.xlu0 %297  ;;  %v301_v42 = vpop.xlane.xlu1 %300  ;;  %v816_v35 = vld [vmem:[%s1135_s4] ss:$0 sm:$0xff] }
  0xac   : > { %v309_v44 = vmul.f32 0.125, %v298_v41  ;;  %v310_v45 = vmul.f32 0.125, %v301_v42  ;;  %v323_v46 = vmul.f32 %v1012_v38, %v1012_v38  ;;  %v324_v47 = vmul.f32 %v1014_v39, %v1014_v39 }
  0xae   : > { %v1022_v48 = vsub.f32 %v275_v12, %v309_v44  ;;  %v1024_v49 = vsub.f32 %v276_v13, %v310_v45  ;;  %v339_v50 = vsel %vm277_vm0, %v323_v46, 0.0  ;;  %v342_v51 = vsel %vm277_vm0, %v324_v47, 0.0 }
  0xaf   : > { %337 = vadd.xlane.f32.xlu1 %v336_v43  ;;  %340 = vadd.xlane.f32.xlu0 %v339_v50 }
  0xb0   : > { %v325_v52 = vmul.f32 %v1022_v48, %v1022_v48  ;;  %v326_v53 = vmul.f32 %v1024_v49, %v1024_v49 }
  0xb2   : > { %v345_v54 = vsel %vm277_vm0, %v325_v52, 0.0  ;;  %v348_v55 = vsel %vm277_vm0, %v326_v53, 0.0 }
  0xb3   : > { %343 = vadd.xlane.f32.xlu1 %v342_v51  ;;  %346 = vadd.xlane.f32.xlu0 %v345_v54 }
  0xb7   : > { %349 = vadd.xlane.f32.xlu1 %v348_v55 }
 0x134   : > { %v329_v58 = vpop.xlane.xlu0 %328 }
 0x135   : > { %v351_v59 = vmul.f32 0.125, %v329_v58 }
 0x137   : > { %v359_v60 = vadd.f32 1e-05, %v351_v59 }
 0x138   : > { %v332_v61 = vpop.xlane.xlu1 %331  ;;  %v335_v62 = vpop.xlane.xlu0 %334 }
 0x139   : > { %881 = vrsqrt.f32 %v359_v60  ;;  %v352_v63 = vmul.f32 0.125, %v332_v61  ;;  %v353_v0 = vmul.f32 0.125, %v335_v62 }
 0x13b   : > { %v360_v1 = vadd.f32 1e-05, %v352_v63  ;;  %v361_v2 = vadd.f32 1e-05, %v353_v0 }
 0x13c   : > { %v338_v3 = vpop.xlane.xlu1 %337  ;;  %v341_v4 = vpop.xlane.xlu0 %340 }
 0x13d   : > { %883 = vrsqrt.f32 %v360_v1  ;;  %v354_v5 = vmul.f32 0.125, %v338_v3  ;;  %v355_v6 = vmul.f32 0.125, %v341_v4 }
 0x13e   : > { %885 = vrsqrt.f32 %v361_v2 }
 0x13f   : > { %v362_v7 = vadd.f32 1e-05, %v354_v5  ;;  %v363_v8 = vadd.f32 1e-05, %v355_v6 }
 0x140   : > { %v344_v9 = vpop.xlane.xlu1 %343  ;;  %v347_v10 = vpop.xlane.xlu0 %346 }
 0x141   : > { %887 = vrsqrt.f32 %v362_v7  ;;  %v356_v11 = vmul.f32 0.125, %v344_v9  ;;  %v357_v12 = vmul.f32 0.125, %v347_v10 }
 0x142   : > { %889 = vrsqrt.f32 %v363_v8 }
 0x143   : > { %v882_v13 = vpop.eup %881  ;;  %v364_v14 = vadd.f32 1e-05, %v356_v11  ;;  %v365_v15 = vadd.f32 1e-05, %v357_v12 }
 0x144   : > { %v350_v16 = vpop.xlane.xlu1 %349  ;;  %v375_v17 = vmul.f32 %v882_v13, %v994_v20 }
 0x145   : > { %891 = vrsqrt.f32 %v364_v14  ;;  %v358_v18 = vmul.f32 0.125, %v350_v16 }
 0x146   : > { %893 = vrsqrt.f32 %v365_v15  ;;  %847 = vmatprep.mubr.msk.f32.mxu0 %vm277_vm0, %v375_v17  ;;  %861 = vmatprep.mubr.msk.f32.mxu1 %vm277_vm0, %v375_v17 }
 0x147   : > { %v884_v19 = vpop.eup %883  ;;  %v366_v22 = vadd.f32 1e-05, %v358_v18 }
 0x148   : > { %v886_v23 = vpop.eup %885  ;;  %v376_v24 = vmul.f32 %v884_v19, %v1002_v28 }
 0x149   : > { %895 = vrsqrt.f32 %v366_v22  ;;  %v377_v25 = vmul.f32 %v886_v23, %v996_v21 }
 0x14a   : > { %848 = vmatmul.mubr.msk.f32.vlgmr.msra.gmra.mrb[0].mxu0 %vm277_vm0, %v376_v24  ;;  %862 = vmatmul.mubr.msk.f32.vlgmr.msra.gmra.mrb[0].mxu1 %vm277_vm0, %v376_v24 }
 0x14b   : > { %v888_v20 = vpop.eup %887  ;;  %850 = vmatprep.mubr.msk.f32.mxu0 %vm277_vm0, %v377_v25  ;;  %864 = vmatprep.mubr.msk.f32.mxu1 %vm277_vm0, %v377_v25 }
 0x14c   : > { %v890_v26 = vpop.eup %889  ;;  %v378_v27 = vmul.f32 %v888_v20, %v1004_v29 }
 0x14d   : > { %v379_v30 = vmul.f32 %v890_v26, %v1012_v38 }
 0x14e   : > { %851 = vmatmul.mubr.msk.f32.gmra.mrb[2].mxu0 %vm277_vm0, %v378_v27  ;;  %865 = vmatmul.mubr.msk.f32.gmra.mrb[2].mxu1 %vm277_vm0, %v378_v27 }
 0x14f   : > { %v892_v28 = vpop.eup %891  ;;  %853 = vmatprep.mubr.msk.f32.mxu0 %vm277_vm0, %v379_v30  ;;  %867 = vmatprep.mubr.msk.f32.mxu1 %vm277_vm0, %v379_v30 }
 0x150   : > { %v894_v21 = vpop.eup %893  ;;  %v380_v31 = vmul.f32 %v892_v28, %v1014_v39 }
 0x151   : > { %v381_v32 = vmul.f32 %v894_v21, %v1022_v48 }
 0x152   : > { %854 = vmatmul.mubr.msk.f32.gmra.mrb[4].mxu0 %vm277_vm0, %v380_v31  ;;  %868 = vmatmul.mubr.msk.f32.gmra.mrb[4].mxu1 %vm277_vm0, %v380_v31 }
 0x153   : > { %v896_v29 = vpop.eup %895  ;;  %856 = vmatprep.mubr.msk.f32.mxu0 %vm277_vm0, %v381_v32  ;;  %870 = vmatprep.mubr.msk.f32.mxu1 %vm277_vm0, %v381_v32 }
 0x154   : > { %v382_v33 = vmul.f32 %v896_v29, %v1024_v49 }
 0x156   : > { %857 = vmatmul.mubr.msk.f32.gmra.mrb[6].mxu0 %vm277_vm0, %v382_v33  ;;  %871 = vmatmul.mubr.msk.f32.gmra.mrb[6].mxu1 %vm277_vm0, %v382_v33 }
 0x21d   : > { %v849_v36 = vpop.f32.mrb[0].mxu0  ;;  %v863_v37 = vpop.f32.mrb[0].mxu1 }
 0x21e   : > { %v487_v38 = vadd.f32 %v849_v36, %v807_v34  ;;  %v1076_v39 = vadd.f32 %v863_v37, %v816_v35  ;;  %v481_v40 = vpop.f32.mrb[1].mxu0  ;;  %v594_v41 = vpop.f32.mrb[1].mxu1 }
 0x21f   : > { %v482_v42 = vadd.f32 %v807_v34, %v481_v40  ;;  %v1078_v43 = vadd.f32 %v816_v35, %v594_v41 }
 0x220   : > { %635 = vst.msk [vmem:[%s1074_s14 + $0x8] sm:$0xff] %vm633_vm1, %v487_v38  ;;  %v643_v44 = vsub.f32 0.0, %v1076_v39 }
 0x221   : > { %634 = vst.msk [vmem:[%s1074_s14] sm:$0xff] %vm633_vm1, %v482_v42  ;;  %v642_v45 = vsub.f32 0.0, %v1078_v43  ;;  %v852_v46 = vpop.f32.mrb[2].mxu0  ;;  %v866_v47 = vpop.f32.mrb[2].mxu1 }
 0x222   : > { %v652_v48 = vmul.f32 1.442695, %v643_v44  ;;  %v497_v49 = vadd.f32 %v852_v46, %v807_v34  ;;  %v1086_v50 = vadd.f32 %v866_v47, %v816_v35  ;;  %v491_v51 = vpop.f32.mrb[3].mxu0  ;;  %v604_v52 = vpop.f32.mrb[3].mxu1 }
 0x223   : > { %v650_v53 = vmul.f32 1.442695, %v642_v45  ;;  %v492_v54 = vadd.f32 %v807_v34, %v491_v51  ;;  %v1088_v55 = vadd.f32 %v816_v35, %v604_v52 }
 0x224   : > { %897 = vpow2.f32 %v652_v48  ;;  %637 = vst.msk [vmem:[%s1074_s14 + $0x18] sm:$0xff] %vm633_vm1, %v497_v49  ;;  %v645_v56 = vsub.f32 0.0, %v1086_v50 }
 0x225   : > { %899 = vpow2.f32 %v650_v53  ;;  %636 = vst.msk [vmem:[%s1074_s14 + $0x10] sm:$0xff] %vm633_vm1, %v492_v54  ;;  %v644_v57 = vsub.f32 0.0, %v1088_v55  ;;  %v855_v58 = vpop.f32.mrb[4].mxu0  ;;  %v869_v59 = vpop.f32.mrb[4].mxu1 }
 0x226   : > { %v656_v60 = vmul.f32 1.442695, %v645_v56  ;;  %v507_v61 = vadd.f32 %v855_v58, %v807_v34  ;;  %v1096_v62 = vadd.f32 %v869_v59, %v816_v35  ;;  %v501_v63 = vpop.f32.mrb[5].mxu0  ;;  %v614_v0 = vpop.f32.mrb[5].mxu1 }
 0x227   : > { %v654_v1 = vmul.f32 1.442695, %v644_v57  ;;  %v502_v2 = vadd.f32 %v807_v34, %v501_v63  ;;  %v1098_v3 = vadd.f32 %v816_v35, %v614_v0 }
 0x228   : > { %901 = vpow2.f32 %v656_v60  ;;  %639 = vst.msk [vmem:[%s1074_s14 + $0x28] sm:$0xff] %vm633_vm1, %v507_v61  ;;  %v647_v4 = vsub.f32 0.0, %v1096_v62 }
 0x229   : > { %903 = vpow2.f32 %v654_v1  ;;  %638 = vst.msk [vmem:[%s1074_s14 + $0x20] sm:$0xff] %vm633_vm1, %v502_v2  ;;  %v646_v5 = vsub.f32 0.0, %v1098_v3  ;;  %v858_v6 = vpop.f32.mrb[6].mxu0  ;;  %v872_v7 = vpop.f32.mrb[6].mxu1 }
 0x22a   : > { %v660_v8 = vmul.f32 1.442695, %v647_v4  ;;  %v517_v9 = vadd.f32 %v858_v6, %v807_v34  ;;  %v630_v10 = vadd.f32 %v872_v7, %v816_v35  ;;  %v511_v11 = vpop.f32.mrb[7].mxu0  ;;  %v624_v12 = vpop.f32.mrb[7].mxu1 }
 0x22b   : > { %v658_v13 = vmul.f32 1.442695, %v646_v5  ;;  %v512_v14 = vadd.f32 %v807_v34, %v511_v11  ;;  %v625_v15 = vadd.f32 %v816_v35, %v624_v12 }
 0x22c   : > { %905 = vpow2.f32 %v660_v8  ;;  %641 = vst.msk [vmem:[%s1074_s14 + $0x38] sm:$0xff] %vm633_vm1, %v517_v9  ;;  %v649_v16 = vsub.f32 0.0, %v630_v10 }
 0x22d   : > { %907 = vpow2.f32 %v658_v13  ;;  %640 = vst.msk [vmem:[%s1074_s14 + $0x30] sm:$0xff] %vm633_vm1, %v512_v14  ;;  %v648_v17 = vsub.f32 0.0, %v625_v15 }
 0x22e   : > { %v898_v18 = vpop.eup %897  ;;  %v664_v19 = vmul.f32 1.442695, %v649_v16 }
 0x22f   : > { %v900_v22 = vpop.eup %899  ;;  %v667_v23 = vadd.f32 1.0, %v898_v18  ;;  %v662_v24 = vmul.f32 1.442695, %v648_v17 }
 0x230   : > { %v666_v25 = vadd.f32 1.0, %v900_v22  ;;  %909 = vpow2.f32 %v664_v19 }
 0x231   : > { %911 = vrcp.f32 %v667_v23 }
 0x232   : > { %v902_v20 = vpop.eup %901  ;;  %913 = vrcp.f32 %v666_v25 }
 0x233   : > { %v904_v26 = vpop.eup %903  ;;  %v669_v27 = vadd.f32 1.0, %v902_v20  ;;  %915 = vpow2.f32 %v662_v24 }
 0x234   : > { %v668_v30 = vadd.f32 1.0, %v904_v26 }
 0x235   : > { %917 = vrcp.f32 %v669_v27 }
 0x236   : > { %v906_v28 = vpop.eup %905  ;;  %919 = vrcp.f32 %v668_v30 }
 0x237   : > { %v908_v21 = vpop.eup %907  ;;  %v671_v31 = vadd.f32 1.0, %v906_v28 }
 0x238   : > { %v670_v32 = vadd.f32 1.0, %v908_v21 }
 0x239   : > { %921 = vrcp.f32 %v671_v31 }
 0x23a   : > { %v910_v29 = vpop.eup %909  ;;  %923 = vrcp.f32 %v670_v32 }
 0x23b   : > { %v912_v33 = vpop.eup %911  ;;  %v673_v34 = vadd.f32 1.0, %v910_v29 }
 0x23c   : > { %v914_v35 = vpop.eup %913  ;;  %v691_v36 = vmul.f32 %v912_v33, %v1076_v39 }
 0x23d   : > { %v916_v37 = vpop.eup %915  ;;  %v690_v38 = vmul.f32 %v914_v35, %v1078_v43  ;;  %925 = vrcp.f32 %v673_v34 }
 0x23e   : > { %699 = vst.msk [vmem:[%s267_s17 + $0x8] sm:$0xff] %vm633_vm1, %v691_v36  ;;  %v672_v40 = vadd.f32 1.0, %v916_v37 }
 0x23f   : > { %v918_v41 = vpop.eup %917  ;;  %698 = vst.msk [vmem:[%s267_s17] sm:$0xff] %vm633_vm1, %v690_v38 }
 0x240   : > { %v920_v42 = vpop.eup %919  ;;  %v693_v44 = vmul.f32 %v918_v41, %v1086_v50  ;;  %927 = vrcp.f32 %v672_v40 }
 0x241   : > { %v692_v45 = vmul.f32 %v920_v42, %v1088_v55 }
 0x242   : > { %701 = vst.msk [vmem:[%s267_s17 + $0x18] sm:$0xff] %vm633_vm1, %v693_v44 }
 0x243   : > { %v922_v46 = vpop.eup %921  ;;  %700 = vst.msk [vmem:[%s267_s17 + $0x10] sm:$0xff] %vm633_vm1, %v692_v45 }
 0x244   : > { %v924_v39 = vpop.eup %923  ;;  %v695_v43 = vmul.f32 %v922_v46, %v1096_v62 }
 0x245   : > { %v694_v47 = vmul.f32 %v924_v39, %v1098_v3 }
 0x246   : > { %703 = vst.msk [vmem:[%s267_s17 + $0x28] sm:$0xff] %vm633_vm1, %v695_v43 }
 0x247   : > { %v926_v48 = vpop.eup %925  ;;  %702 = vst.msk [vmem:[%s267_s17 + $0x20] sm:$0xff] %vm633_vm1, %v694_v47 }
 0x248   : > { %v697_v49 = vmul.f32 %v926_v48, %v630_v10 }
 0x24a   : > { %v928_v50 = vpop.eup %927  ;;  %705 = vst.msk [vmem:[%s267_s17 + $0x38] sm:$0xff] %vm633_vm1, %v697_v49 }
 0x24b   : > { %v696_v51 = vmul.f32 %v928_v50, %v625_v15 }
 0x24d   : > { %704 = vst.msk [vmem:[%s267_s17 + $0x30] sm:$0xff] %vm633_vm1, %v696_v51 }
 0x24e PF: > { %s17_s21 = sadd.s32 1, %s935_s21  }
 0x24f   : > { %p14_p4 = scmp.ge.s32.totalorder %s17_s21, 4  }
 0x251   :  { %16 = sbr.rel (!%p14_p4) target bundleno = 1 (0x1), region = 82 }

// kernel: fvm_encoder_block_forward.4
= control target key start
LH: loop header
LB: loop body
LE: loop exit
PB: predicated region body
PF: predicated region fallthrough
CT: control target
= control target key end

     0   :  { %s1146_s18 = smov 0   ;;  %s1148_s19 = smov 0   ;;  %s1430_s0 = inlined_call_operand.vmem [shape: f32[16,2,8,8], index: 0, kind: input, shape index: {}, may-alias: {0,1}]   ;;  %s1431_s1 = inlined_call_operand.vmem [shape: f32[16,2,8,8], index: 1, kind: input, shape index: {}, may-alias: {0,1}]   ;;  %s1432_s2 = inlined_call_operand.vmem [shape: f32[8,8], index: 2, kind: input, shape index: {}]   ;;  %s1433_s3 = inlined_call_operand.vmem [shape: f32[8,8], index: 3, kind: input, shape index: {}]   ;;  %s1434_s4 = inlined_call_operand.vmem [shape: f32[1,8], index: 4, kind: input, shape index: {}]   ;;  %s1435_s5 = inlined_call_operand.vmem [shape: f32[128,8], index: 5, kind: output, shape index: {}]  }
   0x1   :  { %s1150_s20 = smov 0  }
   0x2 LB: > { %s952_s21 = sadd.s32 4294967295, %s1114_s20   ;;  %s1163_s22 = sadd.s32 1, %s1114_s20   ;;  %s1114_s20 = sphi %s1150_s20, %s1439_s20   ;;  %s1110_s19 = sphi %s1148_s19, %s1438_s19   ;;  %s1106_s18 = sphi %s1146_s18, %s1437_s18  }
   0x3   : > { %s19_s23 = ssub.s32 %s1114_s20, %s1163_s22  ;;  %s22_s24 = sadd.s32 1, %s1110_s19 }
   0x4   : > { %p20_p0 = scmp.eq.s32.totalorder %s19_s23, 0  ;;  %p29_p1 = scmp.ne.s32.totalorder %s1110_s19, %s1106_s18 }
   0x5   : > { %p30_p2 = scmp.eq.s32.totalorder %s1114_s20, 0  ;;  %p955_p4 = scmp.ge.s32.totalorder %s1114_s20, 2 }
   0x6   : > { %s1172_s25 = scalar_select %p20_p0, %s1110_s19, %s22_s24  }
   0x7   : > { %p1174_p3 = por %p30_p2, %p29_p1  ;;  %179 = sbr.rel (%p955_p4) target bundleno = 30 (0x1e), region = 28 }
   0xe   : > { %182 = sbr.rel (!%p1174_p3) target bundleno = 22 (0x16), region = 32  ;;  %s184_s27 = sand.u32 (%p1174_p3), 1, %s1110_s19  }
   0xf   : > { %s996_s28 = sshll.u32 (%p1174_p3), %s1114_s20, 7  ;;  %s956_s29 = sshll.u32 (%p1174_p3), %s184_s27, 6 }
  0x10   : > { %s190_s7 = scalar_lea.vmem (%p1174_p3), %s1430_s0, %s996_s28  ;;  %s186_s8 = scalar_lea.vmem (%p1174_p3), [#allocation2], %s956_s29 }
  0x11   : > { %v232_v0 = vld [vmem:[%s190_s7] sm:$0xff] (%p1174_p3)  ;;  %v234_v1 = vld [vmem:[%s190_s7 + $0x10] sm:$0xff] (%p1174_p3) }
  0x12   : > { %v236_v2 = vld [vmem:[%s190_s7 + $0x20] sm:$0xff] (%p1174_p3)  ;;  %233 = vst [vmem:[%s186_s8] sm:$0xff] (%p1174_p3), %v232_v0  ;;  %235 = vst [vmem:[%s186_s8 + $0x8] sm:$0xff] (%p1174_p3), %v234_v1  ;;  %v238_v3 = vld [vmem:[%s190_s7 + $0x30] sm:$0xff] (%p1174_p3) }
  0x13   : > { %237 = vst [vmem:[%s186_s8 + $0x10] sm:$0xff] (%p1174_p3), %v236_v2  ;;  %v240_v4 = vld [vmem:[%s190_s7 + $0x40] sm:$0xff] (%p1174_p3)  ;;  %v242_v5 = vld [vmem:[%s190_s7 + $0x50] sm:$0xff] (%p1174_p3)  ;;  %239 = vst [vmem:[%s186_s8 + $0x18] sm:$0xff] (%p1174_p3), %v238_v3 }
  0x14   : > { %241 = vst [vmem:[%s186_s8 + $0x20] sm:$0xff] (%p1174_p3), %v240_v4  ;;  %243 = vst [vmem:[%s186_s8 + $0x28] sm:$0xff] (%p1174_p3), %v242_v5  ;;  %v244_v6 = vld [vmem:[%s190_s7 + $0x60] sm:$0xff] (%p1174_p3)  ;;  %v246_v7 = vld [vmem:[%s190_s7 + $0x70] sm:$0xff] (%p1174_p3) }
  0x15   : > { %245 = vst [vmem:[%s186_s8 + $0x30] sm:$0xff] %v244_v6  ;;  %247 = vst [vmem:[%s186_s8 + $0x38] sm:$0xff] %v246_v7 }
  0x16 PF: > { %253 = sbr.rel (!%p1174_p3) target bundleno = 30 (0x1e), region = 70  ;;  %s255_s9 = sand.u32 (%p1174_p3), 1, %s1110_s19  }
  0x17   : > { %s997_s10 = sshll.u32 (%p1174_p3), %s1114_s20, 7  ;;  %s960_s11 = sshll.u32 (%p1174_p3), %s255_s9, 6 }
  0x18   : > { %s900_s14 = scalar_lea.vmem (%p1174_p3), %s1431_s1, %s997_s10  ;;  %s257_s15 = scalar_lea.vmem (%p1174_p3), [#allocation3], %s960_s11 }
  0x19   : > { %v963_v8 = vld [vmem:[%s900_s14 + $0x8] sm:$0xff] (%p1174_p3)  ;;  %v964_v9 = vld [vmem:[%s900_s14 + $0x18] sm:$0xff] (%p1174_p3) }
  0x1a   : > { %v965_v10 = vld [vmem:[%s900_s14 + $0x28] sm:$0xff] (%p1174_p3)  ;;  %305 = vst [vmem:[%s257_s15] sm:$0xff] (%p1174_p3), %v963_v8  ;;  %307 = vst [vmem:[%s257_s15 + $0x8] sm:$0xff] (%p1174_p3), %v964_v9  ;;  %v966_v11 = vld [vmem:[%s900_s14 + $0x38] sm:$0xff] (%p1174_p3) }
  0x1b   : > { %309 = vst [vmem:[%s257_s15 + $0x10] sm:$0xff] (%p1174_p3), %v965_v10  ;;  %v967_v12 = vld [vmem:[%s900_s14 + $0x48] sm:$0xff] (%p1174_p3)  ;;  %v968_v13 = vld [vmem:[%s900_s14 + $0x58] sm:$0xff] (%p1174_p3)  ;;  %311 = vst [vmem:[%s257_s15 + $0x18] sm:$0xff] (%p1174_p3), %v966_v11 }
  0x1c   : > { %313 = vst [vmem:[%s257_s15 + $0x20] sm:$0xff] (%p1174_p3), %v967_v12  ;;  %315 = vst [vmem:[%s257_s15 + $0x28] sm:$0xff] (%p1174_p3), %v968_v13  ;;  %v969_v14 = vld [vmem:[%s900_s14 + $0x68] sm:$0xff] (%p1174_p3)  ;;  %v970_v15 = vld [vmem:[%s900_s14 + $0x78] sm:$0xff] (%p1174_p3) }
  0x1d   : > { %317 = vst [vmem:[%s257_s15 + $0x30] sm:$0xff] %v969_v14  ;;  %319 = vst [vmem:[%s257_s15 + $0x38] sm:$0xff] %v970_v15 }
  0x1e PF: > { %p971_p5 = scmp.ge.s32.totalorder %s1114_s20, 1  ;;  %p324_p6 = scmp.lt.s32.totalorder %s1114_s20, 3 }
  0x20   : > { %p325_p7 = pnand %p971_p5, %p324_p6 }
  0x21   : > { %s331_s16 = sand.u32 (!%p325_p7), 1, %s1106_s18   ;;  %vm393_vm0 = vcmask (!%p325_p7), 64512   ;;  %s974_s29 = sshll.u32 (!%p325_p7), %s952_s21, 3 }
  0x22   : > { %328 = sbr.rel (%p325_p7) target bundleno = 600 (0x258), region = 108  ;;  %s972_s17 = sshll.u32 (!%p325_p7), %s331_s16, 6 }
  0x23   : > { %s1196_s23 = scalar_lea.vmem (!%p325_p7), [#allocation2], %s972_s17  ;;  %s1200_s24 = scalar_lea.vmem (!%p325_p7), [#allocation3], %s972_s17 }
  0x24   : > { %v378_v16 = vld [vmem:[%s1196_s23 + $0x8] sm:$0xff] (!%p325_p7)  ;;  %v377_v17 = vld [vmem:[%s1196_s23] sm:$0xff] (!%p325_p7)  ;;  %v1209_v24 = vld [vmem:[%s1200_s24 + $0x10] sm:$0xff] (!%p325_p7)  ;;  %p372_p8 = scmp.lt.s32.totalorder (!%p325_p7), %s974_s29, 15 }
  0x25   : > { %v386_v18 = vld [vmem:[%s1200_s24 + $0x8] sm:$0xff] (!%p325_p7)  ;;  %v397_v19 = vsel (!%p325_p7), %vm393_vm0, %v378_v16, 0.0  ;;  %v394_v20 = vsel (!%p325_p7), %vm393_vm0, %v377_v17, 0.0  ;;  %v385_v21 = vld [vmem:[%s1200_s24] sm:$0xff] (!%p325_p7)  ;;  %v379_v25 = vld [vmem:[%s1196_s23 + $0x10] sm:$0xff] (!%p325_p7)  ;;  %v424_v26 = vsel (!%p325_p7), %vm393_vm0, %v1209_v24, 0.0 }
  0x26   : > { %398 = vadd.xlane.f32.xlu1 (!%p325_p7), %v397_v19  ;;  %395 = vadd.xlane.f32.xlu0 (!%p325_p7), %v394_v20  ;;  %v421_v22 = vsel (!%p325_p7), %vm393_vm0, %v386_v18, 0.0  ;;  %v418_v23 = vsel (!%p325_p7), %vm393_vm0, %v385_v21, 0.0  ;;  %v400_v27 = vsel (!%p325_p7), %vm393_vm0, %v379_v25, 0.0  ;;  %v1216_v28 = vld [vmem:[%s1200_s24 + $0x18] sm:$0xff] (!%p325_p7)  ;;  %v1226_v32 = vld [vmem:[%s1200_s24 + $0x20] sm:$0xff] (!%p325_p7)  ;;  %v1236_v36 = vld [vmem:[%s1200_s24 + $0x28] sm:$0xff] (!%p325_p7) }
  0x27   : > { %v1219_v29 = vld [vmem:[%s1196_s23 + $0x18] sm:$0xff] (!%p325_p7)  ;;  %v427_v30 = vsel (!%p325_p7), %vm393_vm0, %v1216_v28, 0.0  ;;  %v1229_v33 = vld [vmem:[%s1196_s23 + $0x20] sm:$0xff] (!%p325_p7)  ;;  %v430_v34 = vsel (!%p325_p7), %vm393_vm0, %v1226_v32, 0.0  ;;  %v1239_v37 = vld [vmem:[%s1196_s23 + $0x28] sm:$0xff] (!%p325_p7)  ;;  %v433_v38 = vsel (!%p325_p7), %vm393_vm0, %v1236_v36, 0.0 }
  0x28   : > { %v403_v31 = vsel (!%p325_p7), %vm393_vm0, %v1219_v29, 0.0  ;;  %v406_v35 = vsel (!%p325_p7), %vm393_vm0, %v1229_v33, 0.0  ;;  %v409_v39 = vsel (!%p325_p7), %vm393_vm0, %v1239_v37, 0.0  ;;  %v1246_v40 = vld [vmem:[%s1200_s24 + $0x30] sm:$0xff] (!%p325_p7)  ;;  %v1256_v44 = vld [vmem:[%s1200_s24 + $0x38] sm:$0xff] (!%p325_p7) }
  0x29   : > { %v1249_v41 = vld [vmem:[%s1196_s23 + $0x30] sm:$0xff]  ;;  %v436_v42 = vsel %vm393_vm0, %v1246_v40, 0.0  ;;  %v1259_v45 = vld [vmem:[%s1196_s23 + $0x38] sm:$0xff]  ;;  %v439_v46 = vsel %vm393_vm0, %v1256_v44, 0.0  ;;  %s1441_s29 = smov (!%p372_p8, %s974_s29), 15 }
  0x2a   : > { %422 = vadd.xlane.f32.xlu1 %v421_v22  ;;  %419 = vadd.xlane.f32.xlu0 %v418_v23  ;;  %v412_v43 = vsel %vm393_vm0, %v1249_v41, 0.0  ;;  %v415_v47 = vsel %vm393_vm0, %v1259_v45, 0.0  ;;  %s975_s30 = sshll.u32 %s1441_s29, 3 }
  0x2b   : > { %s1402_s10 = scalar_lea.vmem %s1435_s5, %s975_s30 }
  0x2e   : > { %425 = vadd.xlane.f32.xlu1 %v424_v26  ;;  %401 = vadd.xlane.f32.xlu0 %v400_v27 }
  0x32   : > { %428 = vadd.xlane.f32.xlu1 %v427_v30  ;;  %404 = vadd.xlane.f32.xlu0 %v403_v31 }
  0x36   : > { %431 = vadd.xlane.f32.xlu1 %v430_v34  ;;  %407 = vadd.xlane.f32.xlu0 %v406_v35 }
  0x3a   : > { %434 = vadd.xlane.f32.xlu1 %v433_v38  ;;  %410 = vadd.xlane.f32.xlu0 %v409_v39 }
  0x3e   : > { %437 = vadd.xlane.f32.xlu1 %v436_v42  ;;  %413 = vadd.xlane.f32.xlu0 %v412_v43 }
  0x42   : > { %440 = vadd.xlane.f32.xlu1 %v439_v46  ;;  %416 = vadd.xlane.f32.xlu0 %v415_v47 }
  0xb3   : > { %v399_v48 = vpop.xlane.xlu1 %398  ;;  %v396_v49 = vpop.xlane.xlu0 %395 }
  0xb7   : > { %v423_v50 = vpop.xlane.xlu1 %422  ;;  %v420_v51 = vpop.xlane.xlu0 %419 }
  0xb8   : > { %v443_v52 = vadd.f32 %v423_v50, %v399_v48  ;;  %v442_v53 = vadd.f32 %v420_v51, %v396_v49 }
  0xba   : > { %v452_v54 = vmul.f32 0.0625, %v443_v52  ;;  %v451_v55 = vmul.f32 0.0625, %v442_v53 }
  0xbb   : > { %v426_v56 = vpop.xlane.xlu1 %425  ;;  %v402_v57 = vpop.xlane.xlu0 %401 }
  0xbc   : > { %v1265_v58 = vsub.f32 %v378_v16, %v452_v54  ;;  %v1267_v59 = vsub.f32 %v386_v18, %v452_v54  ;;  %v1269_v60 = vsub.f32 %v377_v17, %v451_v55  ;;  %v1271_v61 = vsub.f32 %v385_v21, %v451_v55 }
  0xbd   : > { %v444_v62 = vadd.f32 %v426_v56, %v402_v57 }
  0xbe   : > { %v507_v63 = vmul.f32 %v1271_v61, %v1271_v61  ;;  %v475_v0 = vmul.f32 %v1269_v60, %v1269_v60  ;;  %v508_v4 = vmul.f32 %v1267_v59, %v1267_v59  ;;  %v476_v8 = vmul.f32 %v1265_v58, %v1265_v58 }
  0xbf   : > { %v453_v1 = vmul.f32 0.0625, %v444_v62  ;;  %v429_v2 = vpop.xlane.xlu1 %428  ;;  %v405_v3 = vpop.xlane.xlu0 %404 }
  0xc0   : > { %v515_v5 = vsel %vm393_vm0, %v507_v63, 0.0  ;;  %v483_v6 = vsel %vm393_vm0, %v475_v0, 0.0  ;;  %v445_v7 = vadd.f32 %v429_v2, %v405_v3  ;;  %v518_v12 = vsel %vm393_vm0, %v508_v4, 0.0 }
  0xc1   : > { %v1283_v9 = vsub.f32 %v379_v25, %v453_v1  ;;  %v1286_v10 = vsub.f32 %v1209_v24, %v453_v1  ;;  %516 = vadd.xlane.f32.xlu1 %v515_v5  ;;  %484 = vadd.xlane.f32.xlu0 %v483_v6  ;;  %v486_v19 = vsel %vm393_vm0, %v476_v8, 0.0  ;;  %v587_v5 = vld [vmem:[%s1432_s2] sm:$0xff] }
  0xc2   : > { %v454_v11 = vmul.f32 0.0625, %v445_v7  ;;  %1030 = vmatprep.subr.mxu0 %v587_v5 }
  0xc3   : > { %v432_v13 = vpop.xlane.xlu1 %431  ;;  %v408_v14 = vpop.xlane.xlu0 %407  ;;  %v509_v15 = vmul.f32 %v1286_v10, %v1286_v10  ;;  %v477_v16 = vmul.f32 %v1283_v9, %v1283_v9  ;;  %1031 = vmatpush3.msra.mxu0 %v587_v5 }
  0xc4   : > { %v1294_v17 = vsub.f32 %v1219_v29, %v454_v11  ;;  %v1297_v18 = vsub.f32 %v1216_v28, %v454_v11  ;;  %v446_v20 = vadd.f32 %v432_v13, %v408_v14 }
  0xc5   : > { %519 = vadd.xlane.f32.xlu1 %v518_v12  ;;  %487 = vadd.xlane.f32.xlu0 %v486_v19  ;;  %v521_v21 = vsel %vm393_vm0, %v509_v15, 0.0  ;;  %v489_v23 = vsel %vm393_vm0, %v477_v16, 0.0 }
  0xc6   : > { %v455_v22 = vmul.f32 0.0625, %v446_v20  ;;  %v510_v24 = vmul.f32 %v1297_v18, %v1297_v18  ;;  %v478_v25 = vmul.f32 %v1294_v17, %v1294_v17 }
  0xc7   : > { %v435_v26 = vpop.xlane.xlu1 %434  ;;  %v411_v27 = vpop.xlane.xlu0 %410 }
  0xc8   : > { %v1307_v28 = vsub.f32 %v1229_v33, %v455_v22  ;;  %v1310_v29 = vsub.f32 %v1226_v32, %v455_v22  ;;  %v447_v30 = vadd.f32 %v435_v26, %v411_v27  ;;  %v524_v31 = vsel %vm393_vm0, %v510_v24, 0.0 }
  0xc9   : > { %522 = vadd.xlane.f32.xlu1 %v521_v21  ;;  %490 = vadd.xlane.f32.xlu0 %v489_v23  ;;  %v492_v35 = vsel %vm393_vm0, %v478_v25, 0.0 }
  0xca   : > { %v456_v34 = vmul.f32 0.0625, %v447_v30  ;;  %v511_v38 = vmul.f32 %v1310_v29, %v1310_v29  ;;  %v479_v39 = vmul.f32 %v1307_v28, %v1307_v28 }
  0xcb   : > { %v438_v42 = vpop.xlane.xlu1 %437  ;;  %v414_v33 = vpop.xlane.xlu0 %413 }
  0xcc   : > { %v1319_v43 = vsub.f32 %v1239_v37, %v456_v34  ;;  %v1322_v32 = vsub.f32 %v1236_v36, %v456_v34  ;;  %v448_v46 = vadd.f32 %v438_v42, %v414_v33  ;;  %v527_v47 = vsel %vm393_vm0, %v511_v38, 0.0 }
  0xcd   : > { %525 = vadd.xlane.f32.xlu1 %v524_v31  ;;  %493 = vadd.xlane.f32.xlu0 %v492_v35  ;;  %v495_v49 = vsel %vm393_vm0, %v479_v39, 0.0 }
  0xce   : > { %v457_v48 = vmul.f32 0.0625, %v448_v46  ;;  %v512_v50 = vmul.f32 %v1322_v32, %v1322_v32  ;;  %v480_v51 = vmul.f32 %v1319_v43, %v1319_v43 }
  0xcf   : > { %v441_v52 = vpop.xlane.xlu1 %440  ;;  %v417_v37 = vpop.xlane.xlu0 %416 }
  0xd0   : > { %v1331_v53 = vsub.f32 %v1249_v41, %v457_v48  ;;  %v1334_v36 = vsub.f32 %v1246_v40, %v457_v48  ;;  %v449_v54 = vadd.f32 %v441_v52, %v417_v37  ;;  %v530_v55 = vsel %vm393_vm0, %v512_v50, 0.0 }
  0xd1   : > { %528 = vadd.xlane.f32.xlu1 %v527_v47  ;;  %496 = vadd.xlane.f32.xlu0 %v495_v49  ;;  %v498_v57 = vsel %vm393_vm0, %v480_v51, 0.0 }
  0xd2   : > { %v458_v56 = vmul.f32 0.0625, %v449_v54  ;;  %v513_v62 = vmul.f32 %v1334_v36, %v1334_v36  ;;  %v481_v63 = vmul.f32 %v1331_v53, %v1331_v53 }
  0xd4   : > { %v1343_v41 = vsub.f32 %v1259_v45, %v458_v56  ;;  %v1346_v40 = vsub.f32 %v1256_v44, %v458_v56  ;;  %v533_v0 = vsel %vm393_vm0, %v513_v62, 0.0  ;;  %v501_v1 = vsel %vm393_vm0, %v481_v63, 0.0  ;;  %v588_v44 = vld [vmem:[%s1433_s3] sm:$0xff] }
  0xd5   : > { %531 = vadd.xlane.f32.xlu1 %v530_v55  ;;  %499 = vadd.xlane.f32.xlu0 %v498_v57 }
  0xd6   : > { %v514_v2 = vmul.f32 %v1346_v40, %v1346_v40  ;;  %v482_v3 = vmul.f32 %v1343_v41, %v1343_v41  ;;  %1016 = vmatprep.subr.mxu1 %v588_v44 }
  0xd7   : > { %1017 = vmatpush3.msra.mxu1 %v588_v44 }
  0xd8   : > { %v536_v45 = vsel %vm393_vm0, %v514_v2, 0.0  ;;  %v504_v4 = vsel %vm393_vm0, %v482_v3, 0.0 }
  0xd9   : > { %534 = vadd.xlane.f32.xlu1 %v533_v0  ;;  %502 = vadd.xlane.f32.xlu0 %v501_v1 }
  0xdd   : > { %537 = vadd.xlane.f32.xlu1 %v536_v45  ;;  %505 = vadd.xlane.f32.xlu0 %v504_v4 }
 0x14e   : > { %v517_v6 = vpop.xlane.xlu1 %516  ;;  %v485_v7 = vpop.xlane.xlu0 %484 }
 0x14f   : > { %v539_v8 = vadd.f32 %v517_v6, %v485_v7 }
 0x151   : > { %v547_v11 = vmul.f32 0.0625, %v539_v8 }
 0x152   : > { %v520_v12 = vpop.xlane.xlu1 %519  ;;  %v488_v13 = vpop.xlane.xlu0 %487 }
 0x153   : > { %v555_v14 = vadd.f32 1e-05, %v547_v11  ;;  %v540_v15 = vadd.f32 %v520_v12, %v488_v13 }
 0x155   : > { %1076 = vrsqrt.f32 %v555_v14  ;;  %v548_v16 = vmul.f32 0.0625, %v540_v15 }
 0x156   : > { %v523_v19 = vpop.xlane.xlu1 %522  ;;  %v491_v20 = vpop.xlane.xlu0 %490 }
 0x157   : > { %v556_v21 = vadd.f32 1e-05, %v548_v16  ;;  %v541_v22 = vadd.f32 %v523_v19, %v491_v20 }
 0x159   : > { %1078 = vrsqrt.f32 %v556_v21  ;;  %v549_v23 = vmul.f32 0.0625, %v541_v22 }
 0x15a   : > { %v526_v24 = vpop.xlane.xlu1 %525  ;;  %v494_v25 = vpop.xlane.xlu0 %493 }
 0x15b   : > { %v557_v26 = vadd.f32 1e-05, %v549_v23  ;;  %v542_v27 = vadd.f32 %v526_v24, %v494_v25 }
 0x15d   : > { %1080 = vrsqrt.f32 %v557_v26  ;;  %v550_v30 = vmul.f32 0.0625, %v542_v27 }
 0x15e   : > { %v529_v31 = vpop.xlane.xlu1 %528  ;;  %v497_v34 = vpop.xlane.xlu0 %496 }
 0x15f   : > { %v1077_v35 = vpop.eup %1076  ;;  %v558_v38 = vadd.f32 1e-05, %v550_v30  ;;  %v543_v39 = vadd.f32 %v529_v31, %v497_v34 }
 0x160   : > { %v579_v42 = vmul.f32 %v1077_v35, %v1271_v61  ;;  %v571_v33 = vmul.f32 %v1077_v35, %v1269_v60 }
 0x161   : > { %1082 = vrsqrt.f32 %v558_v38  ;;  %v551_v46 = vmul.f32 0.0625, %v543_v39 }
 0x162   : > { %v532_v47 = vpop.xlane.xlu1 %531  ;;  %1018 = vmatprep.mubr.msk.f32.mxu1 %vm393_vm0, %v579_v42  ;;  %1032 = vmatprep.mubr.msk.f32.mxu0 %vm393_vm0, %v571_v33  ;;  %v500_v48 = vpop.xlane.xlu0 %499 }
 0x163   : > { %v1079_v49 = vpop.eup %1078  ;;  %v559_v50 = vadd.f32 1e-05, %v551_v46  ;;  %v544_v51 = vadd.f32 %v532_v47, %v500_v48 }
 0x164   : > { %v580_v52 = vmul.f32 %v1079_v49, %v1267_v59  ;;  %v572_v37 = vmul.f32 %v1079_v49, %v1265_v58 }
 0x165   : > { %1084 = vrsqrt.f32 %v559_v50  ;;  %v552_v54 = vmul.f32 0.0625, %v544_v51 }
 0x166   : > { %v535_v61 = vpop.xlane.xlu1 %534  ;;  %1019 = vmatmul.mubr.msk.f32.vlgmr.msra.gmra.mrb[0].mxu1 %vm393_vm0, %v580_v52  ;;  %1033 = vmatmul.mubr.msk.f32.vlgmr.msra.gmra.mrb[0].mxu0 %vm393_vm0, %v572_v37  ;;  %v503_v60 = vpop.xlane.xlu0 %502 }
 0x167   : > { %v1081_v55 = vpop.eup %1080  ;;  %v560_v56 = vadd.f32 1e-05, %v552_v54  ;;  %v545_v57 = vadd.f32 %v535_v61, %v503_v60 }
 0x168   : > { %v581_v62 = vmul.f32 %v1081_v55, %v1286_v10  ;;  %v573_v63 = vmul.f32 %v1081_v55, %v1283_v9 }
 0x169   : > { %1086 = vrsqrt.f32 %v560_v56  ;;  %v553_v0 = vmul.f32 0.0625, %v545_v57 }
 0x16a   : > { %v538_v59 = vpop.xlane.xlu1 %537  ;;  %1021 = vmatprep.mubr.msk.f32.mxu1 %vm393_vm0, %v581_v62  ;;  %1035 = vmatprep.mubr.msk.f32.mxu0 %vm393_vm0, %v573_v63  ;;  %v506_v58 = vpop.xlane.xlu0 %505 }
 0x16b   : > { %v1083_v1 = vpop.eup %1082  ;;  %v561_v2 = vadd.f32 1e-05, %v553_v0  ;;  %v546_v3 = vadd.f32 %v538_v59, %v506_v58 }
 0x16c   : > { %v582_v45 = vmul.f32 %v1083_v1, %v1297_v18  ;;  %v574_v4 = vmul.f32 %v1083_v1, %v1294_v17 }
 0x16d   : > { %1088 = vrsqrt.f32 %v561_v2  ;;  %v554_v44 = vmul.f32 0.0625, %v546_v3 }
 0x16e   : > { %1022 = vmatmul.mubr.msk.f32.gmra.mrb[2].mxu1 %vm393_vm0, %v582_v45  ;;  %1036 = vmatmul.mubr.msk.f32.gmra.mrb[2].mxu0 %vm393_vm0, %v574_v4 }
 0x16f   : > { %v1085_v9 = vpop.eup %1084  ;;  %v562_v10 = vadd.f32 1e-05, %v554_v44 }
 0x170   : > { %v583_v5 = vmul.f32 %v1085_v9, %v1310_v29  ;;  %v575_v6 = vmul.f32 %v1085_v9, %v1307_v28 }
 0x171   : > { %1090 = vrsqrt.f32 %v562_v10 }
 0x172   : > { %1024 = vmatprep.mubr.msk.f32.mxu1 %vm393_vm0, %v583_v5  ;;  %1038 = vmatprep.mubr.msk.f32.mxu0 %vm393_vm0, %v575_v6 }
 0x173   : > { %v1087_v18 = vpop.eup %1086 }
 0x174   : > { %v584_v17 = vmul.f32 %v1087_v18, %v1322_v32  ;;  %v576_v7 = vmul.f32 %v1087_v18, %v1319_v43 }
 0x176   : > { %1025 = vmatmul.mubr.msk.f32.gmra.mrb[4].mxu1 %vm393_vm0, %v584_v17  ;;  %1039 = vmatmul.mubr.msk.f32.gmra.mrb[4].mxu0 %vm393_vm0, %v576_v7 }
 0x177   : > { %v1089_v8 = vpop.eup %1088 }
 0x178   : > { %v585_v29 = vmul.f32 %v1089_v8, %v1334_v36  ;;  %v577_v28 = vmul.f32 %v1089_v8, %v1331_v53  ;;  %v992_v36 = vld [vmem:[%s1434_s4] ss:$0 sm:$0xff] }
 0x17a   : > { %1027 = vmatprep.mubr.msk.f32.mxu1 %vm393_vm0, %v585_v29  ;;  %1041 = vmatprep.mubr.msk.f32.mxu0 %vm393_vm0, %v577_v28 }
 0x17b   : > { %v1091_v11 = vpop.eup %1090 }
 0x17c   : > { %v586_v12 = vmul.f32 %v1091_v11, %v1346_v40  ;;  %v578_v32 = vmul.f32 %v1091_v11, %v1343_v41 }
 0x17e   : > { %1028 = vmatmul.mubr.msk.f32.gmra.mrb[6].mxu1 %vm393_vm0, %v586_v12  ;;  %1042 = vmatmul.mubr.msk.f32.gmra.mrb[6].mxu0 %vm393_vm0, %v578_v32 }
 0x239   : > { %v1020_v43 = vpop.f32.mrb[0].mxu1  ;;  %v1034_v53 = vpop.f32.mrb[0].mxu0 }
 0x23a   : > { %v814_v13 = vadd.f32 %v1034_v53, %v1020_v43  ;;  %v679_v14 = vpop.f32.mrb[1].mxu1  ;;  %v808_v40 = vpop.f32.mrb[1].mxu0 }
 0x23b   : > { %v809_v41 = vadd.f32 %v808_v40, %v679_v14 }
 0x23c   : > { %v855_v15 = vadd.f32 %v992_v36, %v814_v13 }
 0x23d   : > { %v854_v16 = vadd.f32 %v992_v36, %v809_v41 }
 0x23e   : > { %863 = vst.msk [vmem:[%s1402_s10 + $0x8] sm:$0xff] %vm393_vm0, %v855_v15 }
 0x23f   : > { %862 = vst.msk [vmem:[%s1402_s10] sm:$0xff] %vm393_vm0, %v854_v16 }
 0x241   : > { %v1023_v19 = vpop.f32.mrb[2].mxu1  ;;  %v1037_v20 = vpop.f32.mrb[2].mxu0 }
 0x242   : > { %v824_v21 = vadd.f32 %v1037_v20, %v1023_v19  ;;  %v689_v22 = vpop.f32.mrb[3].mxu1  ;;  %v818_v23 = vpop.f32.mrb[3].mxu0 }
 0x243   : > { %v819_v24 = vadd.f32 %v818_v23, %v689_v22 }
 0x244   : > { %v857_v25 = vadd.f32 %v992_v36, %v824_v21 }
 0x245   : > { %v856_v26 = vadd.f32 %v992_v36, %v819_v24 }
 0x246   : > { %865 = vst.msk [vmem:[%s1402_s10 + $0x18] sm:$0xff] %vm393_vm0, %v857_v25 }
 0x247   : > { %864 = vst.msk [vmem:[%s1402_s10 + $0x10] sm:$0xff] %vm393_vm0, %v856_v26 }
 0x249   : > { %v1026_v27 = vpop.f32.mrb[4].mxu1  ;;  %v1040_v30 = vpop.f32.mrb[4].mxu0 }
 0x24a   : > { %v834_v31 = vadd.f32 %v1040_v30, %v1026_v27  ;;  %v699_v34 = vpop.f32.mrb[5].mxu1  ;;  %v828_v35 = vpop.f32.mrb[5].mxu0 }
 0x24b   : > { %v829_v38 = vadd.f32 %v828_v35, %v699_v34 }
 0x24c   : > { %v859_v39 = vadd.f32 %v992_v36, %v834_v31 }
 0x24d   : > { %v858_v42 = vadd.f32 %v992_v36, %v829_v38 }
 0x24e   : > { %867 = vst.msk [vmem:[%s1402_s10 + $0x28] sm:$0xff] %vm393_vm0, %v859_v39 }
 0x24f   : > { %866 = vst.msk [vmem:[%s1402_s10 + $0x20] sm:$0xff] %vm393_vm0, %v858_v42 }
 0x251   : > { %v1029_v33 = vpop.f32.mrb[6].mxu1  ;;  %v1043_v46 = vpop.f32.mrb[6].mxu0 }
 0x252   : > { %v844_v47 = vadd.f32 %v1043_v46, %v1029_v33  ;;  %v709_v48 = vpop.f32.mrb[7].mxu1  ;;  %v838_v49 = vpop.f32.mrb[7].mxu0 }
 0x253   : > { %v839_v50 = vadd.f32 %v838_v49, %v709_v48 }
 0x254   : > { %v861_v51 = vadd.f32 %v992_v36, %v844_v47 }
 0x255   : > { %v860_v52 = vadd.f32 %v992_v36, %v839_v50 }
 0x256   : > { %869 = vst.msk [vmem:[%s1402_s10 + $0x38] sm:$0xff] %vm393_vm0, %v861_v51 }
 0x257   : > { %868 = vst.msk [vmem:[%s1402_s10 + $0x30] sm:$0xff] %vm393_vm0, %v860_v52 }
 0x258 PF: > { %p12_p9 = scmp.ge.s32.totalorder %s1163_s22, 4   ;;  %s1437_s18 = smov %s1110_s19 }
 0x259   : > { %s1438_s19 = smov %s1172_s25  ;;  %s1439_s20 = smov %s1163_s22 }
 0x25a   :  { %14 = sbr.rel (!%p12_p9) target bundleno = 2 (0x2), region = 159 }

// kernel: fvm_encoder_block_forward.7
= control target key start
LH: loop header
LB: loop body
LE: loop exit
PB: predicated region body
PF: predicated region fallthrough
CT: control target
= control target key end

     0   :  { %16 = vsyncpa [#allocation3], 0  ;;  %s2050_s0 = inlined_call_operand.vmem [shape: f32[128,12], index: 0, kind: input, shape index: {}]   ;;  %s2051_s1 = inlined_call_operand.vmem [shape: f32[128,12], index: 1, kind: input, shape index: {}]   ;;  %s2052_s2 = inlined_call_operand.vmem [shape: f32[128,8], index: 2, kind: input, shape index: {}]   ;;  %s2053_s3 = inlined_call_operand.vmem [shape: f32[12,12], index: 3, kind: input, shape index: {}]   ;;  %s2054_s4 = inlined_call_operand.vmem [shape: f32[1,12], index: 4, kind: input, shape index: {}]   ;;  %s2055_s5 = inlined_call_operand.vmem [shape: f32[12,12], index: 5, kind: input, shape index: {}]   ;;  %s2056_s6 = inlined_call_operand.vmem [shape: f32[1,12], index: 6, kind: input, shape index: {}]   ;;  %s2057_s7 = inlined_call_operand.vmem [shape: f32[1,12], index: 7, kind: input, shape index: {}]   ;;  %s2058_s8 = inlined_call_operand.vmem [shape: f32[12,8], index: 8, kind: input, shape index: {}]   ;;  %s2059_s9 = inlined_call_operand.vmem [shape: f32[1,8], index: 9, kind: input, shape index: {}]   ;;  %s2060_s10 = inlined_call_operand.vmem [shape: f32[1,8], index: 10, kind: input, shape index: {}]   ;;  %s2061_s11 = inlined_call_operand.hbm [shape: f32[128,8], index: 11, kind: output, shape index: {}]  }
   0x1   :  { %18 = vsyncpa [#allocation3 + $0x1], 0  ;;  %s1699_s17 = smov 0   ;;  %s1701_s18 = smov 0  }
   0x2   :  { %s1703_s19 = smov 0   ;;  %s1705_s20 = smov 0  }
   0x3 LB: > { %s1720_s21 = sadd.s32 4294967295, %s1633_s20   ;;  %s1318_s22 = sadd.s32 4294967294, %s1633_s20   ;;  %s1633_s20 = sphi %s1705_s20, %s2069_s20   ;;  %s1629_s19 = sphi %s1703_s19, %s2068_s19   ;;  %s1625_s18 = sphi %s1701_s18, %s2067_s18   ;;  %s1621_s17 = sphi %s1699_s17, %s2066_s17  }
   0x4   : > { %s1724_s23 = sadd.s32 1, %s1633_s20   ;;  %s277_s24 = sadd.s32 1, %s1629_s19 }
   0x5   : > { %s274_s25 = ssub.s32 %s1633_s20, %s1724_s23  ;;  %p287_p0 = scmp.ne.s32.totalorder %s1629_s19, %s1625_s18 }
   0x6   : > { %p275_p1 = scmp.eq.s32.totalorder %s274_s25, 0  ;;  %p288_p2 = scmp.eq.s32.totalorder %s1720_s21, 1 }
   0x7   : > { %p293_p3 = scmp.ne.s32.totalorder %s1625_s18, %s1621_s17  ;;  %p294_p4 = scmp.eq.s32.totalorder %s1318_s22, 1 }
   0x8   : > { %s1735_s26 = scalar_select %p275_p1, %s1629_s19, %s277_s24  }
   0x9   : > { %p1737_p5 = por %p288_p2, %p287_p0  ;;  %p1741_p6 = por %p294_p4, %p293_p3 }
   0xa   : > { %p1321_p7 = scmp.ge.s32.totalorder %s1633_s20, 1  ;;  %p363_p8 = scmp.lt.s32.totalorder %s1633_s20, 3 }
   0xc   : > { %p364_p9 = pnand %p1321_p7, %p363_p8 }
   0xd   : > { %v440_v0 = vld [vmem:[%s2053_s3] sm:$0xff] (!%p364_p9)  ;;  %v441_v1 = vld [vmem:[%s2053_s3 + $0x8] sm:$0xf] (!%p364_p9)  ;;  %vm474_vm0 = vcmask (!%p364_p9), 1043456   ;;  %s1323_s14 = sshll.u32 (!%p364_p9), %s1720_s21, 3  ;;  %vm1635_vm1 = vmmov (!%p364_p9), 1  }
   0xe   : > { %367 = sbr.rel (%p364_p9) target bundleno = 1360 (0x550), region = 64  ;;  %v1445_v2 = vpack.c.bf16 (!%p364_p9), %v441_v1, %v440_v0  ;;  %vm1754_vm2 = vmpackc.low (!%p364_p9), %vm474_vm0, %vm1635_vm1  ;;  %p414_p10 = scmp.lt.s32.totalorder (!%p364_p9), %s1323_s14, 15  ;;  %vm449_vm3 = vcmask (!%p364_p9), 97280   ;;  %v639_v12 = vld [vmem:[%s2055_s5] sm:$0xff] (!%p364_p9)  ;;  %v640_v13 = vld [vmem:[%s2055_s5 + $0x8] sm:$0xf] (!%p364_p9) }
   0xf   : > { %v1451_v14 = vpack.c.bf16 (!%p364_p9), %v640_v13, %v639_v12  ;;  %v1329_v15 = vld [vmem:[%s2054_s4] ss:$0 sm:$0xff] (!%p364_p9)  ;;  %vm1074_vm4 = vcmask (!%p364_p9), 64512  }
  0x10   : > { %1447 = vmatprep.subr.msk.bf16.mxu0 (!%p364_p9), %vm1754_vm2, %v1445_v2  ;;  %1463 = vmatprep.subr.msk.bf16.mxu1 (!%p364_p9), %vm1754_vm2, %v1445_v2 }
  0x11   : > { %1450 = vmatpush3.bf16.msk.msra.mxu0 (!%p364_p9), %vm1754_vm2, %v1445_v2  ;;  %1464 = vmatpush3.bf16.msk.msra.mxu1 (!%p364_p9), %vm1754_vm2, %v1445_v2 }
  0x12   : > { %1453 = vmatprep.subr.msk.bf16.mxu1 (!%p364_p9), %vm1754_vm2, %v1451_v14 }
  0x15   : > { %s2071_s14 = smov (!%p414_p10, %s1323_s14), 15 }
  0x16   : > { %s1766_s15 = sshll.u32 %s2071_s14, 3 }
  0x17   : > { %s417_s24 = scalar_lea.vmem %s2050_s0, %s1766_s15  ;;  %s1882_s14 = scalar_lea.vmem %s2051_s1, %s1766_s15 }
  0x18   : > { %v432_v4 = vld [vmem:[%s417_s24] sm:$0xff]  ;;  %v433_v6 = vld [vmem:[%s417_s24 + $0x8] sm:$0xff]  ;;  %v434_v8 = vld [vmem:[%s417_s24 + $0x10] sm:$0xff]  ;;  %s429_s29 = scalar_lea.vmem %s2052_s2, %s1766_s15  ;;  %s410_s15 = sand.u32 1, %s1625_s18  }
  0x19   : > { %v436_v5 = vld [vmem:[%s417_s24 + $0x20] sm:$0xff]  ;;  %1401 = vmatprep.mubr.msk.f32.mxu0 %vm449_vm3, %v432_v4  ;;  %v437_v7 = vld [vmem:[%s417_s24 + $0x28] sm:$0xff]  ;;  %v438_v9 = vld [vmem:[%s417_s24 + $0x30] sm:$0xff]  ;;  %s1322_s13 = sshll.u32 %s410_s15, 6 }
  0x1a   : > { %1407 = vmatprep.mubr.msk.f32.mxu1 %vm449_vm3, %v436_v5  ;;  %1402 = vmatmul.mubr.msk.f32.vlgmr.msra.gmra.mrb[0].mxu0 %vm449_vm3, %v433_v6  ;;  %v435_v10 = vld [vmem:[%s417_s24 + $0x18] sm:$0xff]  ;;  %s1976_s22 = scalar_lea.vmem [#allocation2], %s1322_s13 }
  0x1b   : > { %1408 = vmatmul.mubr.msk.f32.vlgmr.msra.gmra.mrb[0].mxu1 %vm449_vm3, %v437_v7  ;;  %1404 = vmatprep.mubr.msk.f32.mxu0 %vm449_vm3, %v434_v8  ;;  %v439_v11 = vld [vmem:[%s417_s24 + $0x38] sm:$0xff]  ;;  %s1366_s24 = sshll.u32 %s1720_s21, 10  ;;  %s1232_s25 = sshll.u32 %s1976_s22, 4  ;;  %s2001_s25 = int_to_ptr.vmem [resolvable:$true] %s1232_s25 }
  0x1c   : > { %1410 = vmatprep.mubr.msk.f32.mxu1 %vm449_vm3, %v438_v9  ;;  %1456 = vmatpush3.bf16.msk.msra.mxu1 %vm1754_vm2, %v1451_v14  ;;  %s1999_s12 = scalar_lea.hbm %s2061_s11, %s1366_s24  ;;  %s2009_s21 = scalar_lea.sflag [#allocation3], %s410_s15 }
  0x1d   : > { %s1571_s13 = scalar_lea.vmem %s2001_s25, 1024 }
  0x1e   : > { %1405 = vmatmul.mubr.msk.f32.gmra.mrb[2].mxu0 %vm449_vm3, %v435_v10  ;;  %p1572_p11 = scmp.ne.s32.totalorder %s2001_s25, %s1571_s13 }
  0x1f   : > { %1411 = vmatmul.mubr.msk.f32.gmra.mrb[2].mxu1 %vm449_vm3, %v439_v11 }
  0x20   : > { %p1573_p12 = pnand %p1572_p11, %p1737_p5 }
  0x22   : > { %p1574_p13 = pneg %p1573_p12 }
  0xed   : > { %v1403_v16 = vpop.f32.mrb[0].mxu0 }
  0xee   : > { %v1409_v17 = vpop.f32.mrb[0].mxu1  ;;  %v1793_v18 = vadd.f32 %v1403_v16, %v1329_v15  ;;  %v544_v20 = vpop.f32.mrb[1].mxu0 }
  0xef   : > { %v1795_v19 = vadd.f32 %v1409_v17, %v1329_v15  ;;  %v564_v21 = vpop.f32.mrb[1].mxu1  ;;  %v545_v22 = vadd.f32 %v1329_v15, %v544_v20 }
  0xf0   : > { %v1797_v23 = vadd.f32 %v1329_v15, %v564_v21  ;;  %v584_v24 = vsub.f32 0.0, %v1793_v18 }
  0xf1   : > { %v588_v25 = vsub.f32 0.0, %v1795_v19  ;;  %v583_v26 = vsub.f32 0.0, %v545_v22  ;;  %v1406_v28 = vpop.f32.mrb[2].mxu0 }
  0xf2   : > { %v587_v27 = vsub.f32 0.0, %v1797_v23  ;;  %v1412_v29 = vpop.f32.mrb[2].mxu1  ;;  %v593_v30 = vmul.f32 1.442695, %v584_v24  ;;  %v560_v31 = vadd.f32 %v1406_v28, %v1329_v15  ;;  %v554_v33 = vpop.f32.mrb[3].mxu0 }
  0xf3   : > { %v1802_v32 = vadd.f32 %v1412_v29, %v1329_v15  ;;  %v574_v34 = vpop.f32.mrb[3].mxu1  ;;  %v591_v35 = vmul.f32 1.442695, %v583_v26  ;;  %v555_v37 = vadd.f32 %v1329_v15, %v554_v33  ;;  %v601_v40 = vmul.f32 1.442695, %v588_v25 }
  0xf4   : > { %v599_v36 = vmul.f32 1.442695, %v587_v27  ;;  %v575_v38 = vadd.f32 %v1329_v15, %v574_v34  ;;  %1507 = vpow2.f32 %v593_v30  ;;  %v586_v39 = vsub.f32 0.0, %v560_v31 }
  0xf5   : > { %v590_v41 = vsub.f32 0.0, %v1802_v32  ;;  %v585_v42 = vsub.f32 0.0, %v555_v37  ;;  %1509 = vpow2.f32 %v591_v35 }
  0xf6   : > { %v589_v43 = vsub.f32 0.0, %v575_v38  ;;  %v597_v44 = vmul.f32 1.442695, %v586_v39  ;;  %1511 = vpow2.f32 %v599_v36 }
  0xf7   : > { %v595_v45 = vmul.f32 1.442695, %v585_v42  ;;  %v605_v47 = vmul.f32 1.442695, %v590_v41 }
  0xf8   : > { %v603_v46 = vmul.f32 1.442695, %v589_v43  ;;  %1513 = vpow2.f32 %v597_v44 }
  0xf9   : > { %1515 = vpow2.f32 %v601_v40 }
  0xfa   : > { %1517 = vpow2.f32 %v595_v45 }
  0xfb   : > { %1519 = vpow2.f32 %v603_v46 }
  0xfc   : > { %1521 = vpow2.f32 %v605_v47 }
  0xfe   : > { %v1508_v48 = vpop.eup %1507 }
  0xff   : > { %v608_v49 = vadd.f32 1.0, %v1508_v48  ;;  %v1510_v50 = vpop.eup %1509 }
 0x100   : > { %v1512_v51 = vpop.eup %1511  ;;  %v607_v52 = vadd.f32 1.0, %v1510_v50 }
 0x101   : > { %1523 = vrcp.f32 %v608_v49  ;;  %v611_v54 = vadd.f32 1.0, %v1512_v51 }
 0x102   : > { %v1514_v53 = vpop.eup %1513  ;;  %1525 = vrcp.f32 %v607_v52 }
 0x103   : > { %v1516_v55 = vpop.eup %1515  ;;  %v610_v56 = vadd.f32 1.0, %v1514_v53  ;;  %1527 = vrcp.f32 %v611_v54 }
 0x104   : > { %v1518_v57 = vpop.eup %1517  ;;  %v612_v60 = vadd.f32 1.0, %v1516_v55 }
 0x105   : > { %v1520_v58 = vpop.eup %1519  ;;  %v609_v59 = vadd.f32 1.0, %v1518_v57  ;;  %1529 = vrcp.f32 %v610_v56 }
 0x106   : > { %v1522_v61 = vpop.eup %1521  ;;  %v613_v62 = vadd.f32 1.0, %v1520_v58 }
 0x107   : > { %1531 = vrcp.f32 %v609_v59  ;;  %v614_v63 = vadd.f32 1.0, %v1522_v61 }
 0x108   : > { %1533 = vrcp.f32 %v612_v60 }
 0x109   : > { %1535 = vrcp.f32 %v613_v62 }
 0x10a   : > { %1537 = vrcp.f32 %v614_v63 }
 0x10b   : > { %v1524_v0 = vpop.eup %1523 }
 0x10c   : > { %v1526_v1 = vpop.eup %1525  ;;  %v632_v5 = vmul.f32 %v1524_v0, %v1793_v18 }
 0x10d   : > { %v631_v2 = vmul.f32 %v1526_v1, %v545_v22  ;;  %v1528_v4 = vpop.eup %1527 }
 0x10e   : > { %v635_v11 = vmul.f32 %v1528_v4, %v1797_v23 }
 0x10f   : > { %v1530_v6 = vpop.eup %1529  ;;  %1417 = vmatprep.mubr.msk.f32.mxu1 %vm449_vm3, %v631_v2 }
 0x110   : > { %1418 = vmatmul.mubr.msk.f32.vlgmr.msra.gmra.mrb[4].mxu1 %vm449_vm3, %v632_v5  ;;  %v634_v9 = vmul.f32 %v1530_v6, %v560_v31 }
 0x111   : > { %v1532_v7 = vpop.eup %1531 }
 0x112   : > { %v633_v8 = vmul.f32 %v1532_v7, %v555_v37  ;;  %v1534_v10 = vpop.eup %1533 }
 0x113   : > { %v1536_v12 = vpop.eup %1535  ;;  %v636_v13 = vmul.f32 %v1534_v10, %v1795_v19  ;;  %v924_v10 = vld [vmem:[%s2058_s8] sm:$0xff] }
 0x114   : > { %1420 = vmatprep.mubr.msk.f32.mxu1 %vm449_vm3, %v633_v8  ;;  %v1538_v14 = vpop.eup %1537  ;;  %v637_v15 = vmul.f32 %v1536_v12, %v575_v38 }
 0x115   : > { %1421 = vmatmul.mubr.msk.f32.gmra.mrb[6].mxu1 %vm449_vm3, %v634_v9  ;;  %v638_v16 = vmul.f32 %v1538_v14, %v1802_v32 }
 0x116   : > { %1423 = vmatprep.mubr.msk.f32.mxu1 %vm449_vm3, %v635_v11  ;;  %v925_v11 = vld [vmem:[%s2058_s8 + $0x8] sm:$0xf] }
 0x117   : > { %v1457_v12 = vpack.c.bf16 %v925_v11, %v924_v10 }
 0x119   : > { %1424 = vmatmul.mubr.msk.f32.gmra.mrb[8].mxu1 %vm449_vm3, %v636_v13  ;;  %1459 = vmatprep.subr.msk.bf16.mxu0 %vm1754_vm2, %v1457_v12 }
 0x11a   : > { %1426 = vmatprep.mubr.msk.f32.mxu1 %vm449_vm3, %v637_v15  ;;  %1462 = vmatpush3.bf16.msk.msra.mxu0 %vm1754_vm2, %v1457_v12 }
 0x11d   : > { %1427 = vmatmul.mubr.msk.f32.gmra.mrb[10].mxu1 %vm449_vm3, %v638_v16 }
 0x1e3   : > { %v1419_v17 = vpop.f32.mrb[4].mxu1 }
 0x1e4   : > { %v734_v18 = vpop.f32.mrb[5].mxu1  ;;  %v776_v23 = vsel %vm449_vm3, %v1419_v17, 0.0 }
 0x1e5   : > { %v773_v20 = vsel %vm449_vm3, %v734_v18, 0.0 }
 0x1e6   : > { %774 = vadd.xlane.f32.xlu0 %v773_v20 }
 0x1e8   : > { %v1422_v21 = vpop.f32.mrb[6].mxu1 }
 0x1e9   : > { %v744_v22 = vpop.f32.mrb[7].mxu1  ;;  %v782_v26 = vsel %vm449_vm3, %v1422_v21, 0.0 }
 0x1ea   : > { %v779_v19 = vsel %vm449_vm3, %v744_v22, 0.0  ;;  %777 = vadd.xlane.f32.xlu0 %v776_v23 }
 0x1eb   : > { %780 = vadd.xlane.f32.xlu1 %v779_v19 }
 0x1ec   : > { %v1425_v24 = vpop.f32.mrb[8].mxu1 }
 0x1ed   : > { %v754_v25 = vpop.f32.mrb[9].mxu1  ;;  %v788_v30 = vsel %vm449_vm3, %v1425_v24, 0.0 }
 0x1ee   : > { %v785_v27 = vsel %vm449_vm3, %v754_v25, 0.0 }
 0x1ef   : > { %783 = vadd.xlane.f32.xlu1 %v782_v26  ;;  %786 = vadd.xlane.f32.xlu0 %v785_v27 }
 0x1f0   : > { %v1428_v28 = vpop.f32.mrb[10].mxu1 }
 0x1f1   : > { %v764_v29 = vpop.f32.mrb[11].mxu1  ;;  %v794_v32 = vsel %vm449_vm3, %v1428_v28, 0.0 }
 0x1f2   : > { %v791_v31 = vsel %vm449_vm3, %v764_v29, 0.0 }
 0x1f3   : > { %789 = vadd.xlane.f32.xlu1 %v788_v30  ;;  %792 = vadd.xlane.f32.xlu0 %v791_v31 }
 0x1f7   : > { %795 = vadd.xlane.f32.xlu1 %v794_v32  ;;  %v1348_v32 = vld [vmem:[%s2056_s6] ss:$0 sm:$0xff] }
 0x273   : > { %v775_v33 = vpop.xlane.xlu0 %774 }
 0x274   : > { %v798_v34 = vmul.f32 0.083333336, %v775_v33 }
 0x276   : > { %v1825_v35 = vsub.f32 %v734_v18, %v798_v34 }
 0x277   : > { %v778_v36 = vpop.xlane.xlu0 %777 }
 0x278   : > { %v781_v37 = vpop.xlane.xlu1 %780  ;;  %v799_v38 = vmul.f32 0.083333336, %v778_v36  ;;  %v814_v40 = vmul.f32 %v1825_v35, %v1825_v35 }
 0x279   : > { %v800_v39 = vmul.f32 0.083333336, %v781_v37 }
 0x27a   : > { %v1829_v41 = vsub.f32 %v1419_v17, %v799_v38  ;;  %v822_v43 = vsel %vm449_vm3, %v814_v40, 0.0  ;;  %v1349_v38 = vld [vmem:[%s2057_s7] ss:$0 sm:$0xff] }
 0x27b   : > { %v1831_v42 = vsub.f32 %v744_v22, %v800_v39  ;;  %823 = vadd.xlane.f32.xlu0 %v822_v43 }
 0x27c   : > { %v784_v44 = vpop.xlane.xlu1 %783  ;;  %v787_v45 = vpop.xlane.xlu0 %786  ;;  %v815_v48 = vmul.f32 %v1829_v41, %v1829_v41 }
 0x27d   : > { %v801_v46 = vmul.f32 0.083333336, %v784_v44  ;;  %v802_v47 = vmul.f32 0.083333336, %v787_v45  ;;  %v816_v49 = vmul.f32 %v1831_v42, %v1831_v42  ;;  %v908_v45 = vld [vmem:[%s1882_s14] sm:$0xff] }
 0x27e   : > { %v825_v52 = vsel %vm449_vm3, %v815_v48, 0.0 }
 0x27f   : > { %v1838_v50 = vsub.f32 %v1422_v21, %v801_v46  ;;  %v1840_v51 = vsub.f32 %v754_v25, %v802_v47  ;;  %v828_v53 = vsel %vm449_vm3, %v816_v49, 0.0  ;;  %826 = vadd.xlane.f32.xlu1 %v825_v52 }
 0x280   : > { %v790_v54 = vpop.xlane.xlu1 %789  ;;  %829 = vadd.xlane.f32.xlu0 %v828_v53  ;;  %v793_v55 = vpop.xlane.xlu0 %792 }
 0x281   : > { %v803_v56 = vmul.f32 0.083333336, %v790_v54  ;;  %v804_v57 = vmul.f32 0.083333336, %v793_v55  ;;  %v817_v58 = vmul.f32 %v1838_v50, %v1838_v50  ;;  %v818_v59 = vmul.f32 %v1840_v51, %v1840_v51  ;;  %v909_v54 = vld [vmem:[%s1882_s14 + $0x8] sm:$0xff] }
 0x283   : > { %v1848_v60 = vsub.f32 %v1425_v24, %v803_v56  ;;  %v1850_v61 = vsub.f32 %v764_v29, %v804_v57  ;;  %v831_v62 = vsel %vm449_vm3, %v817_v58, 0.0  ;;  %v834_v63 = vsel %vm449_vm3, %v818_v59, 0.0  ;;  %v910_v59 = vld [vmem:[%s1882_s14 + $0x10] sm:$0xff] }
 0x284   : > { %832 = vadd.xlane.f32.xlu1 %v831_v62  ;;  %v796_v0 = vpop.xlane.xlu1 %795  ;;  %835 = vadd.xlane.f32.xlu0 %v834_v63 }
 0x285   : > { %v805_v1 = vmul.f32 0.083333336, %v796_v0  ;;  %v819_v2 = vmul.f32 %v1848_v60, %v1848_v60  ;;  %v820_v4 = vmul.f32 %v1850_v61, %v1850_v61 }
 0x287   : > { %v1858_v5 = vsub.f32 %v1428_v28, %v805_v1  ;;  %v837_v6 = vsel %vm449_vm3, %v819_v2, 0.0  ;;  %v840_v7 = vsel %vm449_vm3, %v820_v4, 0.0  ;;  %v911_v2 = vld [vmem:[%s1882_s14 + $0x18] sm:$0xff] }
 0x288   : > { %838 = vadd.xlane.f32.xlu1 %v837_v6  ;;  %841 = vadd.xlane.f32.xlu0 %v840_v7 }
 0x289   : > { %v821_v8 = vmul.f32 %v1858_v5, %v1858_v5 }
 0x28b   : > { %v843_v9 = vsel %vm449_vm3, %v821_v8, 0.0  ;;  %v912_v8 = vld [vmem:[%s1882_s14 + $0x20] sm:$0xff] }
 0x28c   : > { %844 = vadd.xlane.f32.xlu1 %v843_v9 }
 0x308   : > { %v824_v13 = vpop.xlane.xlu0 %823 }
 0x309   : > { %v846_v14 = vmul.f32 0.083333336, %v824_v13 }
 0x30b   : > { %v854_v15 = vadd.f32 1e-05, %v846_v14  ;;  %v913_v14 = vld [vmem:[%s1882_s14 + $0x28] sm:$0xff] }
 0x30c   : > { %v827_v16 = vpop.xlane.xlu1 %826 }
 0x30d   : > { %v830_v17 = vpop.xlane.xlu0 %829  ;;  %1539 = vrsqrt.f32 %v854_v15  ;;  %v847_v18 = vmul.f32 0.083333336, %v827_v16 }
 0x30e   : > { %v848_v20 = vmul.f32 0.083333336, %v830_v17  ;;  %v914_v17 = vld [vmem:[%s1882_s14 + $0x30] sm:$0xff] }
 0x30f   : > { %v855_v21 = vadd.f32 1e-05, %v847_v18 }
 0x310   : > { %v856_v22 = vadd.f32 1e-05, %v848_v20 }
 0x311   : > { %v833_v23 = vpop.xlane.xlu1 %832  ;;  %v836_v19 = vpop.xlane.xlu0 %835  ;;  %1541 = vrsqrt.f32 %v855_v21 }
 0x312   : > { %v849_v24 = vmul.f32 0.083333336, %v833_v23  ;;  %v850_v25 = vmul.f32 0.083333336, %v836_v19  ;;  %1543 = vrsqrt.f32 %v856_v22  ;;  %v915_v22 = vld [vmem:[%s1882_s14 + $0x38] sm:$0xff]  ;;  %s1636_s14 = smov [#allocation2]  }
 0x313   : > { %s1575_s16 = sshll.u32 %s1636_s14, 4  ;;  %s1576_s16 = int_to_ptr.vmem [resolvable:$false] %s1575_s16 }
 0x314   : > { %v857_v26 = vadd.f32 1e-05, %v849_v24  ;;  %v858_v3 = vadd.f32 1e-05, %v850_v25  ;;  %v1058_v24 = vld [vmem:[%s429_s29] sm:$0xff]  ;;  %s1577_s24 = scalar_lea.vmem %s1576_s16, 2048  ;;  %p1578_p0 = scmp.lt.s32.totalorder %s2001_s25, %s1576_s16 }
 0x315   : > { %v839_v27 = vpop.xlane.xlu1 %838  ;;  %v842_v28 = vpop.xlane.xlu0 %841  ;;  %p1579_p1 = scmp.lt.s32.totalorder %s1577_s24, %s1571_s13 }
 0x316   : > { %1545 = vrsqrt.f32 %v857_v26  ;;  %v851_v29 = vmul.f32 0.083333336, %v839_v27  ;;  %v852_v30 = vmul.f32 0.083333336, %v842_v28  ;;  %v1061_v28 = vld [vmem:[%s429_s29 + $0x18] sm:$0xff] }
 0x317   : > { %1547 = vrsqrt.f32 %v858_v3  ;;  %v1540_v31 = vpop.eup %1539  ;;  %p1580_p2 = por %p1579_p1, %p1578_p0 }
 0x318   : > { %v859_v33 = vadd.f32 1e-05, %v851_v29  ;;  %v860_v34 = vadd.f32 1e-05, %v852_v30  ;;  %v870_v36 = vmul.f32 %v1540_v31, %v1825_v35  ;;  %v1060_v30 = vld [vmem:[%s429_s29 + $0x10] sm:$0xff] }
 0x319   : > { %v845_v37 = vpop.xlane.xlu1 %844  ;;  %p1581_p3 = pnand %p1580_p2, %p1574_p13 }
 0x31a   : > { %1549 = vrsqrt.f32 %v859_v33  ;;  %v853_v39 = vmul.f32 0.083333336, %v845_v37  ;;  %v885_v40 = vmul.f32 %v1348_v32, %v870_v36  ;;  %v1063_v37 = vld [vmem:[%s429_s29 + $0x28] sm:$0xff] }
 0x31b   : > { %1551 = vrsqrt.f32 %v860_v34  ;;  %v1542_v43 = vpop.eup %1541 }
 0x31c   : > { %v861_v44 = vadd.f32 1e-05, %v853_v39  ;;  %v1544_v46 = vpop.eup %1543  ;;  %v871_v47 = vmul.f32 %v1542_v43, %v1829_v41  ;;  %v900_v48 = vadd.f32 %v1349_v38, %v885_v40  ;;  %v1062_v39 = vld [vmem:[%s429_s29 + $0x20] sm:$0xff] }
 0x31d   : > { %v872_v35 = vmul.f32 %v1544_v46, %v1831_v42 }
 0x31e   : > { %1553 = vrsqrt.f32 %v861_v44  ;;  %v886_v49 = vmul.f32 %v1348_v32, %v871_v47  ;;  %v916_v52 = vmul.f32 %v908_v45, %v900_v48  ;;  %v1065_v47 = vld [vmem:[%s429_s29 + $0x38] sm:$0xff] }
 0x31f   : > { %v887_v55 = vmul.f32 %v1348_v32, %v872_v35  ;;  %v1064_v35 = vld [vmem:[%s429_s29 + $0x30] sm:$0xff] }
 0x320   : > { %v1546_v53 = vpop.eup %1545  ;;  %v901_v57 = vadd.f32 %v1349_v38, %v886_v49  ;;  %1433 = vmatprep.mubr.msk.f32.mxu0 %vm449_vm3, %v916_v52 }
 0x321   : > { %v1548_v56 = vpop.eup %1547  ;;  %v873_v58 = vmul.f32 %v1546_v53, %v1838_v50  ;;  %v902_v62 = vadd.f32 %v1349_v38, %v887_v55 }
 0x322   : > { %v874_v41 = vmul.f32 %v1548_v56, %v1840_v51  ;;  %v917_v63 = vmul.f32 %v909_v54, %v901_v57 }
 0x323   : > { %v888_v42 = vmul.f32 %v1348_v32, %v873_v58  ;;  %v918_v1 = vmul.f32 %v910_v59, %v902_v62 }
 0x324   : > { %v1550_v0 = vpop.eup %1549  ;;  %v889_v4 = vmul.f32 %v1348_v32, %v874_v41  ;;  %1434 = vmatmul.mubr.msk.f32.vlgmr.msra.gmra.mrb[4].mxu0 %vm449_vm3, %v917_v63 }
 0x325   : > { %v1552_v6 = vpop.eup %1551  ;;  %v875_v7 = vmul.f32 %v1550_v0, %v1848_v60  ;;  %v903_v50 = vadd.f32 %v1349_v38, %v888_v42  ;;  %1436 = vmatprep.mubr.msk.f32.mxu0 %vm449_vm3, %v918_v1 }
 0x326   : > { %v876_v9 = vmul.f32 %v1552_v6, %v1850_v61  ;;  %v904_v51 = vadd.f32 %v1349_v38, %v889_v4 }
 0x327   : > { %v919_v10 = vmul.f32 %v911_v2, %v903_v50  ;;  %v890_v11 = vmul.f32 %v1348_v32, %v875_v7 }
 0x328   : > { %v1554_v12 = vpop.eup %1553  ;;  %v920_v13 = vmul.f32 %v912_v8, %v904_v51  ;;  %v891_v15 = vmul.f32 %v1348_v32, %v876_v9 }
 0x329   : > { %v877_v60 = vmul.f32 %v1554_v12, %v1858_v5  ;;  %1437 = vmatmul.mubr.msk.f32.gmra.mrb[6].mxu0 %vm449_vm3, %v919_v10  ;;  %v905_v16 = vadd.f32 %v1349_v38, %v890_v11  ;;  %v1059_v5 = vld [vmem:[%s429_s29 + $0x8] sm:$0xff] }
 0x32a   : > { %1439 = vmatprep.mubr.msk.f32.mxu0 %vm449_vm3, %v920_v13  ;;  %v906_v61 = vadd.f32 %v1349_v38, %v891_v15 }
 0x32b   : > { %v921_v18 = vmul.f32 %v913_v14, %v905_v16  ;;  %v892_v20 = vmul.f32 %v1348_v32, %v877_v60 }
 0x32c   : > { %v922_v21 = vmul.f32 %v914_v17, %v906_v61 }
 0x32d   : > { %1440 = vmatmul.mubr.msk.f32.gmra.mrb[8].mxu0 %vm449_vm3, %v921_v18  ;;  %v907_v23 = vadd.f32 %v1349_v38, %v892_v20 }
 0x32e   : > { %1442 = vmatprep.mubr.msk.f32.mxu0 %vm449_vm3, %v922_v21 }
 0x32f   : > { %v923_v19 = vmul.f32 %v915_v22, %v907_v23 }
 0x331   : > { %1443 = vmatmul.mubr.msk.f32.gmra.mrb[10].mxu0 %vm449_vm3, %v923_v19 }
 0x3f7   : > { %v1435_v25 = vpop.f32.mrb[4].mxu0 }
 0x3f8   : > { %v1067_v26 = vadd.f32 %v1435_v25, %v1059_v5  ;;  %v1019_v3 = vpop.f32.mrb[5].mxu0 }
 0x3f9   : > { %v1066_v27 = vadd.f32 %v1058_v24, %v1019_v3 }
 0x3fa   : > { %v1078_v29 = vsel %vm1074_vm4, %v1067_v26, 0.0 }
 0x3fb   : > { %1079 = vadd.xlane.f32.xlu1 %v1078_v29  ;;  %v1075_v32 = vsel %vm1074_vm4, %v1066_v27, 0.0 }
 0x3fc   : > { %v1438_v31 = vpop.f32.mrb[6].mxu0  ;;  %1076 = vadd.xlane.f32.xlu0 %v1075_v32 }
 0x3fd   : > { %v1069_v33 = vadd.f32 %v1438_v31, %v1061_v28  ;;  %v1029_v34 = vpop.f32.mrb[7].mxu0 }
 0x3fe   : > { %v1068_v36 = vadd.f32 %v1060_v30, %v1029_v34 }
 0x3ff   : > { %v1084_v38 = vsel %vm1074_vm4, %v1069_v33, 0.0 }
 0x400   : > { %1085 = vadd.xlane.f32.xlu1 %v1084_v38  ;;  %v1441_v40 = vpop.f32.mrb[8].mxu0  ;;  %v1081_v43 = vsel %vm1074_vm4, %v1068_v36, 0.0 }
 0x401   : > { %v1071_v44 = vadd.f32 %v1441_v40, %v1063_v37  ;;  %1082 = vadd.xlane.f32.xlu0 %v1081_v43  ;;  %v1039_v45 = vpop.f32.mrb[9].mxu0 }
 0x402   : > { %v1070_v46 = vadd.f32 %v1062_v39, %v1039_v45 }
 0x403   : > { %v1090_v48 = vsel %vm1074_vm4, %v1071_v44, 0.0 }
 0x404   : > { %1091 = vadd.xlane.f32.xlu1 %v1090_v48  ;;  %v1444_v49 = vpop.f32.mrb[10].mxu0  ;;  %v1087_v52 = vsel %vm1074_vm4, %v1070_v46, 0.0 }
 0x405   : > { %v1073_v53 = vadd.f32 %v1444_v49, %v1065_v47  ;;  %1088 = vadd.xlane.f32.xlu0 %v1087_v52  ;;  %v1049_v54 = vpop.f32.mrb[11].mxu0 }
 0x406   : > { %v1072_v55 = vadd.f32 %v1064_v35, %v1049_v54 }
 0x407   : > { %v1096_v56 = vsel %vm1074_vm4, %v1073_v53, 0.0 }
 0x408   : > { %1097 = vadd.xlane.f32.xlu1 %v1096_v56  ;;  %v1093_v57 = vsel %vm1074_vm4, %v1072_v55, 0.0 }
 0x409   : > { %1094 = vadd.xlane.f32.xlu0 %v1093_v57  ;;  %v1359_v57 = vld [vmem:[%s2059_s9] ss:$0 sm:$0xff] }
 0x488   : > { %v1080_v58 = vpop.xlane.xlu1 %1079 }
 0x489   : > { %v1101_v59 = vmul.f32 0.125, %v1080_v58  ;;  %v1077_v41 = vpop.xlane.xlu0 %1076 }
 0x48a   : > { %v1100_v62 = vmul.f32 0.125, %v1077_v41 }
 0x48b   : > { %v1923_v63 = vsub.f32 %v1067_v26, %v1101_v59 }
 0x48c   : > { %v1925_v42 = vsub.f32 %v1066_v27, %v1100_v62 }
 0x48d   : > { %v1086_v0 = vpop.xlane.xlu1 %1085  ;;  %v1117_v4 = vmul.f32 %v1923_v63, %v1923_v63 }
 0x48e   : > { %v1103_v1 = vmul.f32 0.125, %v1086_v0  ;;  %v1083_v2 = vpop.xlane.xlu0 %1082  ;;  %v1116_v7 = vmul.f32 %v1925_v42, %v1925_v42  ;;  %v1360_v0 = vld [vmem:[%s2060_s10] ss:$0 sm:$0xff] }
 0x48f   : > { %v1102_v6 = vmul.f32 0.125, %v1083_v2  ;;  %v1127_v8 = vsel %vm1074_vm4, %v1117_v4, 0.0 }
 0x490   : > { %v1931_v50 = vsub.f32 %v1069_v33, %v1103_v1  ;;  %1128 = vadd.xlane.f32.xlu1 %v1127_v8  ;;  %v1124_v10 = vsel %vm1074_vm4, %v1116_v7, 0.0 }
 0x491   : > { %v1934_v9 = vsub.f32 %v1068_v36, %v1102_v6  ;;  %v1092_v51 = vpop.xlane.xlu1 %1091  ;;  %1125 = vadd.xlane.f32.xlu0 %v1124_v10 }
 0x492   : > { %v1105_v11 = vmul.f32 0.125, %v1092_v51  ;;  %v1089_v12 = vpop.xlane.xlu0 %1088  ;;  %v1119_v13 = vmul.f32 %v1931_v50, %v1931_v50 }
 0x493   : > { %v1104_v14 = vmul.f32 0.125, %v1089_v12  ;;  %v1118_v15 = vmul.f32 %v1934_v9, %v1934_v9 }
 0x494   : > { %v1941_v60 = vsub.f32 %v1071_v44, %v1105_v11  ;;  %v1133_v16 = vsel %vm1074_vm4, %v1119_v13, 0.0 }
 0x495   : > { %v1944_v17 = vsub.f32 %v1070_v46, %v1104_v14  ;;  %1134 = vadd.xlane.f32.xlu1 %v1133_v16  ;;  %v1098_v61 = vpop.xlane.xlu1 %1097  ;;  %v1130_v18 = vsel %vm1074_vm4, %v1118_v15, 0.0 }
 0x496   : > { %v1107_v20 = vmul.f32 0.125, %v1098_v61  ;;  %1131 = vadd.xlane.f32.xlu0 %v1130_v18  ;;  %v1095_v21 = vpop.xlane.xlu0 %1094  ;;  %v1121_v22 = vmul.f32 %v1941_v60, %v1941_v60 }
 0x497   : > { %v1106_v23 = vmul.f32 0.125, %v1095_v21  ;;  %v1120_v19 = vmul.f32 %v1944_v17, %v1944_v17 }
 0x498   : > { %v1951_v5 = vsub.f32 %v1073_v53, %v1107_v20  ;;  %v1139_v24 = vsel %vm1074_vm4, %v1121_v22, 0.0 }
 0x499   : > { %v1954_v25 = vsub.f32 %v1072_v55, %v1106_v23  ;;  %1140 = vadd.xlane.f32.xlu1 %v1139_v24  ;;  %v1136_v26 = vsel %vm1074_vm4, %v1120_v19, 0.0 }
 0x49a   : > { %1137 = vadd.xlane.f32.xlu0 %v1136_v26  ;;  %v1123_v3 = vmul.f32 %v1951_v5, %v1951_v5 }
 0x49b   : > { %v1122_v27 = vmul.f32 %v1954_v25, %v1954_v25 }
 0x49c   : > { %v1145_v28 = vsel %vm1074_vm4, %v1123_v3, 0.0 }
 0x49d   : > { %1146 = vadd.xlane.f32.xlu1 %v1145_v28  ;;  %v1142_v29 = vsel %vm1074_vm4, %v1122_v27, 0.0 }
 0x49e   : > { %1143 = vadd.xlane.f32.xlu0 %v1142_v29 }
 0x51d   : > { %v1129_v30 = vpop.xlane.xlu1 %1128 }
 0x51e   : > { %v1149_v31 = vmul.f32 0.125, %v1129_v30  ;;  %v1126_v32 = vpop.xlane.xlu0 %1125 }
 0x51f   : > { %v1148_v33 = vmul.f32 0.125, %v1126_v32 }
 0x520   : > { %v1157_v34 = vadd.f32 1e-05, %v1149_v31 }
 0x521   : > { %v1156_v36 = vadd.f32 1e-05, %v1148_v33 }
 0x522   : > { %v1135_v37 = vpop.xlane.xlu1 %1134  ;;  %1555 = vrsqrt.f32 %v1157_v34 }
 0x523   : > { %v1151_v38 = vmul.f32 0.125, %v1135_v37  ;;  %v1132_v39 = vpop.xlane.xlu0 %1131  ;;  %1557 = vrsqrt.f32 %v1156_v36 }
 0x524   : > { %v1150_v40 = vmul.f32 0.125, %v1132_v39 }
 0x525   : > { %v1159_v43 = vadd.f32 1e-05, %v1151_v38 }
 0x526   : > { %v1158_v44 = vadd.f32 1e-05, %v1150_v40  ;;  %v1141_v45 = vpop.xlane.xlu1 %1140 }
 0x527   : > { %1559 = vrsqrt.f32 %v1159_v43  ;;  %v1153_v46 = vmul.f32 0.125, %v1141_v45  ;;  %v1138_v47 = vpop.xlane.xlu0 %1137 }
 0x528   : > { %1561 = vrsqrt.f32 %v1158_v44  ;;  %v1152_v48 = vmul.f32 0.125, %v1138_v47 }
 0x529   : > { %v1161_v35 = vadd.f32 1e-05, %v1153_v46 }
 0x52a   : > { %v1160_v49 = vadd.f32 1e-05, %v1152_v48  ;;  %v1147_v52 = vpop.xlane.xlu1 %1146 }
 0x52b   : > { %1563 = vrsqrt.f32 %v1161_v35  ;;  %v1155_v53 = vmul.f32 0.125, %v1147_v52  ;;  %v1144_v54 = vpop.xlane.xlu0 %1143 }
 0x52c   : > { %1565 = vrsqrt.f32 %v1160_v49  ;;  %v1154_v55 = vmul.f32 0.125, %v1144_v54  ;;  %v1556_v56 = vpop.eup %1555 }
 0x52d   : > { %v1163_v58 = vadd.f32 1e-05, %v1155_v53  ;;  %v1558_v59 = vpop.eup %1557  ;;  %v1173_v41 = vmul.f32 %v1556_v56, %v1923_v63 }
 0x52e   : > { %v1162_v62 = vadd.f32 1e-05, %v1154_v55  ;;  %v1172_v1 = vmul.f32 %v1558_v59, %v1925_v42 }
 0x52f   : > { %1567 = vrsqrt.f32 %v1163_v58  ;;  %v1188_v2 = vmul.f32 %v1359_v57, %v1173_v41 }
 0x530   : > { %1569 = vrsqrt.f32 %v1162_v62  ;;  %v1187_v6 = vmul.f32 %v1359_v57, %v1172_v1 }
 0x531   : > { %v1560_v4 = vpop.eup %1559  ;;  %v1203_v8 = vadd.f32 %v1360_v0, %v1188_v2 }
 0x532   : > { %v1562_v7 = vpop.eup %1561  ;;  %v1175_v51 = vmul.f32 %v1560_v4, %v1931_v50  ;;  %v1202_v10 = vadd.f32 %v1360_v0, %v1187_v6 }
 0x533   : > { %v1174_v11 = vmul.f32 %v1562_v7, %v1934_v9  ;;  %1211 = vst.msk [vmem:[%s1976_s22 + $0x8] sm:$0xff] %vm1074_vm4, %v1203_v8 }
 0x534   : > { %v1190_v63 = vmul.f32 %v1359_v57, %v1175_v51  ;;  %1210 = vst.msk [vmem:[%s1976_s22] sm:$0xff] %vm1074_vm4, %v1202_v10 }
 0x535   : > { %v1564_v42 = vpop.eup %1563  ;;  %v1189_v12 = vmul.f32 %v1359_v57, %v1174_v11 }
 0x536   : > { %v1566_v13 = vpop.eup %1565  ;;  %v1205_v50 = vadd.f32 %v1360_v0, %v1190_v63  ;;  %v1177_v9 = vmul.f32 %v1564_v42, %v1941_v60 }
 0x537   : > { %v1204_v14 = vadd.f32 %v1360_v0, %v1189_v12  ;;  %v1176_v15 = vmul.f32 %v1566_v13, %v1944_v17 }
 0x538   : > { %1213 = vst.msk [vmem:[%s1976_s22 + $0x18] sm:$0xff] %vm1074_vm4, %v1205_v50  ;;  %v1192_v16 = vmul.f32 %v1359_v57, %v1177_v9 }
 0x539   : > { %v1568_v61 = vpop.eup %1567  ;;  %1212 = vst.msk [vmem:[%s1976_s22 + $0x10] sm:$0xff] %vm1074_vm4, %v1204_v14  ;;  %v1191_v18 = vmul.f32 %v1359_v57, %v1176_v15 }
 0x53a   : > { %v1570_v20 = vpop.eup %1569  ;;  %v1207_v21 = vadd.f32 %v1360_v0, %v1192_v16  ;;  %v1179_v22 = vmul.f32 %v1568_v61, %v1951_v5 }
 0x53b   : > { %v1206_v23 = vadd.f32 %v1360_v0, %v1191_v18  ;;  %v1178_v60 = vmul.f32 %v1570_v20, %v1954_v25 }
 0x53c   : > { %1215 = vst.msk [vmem:[%s1976_s22 + $0x28] sm:$0xff] %vm1074_vm4, %v1207_v21  ;;  %v1194_v17 = vmul.f32 %v1359_v57, %v1179_v22 }
 0x53d   : > { %1214 = vst.msk [vmem:[%s1976_s22 + $0x20] sm:$0xff] %vm1074_vm4, %v1206_v23  ;;  %v1193_v19 = vmul.f32 %v1359_v57, %v1178_v60 }
 0x53e   : > { %v1209_v24 = vadd.f32 %v1360_v0, %v1194_v17 }
 0x53f   : > { %v1208_v5 = vadd.f32 %v1360_v0, %v1193_v19 }
 0x540   : > { %1217 = vst.msk [vmem:[%s1976_s22 + $0x38] sm:$0xff] %vm1074_vm4, %v1209_v24 }
 0x541   : > { %1216 = vst.msk [vmem:[%s1976_s22 + $0x30] sm:$0xff] %vm1074_vm4, %v1208_v5 }
 0x542   : > { %1584 = shalt.err (!%p1581_p3)
}
 0x543   : > { %s1585_s15 = scalar_lea.hbm %s1999_s12, 1024  ;;  %s1589_s30 = scalar_lea.hbm %s2061_s11, 2048 }
 0x544   : > { %p1586_p4 = scmp.ne.s32.totalorder %s1999_s12, %s1585_s15  ;;  %p1590_p9 = scmp.lt.u32.totalorder %s1999_s12, %s2061_s11 }
 0x545   : > { %p1591_p10 = scmp.lt.u32.totalorder %s1589_s30, %s1585_s15  ;;  %p1593_p12 = scmp.lt.u32.totalorder %s1585_s15, %s1999_s12 }
 0x546   : > { %p1587_p7 = pnand %p1586_p4, %p1737_p5 }
 0x547   : > { %p1592_p11 = por %p1591_p10, %p1590_p9 }
 0x548   : > { %p1588_p8 = pneg %p1587_p7 }
 0x549   : > { %p1594_p13 = por %p1593_p12, %p1592_p11 }
 0x54b   : > { %p1595_p0 = pnand %p1594_p13, %p1588_p8 }
 0x54d   : > { %1598 = shalt.err (!%p1595_p0)
}
 0x54e   : > { %s1637_s13 = smov 128   ;;  %s1638_s24 = smov 8  }
 0x54f   : > { %1465 = dma.vmem_to_hbm [thread:$0]  (%p1737_p5), %s2001_s25, 1024, %s1999_s12, %s2009_s21, %s1637_s13, %s1637_s13, %s1638_s24  }
 0x550 PF: > { %p1471_p1 = scmp.ge.s32.totalorder %s1633_s20, 2  ;;  %s1247_s22 = sand.u32 1, %s1621_s17  }
 0x551   : > { %s1248_s15 = scalar_lea.sflag [#allocation3], %s1247_s22 }
 0x552   : > { %p1468_p2 = pnand %p1471_p1, %p1741_p6 }
 0x554   : > { %1616 = dma.done.wait (!%p1468_p2), %s1248_s15, 1024  }
 0x555   : > { %1618 = vsyncadd (!%p1468_p2), %s1248_s15, 4294966272  ;;  %p21_p3 = scmp.ge.s32.totalorder %s1724_s23, 4   ;;  %s2066_s17 = smov %s1625_s18 }
 0x556   : > { %s2067_s18 = smov %s1629_s19  ;;  %s2068_s19 = smov %s1735_s26 }
 0x557   : > { %s2069_s20 = smov %s1724_s23  ;;  %23 = sbr.rel (!%p21_p3) target bundleno = 3 (0x3), region = 105 }
 0x55e   :  { %1253 = vsyncpa [#allocation3], 1 }
 0x55f   :  { %1255 = vsyncpa [#allocation3 + $0x1], 1 }

</bundles_post_ra>
